<compile_context>
chip_gen: v5e
topology: v5e:2x2
jax: 0.10.0
libtpu: 0.0.40
codegen_flags: <defaults>
</compile_context>

<pallas_src>
import jax
import jax.numpy as jnp
from jax.experimental import pallas as pl
from jax.experimental.pallas import tpu as pltpu

B = 8          # graphs per call
N = 128        # nodes per graph
C = 32         # in_cha == out_cha == dim_h
C2 = 2 * C     # hidden dim of FF block
C4 = 4 * C     # fused projection width
K = 3          # Chebyshev order
E = 512        # directed edges per graph
EPS = 1e-5


def _bn(x, gamma, beta):
    """BatchNorm1d over the node axis (training-mode batch statistics)."""
    mean = jnp.mean(x, axis=0, keepdims=True)
    var = jnp.mean((x - mean) ** 2, axis=0, keepdims=True)
    return (x - mean) * jax.lax.rsqrt(var + EPS) * gamma + beta


def gps_kernel(x_ref, lhat_ref, wproj_ref, wcheb_ref, wff1_ref, wff2_ref,
               misc_ref, o_ref):
    x = x_ref[...]                                   # (N, C) f32
    xb = x.astype(jnp.bfloat16)
    lhat = lhat_ref[...]                             # (N, N) bf16

    misc = misc_ref[...]                             # (8, 128) f32 packed params
    bfused = misc[0:1, :]                            # [cheb_b | bq | bk | bv@Wo+bo]
    g1 = misc[1:2, 0:C2]                             # [gamma1_local | gamma1_attn]
    b1 = misc[2:3, 0:C2]
    g2 = misc[3:4, 0:C]
    b2 = misc[4:5, 0:C]

    # ---- fused lane-dense x projection (single 32-contraction, 128-lane dot) ----
    # columns: [ChebConv W0 term | q | k | v @ Wout]; out_proj bias folded into
    # bfused (exact because softmax rows sum to 1).  q/k/v are sliced once each
    # and each feeds exactly one consumer matmul.
    y = jnp.dot(xb, wproj_ref[...], preferred_element_type=jnp.float32) + bfused
    h0 = y[:, 0:C]
    q = y[:, C:2 * C]
    k_ = y[:, 2 * C:3 * C]
    v = y[:, 3 * C:4 * C]

    # ---- local model: ChebConv (K=3), orders 1&2 fused into one 64-deep dot ----
    # TODO(synk): kanChebConv's KAN-based per-order transform is approximated by
    # the standard linear Chebyshev transform.
    t1 = jnp.dot(lhat, xb, preferred_element_type=jnp.float32)             # (N, C)
    t2 = 2.0 * jnp.dot(lhat, t1.astype(jnp.bfloat16),
                       preferred_element_type=jnp.float32) - x             # (N, C)
    t12 = jnp.concatenate([t1, t2], axis=1).astype(jnp.bfloat16)           # (N, 2C)
    h_local = h0 + jnp.dot(t12, wcheb_ref[...],
                           preferred_element_type=jnp.float32)             # (N, C)
    h_local = x + h_local                                                  # residual

    # ---- global model: single-head self-attention ----
    scale = 1.0 / (float(C) ** 0.5)                  # head_dim == C (1 head)
    s = jnp.dot(q.astype(jnp.bfloat16), k_.astype(jnp.bfloat16).T,
                preferred_element_type=jnp.float32) * scale                # (N, N)
    s = s - jnp.max(s, axis=-1, keepdims=True)
    p = jnp.exp(s)
    p = p * pl.reciprocal(jnp.sum(p, axis=-1, keepdims=True), approx=True)
    h_attn = jnp.dot(p.astype(jnp.bfloat16), v.astype(jnp.bfloat16),
                     preferred_element_type=jnp.float32)                   # (N, C)
    h_attn = x + h_attn                                                    # residual

    # ---- merged norm1_local / norm1_attn: one BN pass over 2C lanes ----
    hcat = _bn(jnp.concatenate([h_local, h_attn], axis=1), g1, b1)         # (N, 2C)
    h = hcat[:, 0:C] + hcat[:, C:2 * C]

    # ---- feed-forward block (KAN layers, base SiLU-linear path) ----
    # TODO(synk): KAN B-spline term omitted; only the base linear(SiLU(x)) path
    # of each KAN layer is implemented.
    s1 = h * jax.nn.sigmoid(h)                                             # SiLU
    y1 = jnp.dot(s1.astype(jnp.bfloat16), wff1_ref[...],
                 preferred_element_type=jnp.float32)                       # (N, 2C)
    y1 = jnp.maximum(y1, 0.0)                                              # ReLU
    s2 = y1 * jax.nn.sigmoid(y1)
    y2 = jnp.dot(s2.astype(jnp.bfloat16), wff2_ref[...],
                 preferred_element_type=jnp.float32)                       # (N, C)
    h = _bn(h + y2, g2, b2)                                                # norm2

    o_ref[...] = h


def build_scaled_laplacian(edge_index, n):
    """Dense L_hat = 2*L/lambda_max - I with lambda_max=2  ==> -D^-1/2 A D^-1/2."""
    src, dst = edge_index[0], edge_index[1]
    a = jnp.zeros((n, n), jnp.float32)
    a = a.at[src, dst].set(1.0)
    a = a.at[dst, src].set(1.0)                         # symmetrize
    a = a * (1.0 - jnp.eye(n, dtype=jnp.float32))       # drop self loops
    deg = jnp.sum(a, axis=1)
    dinv = jnp.where(deg > 0, jax.lax.rsqrt(deg), 0.0)
    return -(dinv[:, None] * a * dinv[None, :]).astype(jnp.float32)


def _prepare(params):
    """Fold / pack parameters into the kernel's fused bf16 layout."""
    wq = params["in_proj_w"][:, 0:C]
    wk = params["in_proj_w"][:, C:2 * C]
    wv = params["in_proj_w"][:, 2 * C:3 * C]
    wo = params["out_proj_w"]
    # fused x-projection: [W0 | Wq | Wk | Wv @ Wout]
    wproj = jnp.concatenate([params["cheb_w"][0], wq, wk, wv @ wo], axis=1)    # (C, 4C)

    bq = params["in_proj_b"][:, 0:C]
    bk = params["in_proj_b"][:, C:2 * C]
    bv = params["in_proj_b"][:, 2 * C:3 * C]
    bfused = jnp.concatenate(
        [params["cheb_b"], bq, bk, bv @ wo + params["out_proj_b"]], axis=1)    # (1, 4C)

    wcheb12 = jnp.concatenate([params["cheb_w"][1], params["cheb_w"][2]],
                              axis=0)                                          # (2C, C)

    bn = params["bn"]
    misc = jnp.zeros((8, 128), jnp.float32)
    misc = misc.at[0, :].set(bfused[0])
    misc = misc.at[1, 0:C2].set(jnp.concatenate([bn[0], bn[2]]))   # norm1 gammas
    misc = misc.at[2, 0:C2].set(jnp.concatenate([bn[1], bn[3]]))   # norm1 betas
    misc = misc.at[3, 0:C].set(bn[4])                              # norm2 gamma
    misc = misc.at[4, 0:C].set(bn[5])                              # norm2 beta

    return (wproj.astype(jnp.bfloat16),
            wcheb12.astype(jnp.bfloat16),
            params["ff_w1"].astype(jnp.bfloat16),
            params["ff_w2"].astype(jnp.bfloat16),
            misc)


@jax.jit
def gps_layer(x, edge_index, params):
    b = x.shape[0]
    lhat = jax.vmap(lambda ei: build_scaled_laplacian(ei, N))(edge_index)
    lhat = lhat.astype(jnp.bfloat16)
    wproj, wcheb12, wff1, wff2, misc = _prepare(params)

    shared = lambda i: (0, 0)   # parameter blocks resident across grid steps
    out = pl.pallas_call(
        gps_kernel,
        out_shape=jax.ShapeDtypeStruct((b, N, C), jnp.float32),
        grid=(b,),
        in_specs=[
            pl.BlockSpec((None, N, C), lambda i: (i, 0, 0)),   # x
            pl.BlockSpec((None, N, N), lambda i: (i, 0, 0)),   # lhat
            pl.BlockSpec((C, C4), shared),                     # fused x-projection
            pl.BlockSpec((C2, C), shared),                     # cheb W1;W2
            pl.BlockSpec((C, C2), shared),                     # ff_w1
            pl.BlockSpec((C2, C), shared),                     # ff_w2
            pl.BlockSpec((8, 128), shared),                    # packed biases / BN
        ],
        out_specs=pl.BlockSpec((None, N, C), lambda i: (i, 0, 0)),
        compiler_params=pltpu.CompilerParams(
            dimension_semantics=("parallel",)),
    )(x, lhat, wproj, wcheb12, wff1, wff2, misc)
    return out


def init_params(key):
    ks = jax.random.split(key, 8)
    p = {
        # ChebConv weights, input-major so the kernel does t_k @ W_k
        "cheb_w": 0.1 * jax.random.normal(ks[0], (K, C, C), jnp.float32),
        "cheb_b": 0.02 * jax.random.normal(ks[1], (1, C), jnp.float32),
        # MultiheadAttention (1 head) — in_proj stored as (C, 3C): qkv = x @ W + b
        "in_proj_w": 0.1 * jax.random.normal(ks[2], (C, 3 * C), jnp.float32),
        "in_proj_b": 0.02 * jax.random.normal(ks[3], (1, 3 * C), jnp.float32),
        "out_proj_w": 0.1 * jax.random.normal(ks[4], (C, C), jnp.float32),
        "out_proj_b": 0.02 * jax.random.normal(ks[5], (1, C), jnp.float32),
        # BatchNorm affine params: rows = [g1l, b1l, g1a, b1a, g2, b2]
        "bn": jnp.stack([jnp.ones((C,), jnp.float32),
                         jnp.zeros((C,), jnp.float32),
                         jnp.ones((C,), jnp.float32),
                         jnp.zeros((C,), jnp.float32),
                         jnp.ones((C,), jnp.float32),
                         jnp.zeros((C,), jnp.float32)], axis=0),
        # KAN base weights (pre-transposed): y = silu(x) @ W
        "ff_w1": 0.1 * jax.random.normal(ks[6], (C, C2), jnp.float32),
        "ff_w2": 0.1 * jax.random.normal(ks[7], (C2, C), jnp.float32),
    }
    return p


if __name__ == "__main__":
    key = jax.random.PRNGKey(0)
    kx, ke, kp = jax.random.split(key, 3)

    x = jax.random.normal(kx, (B, N, C), jnp.float32)

    # deterministic random graphs: ring edges + random extra edges, per graph
    ring_src = jnp.arange(N, dtype=jnp.int32)
    ring_dst = (ring_src + 1) % N
    ring = jnp.stack([ring_src, ring_dst], axis=0)                     # (2, N)
    rnd = jax.random.randint(ke, (B, 2, E - N), 0, N, dtype=jnp.int32)
    edge_index = jnp.concatenate(
        [jnp.broadcast_to(ring[None], (B, 2, N)), rnd], axis=2)        # (B, 2, E)

    params = init_params(kp)

    out = gps_layer(x, edge_index, params)
    jax.block_until_ready(out)
    assert out.shape == (B, N, C) and out.dtype == jnp.float32
    assert bool(jnp.all(jnp.isfinite(out)))
    print("KERNEL_OK")
</pallas_src>

<mosaic_0001>
module attributes {stable_mosaic.version = 11 : i64} {
  func.func @gps_kernel(%arg0: i32, %arg1: memref<1x128x32xf32, #tpu.memory_space<vmem>>, %arg2: memref<1x128x128xbf16, #tpu.memory_space<vmem>>, %arg3: memref<32x128xbf16, #tpu.memory_space<vmem>>, %arg4: memref<64x32xbf16, #tpu.memory_space<vmem>>, %arg5: memref<32x64xbf16, #tpu.memory_space<vmem>>, %arg6: memref<64x32xbf16, #tpu.memory_space<vmem>>, %arg7: memref<8x128xf32, #tpu.memory_space<vmem>>, %arg8: memref<1x128x32xf32, #tpu.memory_space<vmem>>) attributes {dimension_semantics = [#tpu.dimension_semantics<parallel>], iteration_bounds = array<i64: 8>, scalar_prefetch = 0 : i64, scratch_operands = 0 : i64, tpu.core_type = #tpu.core_type<tc>, window_params = [{transform_indices = @transform_0, window_bounds = array<i64: 1, 128, 32>}, {transform_indices = @transform_1, window_bounds = array<i64: 1, 128, 128>}, {pipeline_mode = #tpu.pipeline_mode<synchronous>, transform_indices = @transform_2, window_bounds = array<i64: 32, 128>}, {pipeline_mode = #tpu.pipeline_mode<synchronous>, transform_indices = @transform_3, window_bounds = array<i64: 64, 32>}, {pipeline_mode = #tpu.pipeline_mode<synchronous>, transform_indices = @transform_4, window_bounds = array<i64: 32, 64>}, {pipeline_mode = #tpu.pipeline_mode<synchronous>, transform_indices = @transform_5, window_bounds = array<i64: 64, 32>}, {pipeline_mode = #tpu.pipeline_mode<synchronous>, transform_indices = @transform_6, window_bounds = array<i64: 8, 128>}, {transform_indices = @transform_7, window_bounds = array<i64: 1, 128, 32>}]} {
    %c0 = arith.constant 0 : index
    %c0_0 = arith.constant 0 : index
    %c0_1 = arith.constant 0 : index
    %0 = vector.load %arg1[%c0, %c0_0, %c0_1] : memref<1x128x32xf32, #tpu.memory_space<vmem>>, vector<1x128x32xf32>
    %1 = vector.shape_cast %0 : vector<1x128x32xf32> to vector<128x32xf32>
    %2 = arith.truncf %1 : vector<128x32xf32> to vector<128x32xbf16>
    %c0_2 = arith.constant 0 : index
    %c0_3 = arith.constant 0 : index
    %c0_4 = arith.constant 0 : index
    %3 = vector.load %arg2[%c0_2, %c0_3, %c0_4] : memref<1x128x128xbf16, #tpu.memory_space<vmem>>, vector<1x128x128xbf16>
    %4 = vector.shape_cast %3 : vector<1x128x128xbf16> to vector<128x128xbf16>
    %c0_5 = arith.constant 0 : index
    %c0_6 = arith.constant 0 : index
    %5 = vector.load %arg7[%c0_5, %c0_6] : memref<8x128xf32, #tpu.memory_space<vmem>>, vector<8x128xf32>
    %6 = vector.extract_strided_slice %5 {offsets = [0, 0], sizes = [1, 128], strides = [1, 1]} : vector<8x128xf32> to vector<1x128xf32>
    %7 = vector.extract_strided_slice %5 {offsets = [1, 0], sizes = [1, 64], strides = [1, 1]} : vector<8x128xf32> to vector<1x64xf32>
    %8 = vector.extract_strided_slice %5 {offsets = [2, 0], sizes = [1, 64], strides = [1, 1]} : vector<8x128xf32> to vector<1x64xf32>
    %9 = vector.extract_strided_slice %5 {offsets = [3, 0], sizes = [1, 32], strides = [1, 1]} : vector<8x128xf32> to vector<1x32xf32>
    %10 = vector.extract_strided_slice %5 {offsets = [4, 0], sizes = [1, 32], strides = [1, 1]} : vector<8x128xf32> to vector<1x32xf32>
    %c0_7 = arith.constant 0 : index
    %c0_8 = arith.constant 0 : index
    %11 = vector.load %arg3[%c0_7, %c0_8] : memref<32x128xbf16, #tpu.memory_space<vmem>>, vector<32x128xbf16>
    %cst = arith.constant dense<0.000000e+00> : vector<128x128xf32>
    %12 = tpu.matmul %2, %11, %cst {dimension_numbers = #tpu.dot_dimension_numbers<[1], [0], [0], [1], [0, 0, 1, 1], [], []>} : vector<128x32xbf16>, vector<32x128xbf16>, vector<128x128xf32> -> vector<128x128xf32>
    %13 = vector.broadcast %6 : vector<1x128xf32> to vector<128x128xf32>
    %14 = arith.addf %12, %13 : vector<128x128xf32>
    %15 = vector.extract_strided_slice %14 {offsets = [0, 0], sizes = [128, 32], strides = [1, 1]} : vector<128x128xf32> to vector<128x32xf32>
    %16 = vector.extract_strided_slice %14 {offsets = [0, 32], sizes = [128, 32], strides = [1, 1]} : vector<128x128xf32> to vector<128x32xf32>
    %17 = vector.extract_strided_slice %14 {offsets = [0, 64], sizes = [128, 32], strides = [1, 1]} : vector<128x128xf32> to vector<128x32xf32>
    %18 = vector.extract_strided_slice %14 {offsets = [0, 96], sizes = [128, 32], strides = [1, 1]} : vector<128x128xf32> to vector<128x32xf32>
    %cst_9 = arith.constant dense<0.000000e+00> : vector<128x32xf32>
    %19 = tpu.matmul %4, %2, %cst_9 {dimension_numbers = #tpu.dot_dimension_numbers<[1], [0], [0], [1], [0, 0, 1, 1], [], []>} : vector<128x128xbf16>, vector<128x32xbf16>, vector<128x32xf32> -> vector<128x32xf32>
    %20 = arith.truncf %19 : vector<128x32xf32> to vector<128x32xbf16>
    %cst_10 = arith.constant dense<0.000000e+00> : vector<128x32xf32>
    %21 = tpu.matmul %4, %20, %cst_10 {dimension_numbers = #tpu.dot_dimension_numbers<[1], [0], [0], [1], [0, 0, 1, 1], [], []>} : vector<128x128xbf16>, vector<128x32xbf16>, vector<128x32xf32> -> vector<128x32xf32>
    %cst_11 = arith.constant 2.000000e+00 : f32
    %22 = vector.broadcast %cst_11 : f32 to vector<128x32xf32>
    %23 = arith.mulf %22, %21 : vector<128x32xf32>
    %24 = arith.subf %23, %1 : vector<128x32xf32>
    %25 = tpu.concatenate %19, %24 in 1 : vector<128x32xf32>, vector<128x32xf32> -> vector<128x64xf32>
    %26 = arith.truncf %25 : vector<128x64xf32> to vector<128x64xbf16>
    %c0_12 = arith.constant 0 : index
    %c0_13 = arith.constant 0 : index
    %27 = vector.load %arg4[%c0_12, %c0_13] : memref<64x32xbf16, #tpu.memory_space<vmem>>, vector<64x32xbf16>
    %cst_14 = arith.constant dense<0.000000e+00> : vector<128x32xf32>
    %28 = tpu.matmul %26, %27, %cst_14 {dimension_numbers = #tpu.dot_dimension_numbers<[1], [0], [0], [1], [0, 0, 1, 1], [], []>} : vector<128x64xbf16>, vector<64x32xbf16>, vector<128x32xf32> -> vector<128x32xf32>
    %29 = arith.addf %15, %28 : vector<128x32xf32>
    %30 = arith.addf %1, %29 : vector<128x32xf32>
    %31 = arith.truncf %16 : vector<128x32xf32> to vector<128x32xbf16>
    %32 = arith.truncf %17 : vector<128x32xf32> to vector<128x32xbf16>
    %33 = tpu.transpose %32, [1, 0] : vector<128x32xbf16> -> vector<32x128xbf16>
    %cst_15 = arith.constant dense<0.000000e+00> : vector<128x128xf32>
    %34 = tpu.matmul %31, %33, %cst_15 {dimension_numbers = #tpu.dot_dimension_numbers<[1], [0], [0], [1], [0, 0, 1, 1], [], []>} : vector<128x32xbf16>, vector<32x128xbf16>, vector<128x128xf32> -> vector<128x128xf32>
    %cst_16 = arith.constant 0.176776692 : f32
    %35 = vector.broadcast %cst_16 : f32 to vector<128x128xf32>
    %36 = arith.mulf %34, %35 : vector<128x128xf32>
    %cst_17 = arith.constant dense<0xFF800000> : vector<128xf32>
    %37 = vector.multi_reduction <maximumf>, %36, %cst_17 [1] : vector<128x128xf32> to vector<128xf32>
    %38 = vector.shape_cast %37 : vector<128xf32> to vector<128x1xf32>
    %39 = vector.broadcast %38 : vector<128x1xf32> to vector<128x128xf32>
    %40 = arith.subf %36, %39 : vector<128x128xf32>
    %41 = math.exp %40 : vector<128x128xf32>
    %cst_18 = arith.constant dense<0.000000e+00> : vector<128xf32>
    %42 = vector.multi_reduction <add>, %41, %cst_18 [1] : vector<128x128xf32> to vector<128xf32>
    %43 = vector.shape_cast %42 : vector<128xf32> to vector<128x1xf32>
    %44 = tpu.reciprocal %43 {approx = true} : vector<128x1xf32> -> vector<128x1xf32>
    %45 = vector.broadcast %44 : vector<128x1xf32> to vector<128x128xf32>
    %46 = arith.mulf %41, %45 : vector<128x128xf32>
    %47 = arith.truncf %46 : vector<128x128xf32> to vector<128x128xbf16>
    %48 = arith.truncf %18 : vector<128x32xf32> to vector<128x32xbf16>
    %cst_19 = arith.constant dense<0.000000e+00> : vector<128x32xf32>
    %49 = tpu.matmul %47, %48, %cst_19 {dimension_numbers = #tpu.dot_dimension_numbers<[1], [0], [0], [1], [0, 0, 1, 1], [], []>} : vector<128x128xbf16>, vector<128x32xbf16>, vector<128x32xf32> -> vector<128x32xf32>
    %50 = arith.addf %1, %49 : vector<128x32xf32>
    %51 = tpu.concatenate %30, %50 in 1 : vector<128x32xf32>, vector<128x32xf32> -> vector<128x64xf32>
    %cst_20 = arith.constant dense<0.000000e+00> : vector<64xf32>
    %52 = vector.multi_reduction <add>, %51, %cst_20 [0] : vector<128x64xf32> to vector<64xf32>
    %53 = vector.shape_cast %52 : vector<64xf32> to vector<1x64xf32>
    %cst_21 = arith.constant 1.280000e+02 : f32
    %54 = vector.broadcast %cst_21 : f32 to vector<1x64xf32>
    %55 = arith.divf %53, %54 : vector<1x64xf32>
    %56 = vector.broadcast %55 : vector<1x64xf32> to vector<128x64xf32>
    %57 = arith.subf %51, %56 : vector<128x64xf32>
    %58 = arith.mulf %57, %57 : vector<128x64xf32>
    %cst_22 = arith.constant dense<0.000000e+00> : vector<64xf32>
    %59 = vector.multi_reduction <add>, %58, %cst_22 [0] : vector<128x64xf32> to vector<64xf32>
    %60 = vector.shape_cast %59 : vector<64xf32> to vector<1x64xf32>
    %cst_23 = arith.constant 1.280000e+02 : f32
    %61 = vector.broadcast %cst_23 : f32 to vector<1x64xf32>
    %62 = arith.divf %60, %61 : vector<1x64xf32>
    %63 = vector.broadcast %55 : vector<1x64xf32> to vector<128x64xf32>
    %64 = arith.subf %51, %63 : vector<128x64xf32>
    %cst_24 = arith.constant 9.99999974E-6 : f32
    %65 = vector.broadcast %cst_24 : f32 to vector<1x64xf32>
    %66 = arith.addf %62, %65 : vector<1x64xf32>
    %67 = math.rsqrt %66 : vector<1x64xf32>
    %68 = vector.broadcast %67 : vector<1x64xf32> to vector<128x64xf32>
    %69 = arith.mulf %64, %68 : vector<128x64xf32>
    %70 = vector.broadcast %7 : vector<1x64xf32> to vector<128x64xf32>
    %71 = arith.mulf %69, %70 : vector<128x64xf32>
    %72 = vector.broadcast %8 : vector<1x64xf32> to vector<128x64xf32>
    %73 = arith.addf %71, %72 : vector<128x64xf32>
    %74 = vector.extract_strided_slice %73 {offsets = [0, 0], sizes = [128, 32], strides = [1, 1]} : vector<128x64xf32> to vector<128x32xf32>
    %75 = vector.extract_strided_slice %73 {offsets = [0, 32], sizes = [128, 32], strides = [1, 1]} : vector<128x64xf32> to vector<128x32xf32>
    %76 = arith.addf %74, %75 : vector<128x32xf32>
    %77 = arith.negf %76 : vector<128x32xf32>
    %78 = math.exp %77 : vector<128x32xf32>
    %cst_25 = arith.constant 1.000000e+00 : f32
    %79 = vector.broadcast %cst_25 : f32 to vector<128x32xf32>
    %80 = arith.addf %79, %78 : vector<128x32xf32>
    %81 = arith.divf %79, %80 : vector<128x32xf32>
    %82 = arith.mulf %76, %81 : vector<128x32xf32>
    %83 = arith.truncf %82 : vector<128x32xf32> to vector<128x32xbf16>
    %c0_26 = arith.constant 0 : index
    %c0_27 = arith.constant 0 : index
    %84 = vector.load %arg5[%c0_26, %c0_27] : memref<32x64xbf16, #tpu.memory_space<vmem>>, vector<32x64xbf16>
    %cst_28 = arith.constant dense<0.000000e+00> : vector<128x64xf32>
    %85 = tpu.matmul %83, %84, %cst_28 {dimension_numbers = #tpu.dot_dimension_numbers<[1], [0], [0], [1], [0, 0, 1, 1], [], []>} : vector<128x32xbf16>, vector<32x64xbf16>, vector<128x64xf32> -> vector<128x64xf32>
    %cst_29 = arith.constant 0.000000e+00 : f32
    %86 = vector.broadcast %cst_29 : f32 to vector<128x64xf32>
    %87 = arith.maximumf %85, %86 : vector<128x64xf32>
    %88 = arith.negf %87 : vector<128x64xf32>
    %89 = math.exp %88 : vector<128x64xf32>
    %cst_30 = arith.constant 1.000000e+00 : f32
    %90 = vector.broadcast %cst_30 : f32 to vector<128x64xf32>
    %91 = arith.addf %90, %89 : vector<128x64xf32>
    %92 = arith.divf %90, %91 : vector<128x64xf32>
    %93 = arith.mulf %87, %92 : vector<128x64xf32>
    %94 = arith.truncf %93 : vector<128x64xf32> to vector<128x64xbf16>
    %c0_31 = arith.constant 0 : index
    %c0_32 = arith.constant 0 : index
    %95 = vector.load %arg6[%c0_31, %c0_32] : memref<64x32xbf16, #tpu.memory_space<vmem>>, vector<64x32xbf16>
    %cst_33 = arith.constant dense<0.000000e+00> : vector<128x32xf32>
    %96 = tpu.matmul %94, %95, %cst_33 {dimension_numbers = #tpu.dot_dimension_numbers<[1], [0], [0], [1], [0, 0, 1, 1], [], []>} : vector<128x64xbf16>, vector<64x32xbf16>, vector<128x32xf32> -> vector<128x32xf32>
    %97 = arith.addf %76, %96 : vector<128x32xf32>
    %cst_34 = arith.constant dense<0.000000e+00> : vector<32xf32>
    %98 = vector.multi_reduction <add>, %97, %cst_34 [0] : vector<128x32xf32> to vector<32xf32>
    %99 = vector.shape_cast %98 : vector<32xf32> to vector<1x32xf32>
    %cst_35 = arith.constant 1.280000e+02 : f32
    %100 = vector.broadcast %cst_35 : f32 to vector<1x32xf32>
    %101 = arith.divf %99, %100 : vector<1x32xf32>
    %102 = vector.broadcast %101 : vector<1x32xf32> to vector<128x32xf32>
    %103 = arith.subf %97, %102 : vector<128x32xf32>
    %104 = arith.mulf %103, %103 : vector<128x32xf32>
    %cst_36 = arith.constant dense<0.000000e+00> : vector<32xf32>
    %105 = vector.multi_reduction <add>, %104, %cst_36 [0] : vector<128x32xf32> to vector<32xf32>
    %106 = vector.shape_cast %105 : vector<32xf32> to vector<1x32xf32>
    %cst_37 = arith.constant 1.280000e+02 : f32
    %107 = vector.broadcast %cst_37 : f32 to vector<1x32xf32>
    %108 = arith.divf %106, %107 : vector<1x32xf32>
    %109 = vector.broadcast %101 : vector<1x32xf32> to vector<128x32xf32>
    %110 = arith.subf %97, %109 : vector<128x32xf32>
    %cst_38 = arith.constant 9.99999974E-6 : f32
    %111 = vector.broadcast %cst_38 : f32 to vector<1x32xf32>
    %112 = arith.addf %108, %111 : vector<1x32xf32>
    %113 = math.rsqrt %112 : vector<1x32xf32>
    %114 = vector.broadcast %113 : vector<1x32xf32> to vector<128x32xf32>
    %115 = arith.mulf %110, %114 : vector<128x32xf32>
    %116 = vector.broadcast %9 : vector<1x32xf32> to vector<128x32xf32>
    %117 = arith.mulf %115, %116 : vector<128x32xf32>
    %118 = vector.broadcast %10 : vector<1x32xf32> to vector<128x32xf32>
    %119 = arith.addf %117, %118 : vector<128x32xf32>
    %c0_39 = arith.constant 0 : index
    %c0_40 = arith.constant 0 : index
    %c0_41 = arith.constant 0 : index
    %120 = vector.load %arg8[%c0_39, %c0_40, %c0_41] : memref<1x128x32xf32, #tpu.memory_space<vmem>>, vector<1x128x32xf32>
    %121 = vector.shape_cast %120 : vector<1x128x32xf32> to vector<128x32xf32>
    %122 = vector.shape_cast %119 : vector<128x32xf32> to vector<1x128x32xf32>
    tpu.vector_store %arg8[%c0_39, %c0_40, %c0_41], %122 {strides = array<i32>} : memref<1x128x32xf32, #tpu.memory_space<vmem>>, vector<1x128x32xf32>,
    return
  }
  func.func @transform_0(%arg0: i32) -> (i32, i32, i32) {
    %c0_i32 = arith.constant 0 : i32
    %c0_i32_0 = arith.constant 0 : i32
    %c0_i32_1 = arith.constant 0 : i32
    return %arg0, %c0_i32, %c0_i32_0 : i32, i32, i32
  }
  func.func @transform_1(%arg0: i32) -> (i32, i32, i32) {
    %c0_i32 = arith.constant 0 : i32
    %c0_i32_0 = arith.constant 0 : i32
    %c0_i32_1 = arith.constant 0 : i32
    return %arg0, %c0_i32, %c0_i32_0 : i32, i32, i32
  }
  func.func @transform_2(%arg0: i32) -> (i32, i32) {
    %c0_i32 = arith.constant 0 : i32
    %c0_i32_0 = arith.constant 0 : i32
    %c0_i32_1 = arith.constant 0 : i32
    return %c0_i32, %c0_i32_0 : i32, i32
  }
  func.func @transform_3(%arg0: i32) -> (i32, i32) {
    %c0_i32 = arith.constant 0 : i32
    %c0_i32_0 = arith.constant 0 : i32
    %c0_i32_1 = arith.constant 0 : i32
    return %c0_i32, %c0_i32_0 : i32, i32
  }
  func.func @transform_4(%arg0: i32) -> (i32, i32) {
    %c0_i32 = arith.constant 0 : i32
    %c0_i32_0 = arith.constant 0 : i32
    %c0_i32_1 = arith.constant 0 : i32
    return %c0_i32, %c0_i32_0 : i32, i32
  }
  func.func @transform_5(%arg0: i32) -> (i32, i32) {
    %c0_i32 = arith.constant 0 : i32
    %c0_i32_0 = arith.constant 0 : i32
    %c0_i32_1 = arith.constant 0 : i32
    return %c0_i32, %c0_i32_0 : i32, i32
  }
  func.func @transform_6(%arg0: i32) -> (i32, i32) {
    %c0_i32 = arith.constant 0 : i32
    %c0_i32_0 = arith.constant 0 : i32
    %c0_i32_1 = arith.constant 0 : i32
    return %c0_i32, %c0_i32_0 : i32, i32
  }
  func.func @transform_7(%arg0: i32) -> (i32, i32, i32) {
    %c0_i32 = arith.constant 0 : i32
    %c0_i32_0 = arith.constant 0 : i32
    %c0_i32_1 = arith.constant 0 : i32
    return %arg0, %c0_i32, %c0_i32_0 : i32, i32, i32
  }
}

</mosaic_0001>

<bundles_post_ra>
// kernel: gps_layer.1
= control target key start
LH: loop header
LB: loop body
LE: loop exit
PB: predicated region body
PF: predicated region fallthrough
CT: control target
= control target key end

     0   :  { %s3224_s24 = smov 0   ;;  %s4814_s0 = inlined_call_operand.vmem [shape: f32[8,128,32], index: 0, kind: input, shape index: {}]   ;;  %s4815_s1 = inlined_call_operand.vmem [shape: bf16[8,128,128], index: 1, kind: input, shape index: {}]   ;;  %s4816_s2 = inlined_call_operand.vmem [shape: bf16[32,128], index: 2, kind: input, shape index: {}]   ;;  %s4817_s3 = inlined_call_operand.vmem [shape: bf16[64,32], index: 3, kind: input, shape index: {}]   ;;  %s4818_s4 = inlined_call_operand.vmem [shape: bf16[32,64], index: 4, kind: input, shape index: {}]   ;;  %s4819_s5 = inlined_call_operand.vmem [shape: bf16[64,32], index: 5, kind: input, shape index: {}]   ;;  %s4820_s6 = inlined_call_operand.vmem [shape: f32[8,128], index: 6, kind: input, shape index: {}]   ;;  %s4821_s7 = inlined_call_operand.vmem [shape: f32[8,128,32], index: 7, kind: output, shape index: {}]  }
   0x1 LB: > { %s2716_s25 = sadd.s32 4294967295, %s3178_s24   ;;  %p2720_p0 = scmp.ge.s32.totalorder %s3178_s24, 1  ;;  %s3178_s24 = sphi %s3224_s24, %s17_s24  }
   0x2   : > { %p247_p1 = scmp.lt.s32.totalorder %s3178_s24, 9 }
   0x4   : > { %p248_p2 = pnand %p2720_p0, %p247_p1 }
   0x6   : > { %251 = sbr.rel (%p248_p2) target bundleno = 2138 (0x85a), region = 48 }
   0xb   : > { %v2893_v0 = vld [vmem:[%s4816_s2 + $0x8] sm:$0xff]  ;;  %p284_p3 = scmp.lt.s32.totalorder %s2716_s25, 7  ;;  %v2892_v1 = vld [vmem:[%s4816_s2] sm:$0xff]  ;;  %vm358_vm0 = vcmask 261120   ;;  %s3180_s17 = smov 64   ;;  %vm738_vm1 = vcmask 523264  }
   0xc   : > { %389 = vmatpush.bf16.msra.mxu0 %v2893_v0  ;;  %v340_v44 = vld [vmem:[%s4820_s6] sm:$0xff]  ;;  %s3181_s18 = smov 96   ;;  %s3182_s19 = smov 32  }
   0xd   : > { %s4878_s25 = smov (!%p284_p3, %s2716_s25), 7  ;;  %v345_v45 = vperm.slane %v340_v44, 0 }
   0xe   : > { %s2881_s30 = sshll.u32 %s4878_s25, 7  ;;  %s2882_s11 = sshll.u32 %s4878_s25, 6 }
   0xf   : > { %s3246_s10 = scalar_lea.vmem %s4814_s0, %s2881_s30  ;;  %s293_s14 = scalar_lea.vmem %s4815_s1, %s2882_s11 }
  0x10   : > { %390 = vmatpush.bf16.msra.mxu0 %v2892_v1  ;;  %v3249_v2 = vld [vmem:[%s3246_s10 + $0x70] sm:$0xff]  ;;  %v3252_v3 = vld [vmem:[%s3246_s10 + $0x78] sm:$0xff]  ;;  %v3255_v4 = vld [vmem:[%s3246_s10] sm:$0xff]  ;;  %s4770_s28 = scalar_lea.vmem %s4821_s7, %s2881_s30 }
  0x11   : > { %v323_v5 = vpack.c.bf16 %v3252_v3, %v3249_v2  ;;  %v3260_v6 = vld [vmem:[%s3246_s10 + $0x8] sm:$0xff]  ;;  %v3263_v7 = vld [vmem:[%s3246_s10 + $0x60] sm:$0xff]  ;;  %v3274_v11 = vld [vmem:[%s3246_s10 + $0x50] sm:$0xff] }
  0x12   : > { %v3266_v8 = vld [vmem:[%s3246_s10 + $0x68] sm:$0xff]  ;;  %v316_v9 = vpack.c.bf16 %v3260_v6, %v3255_v4  ;;  %v3277_v12 = vld [vmem:[%s3246_s10 + $0x58] sm:$0xff]  ;;  %v3282_v14 = vld [vmem:[%s3246_s10 + $0x40] sm:$0xff] }
  0x13   : > { %480 = vmatpush.bf16.msra.mxu1 %v323_v5  ;;  %v322_v10 = vpack.c.bf16 %v3266_v8, %v3263_v7  ;;  %v321_v13 = vpack.c.bf16 %v3277_v12, %v3274_v11  ;;  %v3285_v15 = vld [vmem:[%s3246_s10 + $0x48] sm:$0xff]  ;;  %v3290_v17 = vld [vmem:[%s3246_s10 + $0x30] sm:$0xff]  ;;  %v3293_v18 = vld [vmem:[%s3246_s10 + $0x38] sm:$0xff] }
  0x14   : > { %2735 = vmatmul.msk.bf16.vlgmr.msra.gmra.mxu0 %vm358_vm0, %v316_v9  ;;  %v320_v16 = vpack.c.bf16 %v3285_v15, %v3282_v14  ;;  %v3296_v19 = vld [vmem:[%s3246_s10 + $0x10] sm:$0xff]  ;;  %v3299_v20 = vld [vmem:[%s3246_s10 + $0x18] sm:$0xff]  ;;  %v319_v21 = vpack.c.bf16 %v3293_v18, %v3290_v17  ;;  %v3306_v23 = vld [vmem:[%s3246_s10 + $0x20] sm:$0xff] }
  0x15   : > { %v317_v22 = vpack.c.bf16 %v3299_v20, %v3296_v19  ;;  %v3309_v24 = vld [vmem:[%s3246_s10 + $0x28] sm:$0xff]  ;;  %v3318_v26 = vld [vmem:[%s293_s14] sm:$0xff]  ;;  %v3326_v28 = vld [vmem:[%s293_s14 + $0x10] sm:$0xff] }
  0x16   : > { %v318_v25 = vpack.c.bf16 %v3309_v24, %v3306_v23  ;;  %v3322_v27 = vld [vmem:[%s293_s14 + $0x8] sm:$0xff]  ;;  %v3330_v29 = vld [vmem:[%s293_s14 + $0x18] sm:$0xff]  ;;  %v3334_v30 = vld [vmem:[%s293_s14 + $0x20] sm:$0xff] }
  0x17   : > { %481 = vmatpush.bf16.msra.mxu1 %v322_v10  ;;  %v3338_v31 = vld [vmem:[%s293_s14 + $0x28] sm:$0xff]  ;;  %v3342_v32 = vld [vmem:[%s293_s14 + $0x30] sm:$0xff]  ;;  %v3345_v35 = vld [vmem:[%s293_s14 + $0x38] sm:$0xff] }
  0x1b   : > { %482 = vmatpush.bf16.msra.mxu1 %v321_v13 }
  0x1f   : > { %483 = vmatpush.bf16.msra.mxu1 %v320_v16 }
  0x23   : > { %484 = vmatpush.bf16.msra.mxu1 %v319_v21 }
  0x24   : > { %2736 = vmatmul.msk.bf16.gmra.mxu0 %vm358_vm0, %v317_v22 }
  0x27   : > { %485 = vmatpush.bf16.msra.mxu1 %v318_v25 }
  0x2b   : > { %486 = vmatpush.bf16.msra.mxu1 %v317_v22 }
  0x2f   : > { %487 = vmatpush.bf16.msra.mxu1 %v316_v9 }
  0x32   : > { %488 = vmatmul.bf16.vlgmr.msra.gmra.mxu1 %v3318_v26 }
  0x34   : > { %2737 = vmatmul.msk.bf16.gmra.mxu0 %vm358_vm0, %v318_v25 }
  0x42   : > { %493 = vmatmul.bf16.gmra.mxu1 %v3322_v27 }
  0x44   : > { %2738 = vmatmul.msk.bf16.gmra.mxu0 %vm358_vm0, %v319_v21 }
  0x52   : > { %498 = vmatmul.bf16.gmra.mxu1 %v3326_v28 }
  0x54   : > { %2739 = vmatmul.msk.bf16.gmra.mxu0 %vm358_vm0, %v320_v16 }
  0x62   : > { %503 = vmatmul.bf16.gmra.mxu1 %v3330_v29 }
  0x64   : > { %2740 = vmatmul.msk.bf16.gmra.mxu0 %vm358_vm0, %v321_v13 }
  0x72   : > { %508 = vmatmul.bf16.gmra.mxu1 %v3334_v30 }
  0x74   : > { %2741 = vmatmul.msk.bf16.gmra.mxu0 %vm358_vm0, %v322_v10 }
  0x82   : > { %513 = vmatmul.bf16.gmra.mxu1 %v3338_v31 }
  0x84   : > { %2742 = vmatmul.msk.bf16.gmra.mxu0 %vm358_vm0, %v323_v5 }
  0x91   : > { %v392_v33 = vpop.f32.mrf.mxu0 }
  0x92   : > { %518 = vmatmul.bf16.gmra.mxu1 %v3342_v32  ;;  %v3387_v57 = vadd.f32 %v392_v33, %v345_v45 }
  0x99   : > { %v394_v34 = vpop.f32.mrf.mxu0 }
  0x9a   : > { %v3389_v58 = vadd.f32 %v394_v34, %v345_v45 }
  0x9c   : > { %v3393_v60 = vpack.c.bf16 %v3389_v58, %v3387_v57 }
  0xa1   : > { %v3347_v36 = vpop.f32.mrf.mxu0 }
  0xa2   : > { %523 = vmatmul.bf16.gmra.mxu1 %v3345_v35 }
  0xa9   : > { %v3350_v37 = vpop.f32.mrf.mxu0 }
  0xaf   : > { %v3352_v38 = vpop.f32.mrf.mxu1 }
  0xb1   : > { %v402_v39 = vpop.f32.mrf.mxu0 }
  0xb2   : > { %v3375_v52 = vadd.f32 %v402_v39, %v345_v45 }
  0xb7   : > { %v3354_v40 = vpop.f32.mrf.mxu1 }
  0xb9   : > { %v404_v41 = vpop.f32.mrf.mxu0 }
  0xba   : > { %v3377_v53 = vadd.f32 %v404_v41, %v345_v45 }
  0xbc   : > { %v3381_v55 = vpack.c.bf16 %v3377_v53, %v3375_v52 }
  0xbf   : > { %v3356_v42 = vpop.f32.mrf.mxu1 }
  0xc1   : > { %v407_v43 = vpop.f32.mrf.mxu0 }
  0xc2   : > { %v3363_v47 = vadd.f32 %v407_v43, %v345_v45 }
  0xc7   : > { %v3361_v46 = vpop.f32.mrf.mxu1 }
  0xc9   : > { %v409_v48 = vpop.f32.mrf.mxu0 }
  0xca   : > { %v3365_v49 = vadd.f32 %v409_v48, %v345_v45 }
  0xcc   : > { %4831 = vst [vmem:[#allocation2_spill] sm:$0xff] %v3365_v49  ;;  %v3369_v50 = vpack.c.bf16 %v3365_v49, %v3363_v47 }
  0xce   : > { %882 = vrot.lane.b32.xlu2 %v3369_v50, %s3180_s17 }
  0xcf   : > { %v3373_v51 = vpop.f32.mrf.mxu1 }
  0xd1   : > { %v412_v54 = vpop.f32.mrf.mxu0 }
  0xd2   : > { %v3412_v13 = vadd.f32 %v412_v54, %v345_v45 }
  0xd4   : > { %4834 = vst [vmem:[#allocation5_spill] sm:$0xff] %v3412_v13 }
  0xd6   : > { %880 = vrot.lane.b32.xlu2 %v3381_v55, %s3180_s17 }
  0xd7   : > { %v3385_v56 = vpop.f32.mrf.mxu1 }
  0xd9   : > { %v414_v59 = vpop.f32.mrf.mxu0 }
  0xda   : > { %v3414_v16 = vadd.f32 %v414_v59, %v345_v45 }
  0xdc   : > { %4835 = vst [vmem:[#allocation6_spill] sm:$0xff] %v3414_v16  ;;  %v3418_v22 = vpack.c.bf16 %v3414_v16, %v3412_v13 }
  0xde   : > { %860 = vrot.lane.b32.xlu2 %v3393_v60, %s3181_s18 }
  0xdf   : > { %v3397_v61 = vpop.f32.mrf.mxu1 }
  0xe1   : > { %v417_v62 = vpop.f32.mrf.mxu0 }
  0xe2   : > { %v3403_v0 = vadd.f32 %v417_v62, %v345_v45 }
  0xe4   : > { %4832 = vst [vmem:[#allocation3_spill] sm:$0xff] %v3403_v0 }
  0xe6   : > { %866 = vrot.lane.b32.xlu2 %v3369_v50, %s3181_s18 }
  0xe7   : > { %v3401_v63 = vpop.f32.mrf.mxu1 }
  0xe9   : > { %v419_v1 = vpop.f32.mrf.mxu0 }
  0xea   : > { %v3405_v5 = vadd.f32 %v419_v1, %v345_v45 }
  0xec   : > { %4833 = vst [vmem:[#allocation4_spill] sm:$0xff] %v3405_v5  ;;  %v849_v9 = vpack.c.bf16 %v3405_v5, %v3403_v0  ;;  %v2895_v5 = vld [vmem:[%s4817_s3 + $0x8] sm:$0xff]  ;;  %v529_v0 = vpack.c.bf16 %v3354_v40, %v3352_v38 }
  0xee   : > { %886 = vrot.lane.b32.xlu1 %v849_v9, %s3180_s17 }
  0xef   : > { %v3410_v10 = vpop.f32.mrf.mxu1 }
  0xf1   : > { %v422_v21 = vpop.f32.mrf.mxu0 }
  0xf2   : > { %v3424_v33 = vadd.f32 %v422_v21, %v345_v45 }
  0xf4   : > { %4836 = vst [vmem:[#allocation7_spill] sm:$0xff] %v3424_v33 }
  0xf6   : > { %884 = vrot.lane.b32.xlu1 %v3418_v22, %s3180_s17 }
  0xf7   : > { %v3422_v25 = vpop.f32.mrf.mxu1 }
  0xf9   : > { %v424_v34 = vpop.f32.mrf.mxu0 }
  0xfa   : > { %v3426_v39 = vadd.f32 %v424_v34, %v345_v45 }
  0xfc   : > { %4837 = vst [vmem:[#allocation8_spill] sm:$0xff] %v3426_v39  ;;  %v3430_v41 = vpack.c.bf16 %v3426_v39, %v3424_v33  ;;  %v532_v39 = vpack.c.bf16 %v3401_v63, %v3397_v61 }
  0xfe   : > { %872 = vrot.lane.b32.xlu2 %v3430_v41, %s3181_s18  ;;  %876 = vrot.lane.b32.xlu1 %v3393_v60, %s3180_s17 }
  0xff   : > { %v3436_v43 = vpop.f32.mrf.mxu1 }
 0x101   : > { %v427_v44 = vpop.f32.mrf.mxu0 }
 0x102   : > { %v3442_v54 = vadd.f32 %v427_v44, %v345_v45  ;;  %v3459_v44 = vadd.f32 %v3347_v36, %v345_v45 }
 0x104   : > { %4838 = vst [vmem:[#allocation9_spill] sm:$0xff] %v3442_v54 }
 0x106   : > { %864 = vrot.lane.b32.xlu1 %v3381_v55, %s3181_s18 }
 0x107   : > { %v3440_v48 = vpop.f32.mrf.mxu1 }
 0x109   : > { %v429_v59 = vpop.f32.mrf.mxu0 }
 0x10a   : > { %v3444_v62 = vadd.f32 %v429_v59, %v345_v45  ;;  %v3462_v59 = vadd.f32 %v3350_v37, %v345_v45  ;;  %v534_v45 = vpack.c.bf16 %v3440_v48, %v3436_v43 }
 0x10c   : > { %4839 = vst [vmem:[#allocation10_spill] sm:$0xff] %v3444_v62  ;;  %v851_v1 = vpack.c.bf16 %v3444_v62, %v3442_v54  ;;  %v3466_v62 = vpack.c.bf16 %v3462_v59, %v3459_v44 }
 0x10e   : > { %890 = vrot.lane.b32.xlu0 %v851_v1, %s3180_s17  ;;  %1171 = vrot.lane.b32.xlu2 %v851_v1, %s3182_s19 }
 0x10f   : > { %870 = vrot.lane.b32.xlu1 %v849_v9, %s3181_s18  ;;  %v3451_v21 = vpop.f32.mrf.mxu1 }
 0x116   : > { %888 = vrot.lane.b32.xlu0 %v3430_v41, %s3180_s17 }
 0x117   : > { %874 = vrot.lane.b32.xlu1 %v851_v1, %s3181_s18  ;;  %v3456_v34 = vpop.f32.mrf.mxu1 }
 0x118   : > { %v535_v37 = vpack.c.bf16 %v3456_v34, %v3451_v21 }
 0x11e   : > { %878 = vrot.lane.b32.xlu0 %v3466_v62, %s3180_s17 }
 0x11f   : > { %1167 = vrot.lane.b32.xlu1 %v849_v9, %s3182_s19  ;;  %v3471_v54 = vpop.f32.mrf.mxu1  ;;  %v533_v9 = vpack.c.bf16 %v3422_v25, %v3410_v10 }
 0x126   : > { %862 = vrot.lane.b32.xlu0 %v3466_v62, %s3181_s18 }
 0x127   : > { %v3475_v1 = vpop.f32.mrf.mxu1 }
 0x128   : > { %v536_v36 = vpack.c.bf16 %v3475_v1, %v3471_v54  ;;  %v883_v33 = vpop.permute.xlu2 %882 }
 0x12a   : > { %537 = vmatpush.bf16.msra.mxu2 %v536_v36  ;;  %v2897_v36 = vld [vmem:[%s4817_s3 + $0x18] sm:$0xff] }
 0x12b   : > { %767 = vmatpush.bf16.msra.mxu3 %v2897_v36 }
 0x12e   : > { %538 = vmatpush.bf16.msra.mxu2 %v535_v37  ;;  %868 = vrot.lane.b32.xlu0 %v3418_v22, %s3181_s18  ;;  %v2896_v37 = vld [vmem:[%s4817_s3 + $0x10] sm:$0xff] }
 0x12f   : > { %768 = vmatpush.bf16.msra.mxu3 %v2896_v37 }
 0x130   : > { %v881_v36 = vpop.permute.xlu2 %880 }
 0x132   : > { %539 = vmatpush.bf16.msra.mxu2 %v534_v45  ;;  %v531_v45 = vpack.c.bf16 %v3385_v56, %v3373_v51 }
 0x133   : > { %769 = vmatpush.bf16.msra.mxu3 %v2895_v5 }
 0x136   : > { %540 = vmatpush.bf16.msra.mxu2 %v533_v9  ;;  %v530_v9 = vpack.c.bf16 %v3361_v46, %v3356_v42 }
 0x138   : > { %v861_v37 = vpop.permute.xlu2 %860 }
 0x13a   : > { %541 = vmatpush.bf16.msra.mxu2 %v532_v39  ;;  %v2894_v39 = vld [vmem:[%s4817_s3] sm:$0xff] }
 0x13b   : > { %770 = vmatpush.bf16.msra.mxu3 %v2894_v39 }
 0x13e   : > { %542 = vmatpush.bf16.msra.mxu2 %v531_v45 }
 0x140   : > { %v867_v45 = vpop.permute.xlu2 %866 }
 0x142   : > { %543 = vmatpush.bf16.msra.mxu2 %v530_v9 }
 0x146   : > { %544 = vmatpush.bf16.msra.mxu2 %v529_v0 }
 0x149   : > { %545 = vmatmul.bf16.vlgmr.msra.gmra.mxu2 %v3318_v26 }
 0x158   : > { %v3509_v16 = vpop.permute.xlu2 %872 }
 0x159   : > { %550 = vmatmul.bf16.gmra.mxu2 %v3322_v27 }
 0x160   : > { %v887_v39 = vpop.permute.xlu1 %886 }
 0x161   : > { %v932_v27 = vsel %vm358_vm0, %v887_v39, 0 }
 0x168   : > { %v1172_v9 = vpop.permute.xlu2 %1171  ;;  %v885_v49 = vpop.permute.xlu1 %884 }
 0x169   : > { %555 = vmatmul.bf16.gmra.mxu2 %v3326_v28  ;;  %1181 = vmatpush.bf16.msrb.mxu3 %v1172_v9  ;;  %v929_v28 = vsel %vm358_vm0, %v885_v49, 0 }
 0x179   : > { %560 = vmatmul.bf16.gmra.mxu2 %v3330_v29  ;;  %v926_v29 = vsel %vm358_vm0, %v883_v33, 0 }
 0x180   : > { %v891_v5 = vpop.permute.xlu0 %890 }
 0x181   : > { %v938_v13 = vsel %vm358_vm0, %v891_v5, 0  ;;  %v877_v5 = vpop.permute.xlu1 %876 }
 0x182   : > { %940 = vmatpush.bf16.xpose.msrb.mxu0 %v938_v13 }
 0x188   : > { %v889_v0 = vpop.permute.xlu0 %888 }
 0x189   : > { %565 = vmatmul.bf16.gmra.mxu2 %v3334_v30  ;;  %v935_v26 = vsel %vm358_vm0, %v889_v0, 0  ;;  %v923_v30 = vsel %vm358_vm0, %v881_v36, 0  ;;  %v917_v0 = vsel %vm358_vm0, %v877_v5, 0 }
 0x18a   : > { %941 = vmatpush.bf16.xpose.msrb.mxu0 %v935_v26 }
 0x190   : > { %v879_v13 = vpop.permute.xlu0 %878 }
 0x191   : > { %v920_v9 = vsel %vm358_vm0, %v879_v13, 0 }
 0x192   : > { %942 = vmatpush.bf16.xpose.msrb.mxu0 %v932_v27 }
 0x198   : > { %v863_v49 = vpop.permute.xlu0 %862 }
 0x199   : > { %570 = vmatmul.bf16.gmra.mxu2 %v3338_v31 }
 0x19a   : > { %943 = vmatpush.bf16.xpose.msrb.mxu0 %v929_v28 }
 0x1a2   : > { %944 = vmatpush.bf16.xpose.msrb.mxu0 %v926_v29  ;;  %v865_v29 = vpop.permute.xlu1 %864 }
 0x1a9   : > { %575 = vmatmul.bf16.gmra.mxu2 %v3342_v32 }
 0x1aa   : > { %945 = vmatpush.bf16.xpose.msrb.mxu0 %v923_v30 }
 0x1b2   : > { %946 = vmatpush.bf16.xpose.msrb.mxu0 %v920_v9 }
 0x1b9   : > { %580 = vmatmul.bf16.gmra.mxu2 %v3345_v35 }
 0x1ba   : > { %947 = vmatpush.bf16.xpose.msrb.mxu0 %v917_v0 }
 0x1c1   : > { %2799 = vmatmul.msk.bf16.vlgmr.msrb.gmra.mxu0 %vm358_vm0, %v861_v37 }
 0x1cc   : > { %v546_v31 = vpop.f32.mrf.mxu2 }
 0x1cd   : > { %v586_v32 = vmul.f32 2.0, %v546_v31 }
 0x1cf   : > { %v602_v26 = vsub.f32 %v586_v32, %v3255_v4 }
 0x1d1   : > { %2800 = vmatmul.msk.bf16.gmra.mxu0 %vm358_vm0, %v863_v49 }
 0x1d4   : > { %v548_v33 = vpop.f32.mrf.mxu2 }
 0x1d5   : > { %v587_v36 = vmul.f32 2.0, %v548_v33 }
 0x1d7   : > { %v603_v39 = vsub.f32 %v587_v36, %v3260_v6 }
 0x1d9   : > { %v2916_v27 = vpack.i.bf16 %v603_v39, %v602_v26  ;;  %v871_v39 = vpop.permute.xlu1 %870 }
 0x1db   : > { %2917 = vrot.lane.b32.xlu0 %v2916_v27, %s3182_s19 }
 0x1dc   : > { %v551_v28 = vpop.f32.mrf.mxu2 }
 0x1dd   : > { %v588_v35 = vmul.f32 2.0, %v551_v28 }
 0x1df   : > { %v604_v13 = vsub.f32 %v588_v35, %v3296_v19 }
 0x1e1   : > { %2801 = vmatmul.msk.bf16.gmra.mxu0 %vm358_vm0, %v865_v29 }
 0x1e3   : > { %1169 = vrot.lane.b32.xlu0 %v3430_v41, %s3182_s19 }
 0x1e4   : > { %v553_v37 = vpop.f32.mrf.mxu2 }
 0x1e5   : > { %v589_v30 = vmul.f32 2.0, %v553_v37 }
 0x1e7   : > { %v605_v9 = vsub.f32 %v589_v30, %v3299_v20 }
 0x1e9   : > { %v2921_v4 = vpack.i.bf16 %v605_v9, %v604_v13 }
 0x1eb   : > { %1165 = vrot.lane.b32.xlu0 %v3418_v22, %s3182_s19  ;;  %2922 = vrot.lane.b32.xlu2 %v2921_v4, %s3182_s19  ;;  %v869_v22 = vpop.permute.xlu0 %868 }
 0x1ec   : > { %v556_v6 = vpop.f32.mrf.mxu2 }
 0x1ed   : > { %v590_v5 = vmul.f32 2.0, %v556_v6 }
 0x1ef   : > { %v606_v31 = vsub.f32 %v590_v5, %v3306_v23  ;;  %v875_v5 = vpop.permute.xlu1 %874 }
 0x1f1   : > { %2802 = vmatmul.msk.bf16.gmra.mxu0 %vm358_vm0, %v867_v45 }
 0x1f3   : > { %1163 = vrot.lane.b32.xlu0 %v3369_v50, %s3182_s19 }
 0x1f4   : > { %v558_v41 = vpop.f32.mrf.mxu2 }
 0x1f5   : > { %v591_v0 = vmul.f32 2.0, %v558_v41 }
 0x1f7   : > { %v607_v19 = vsub.f32 %v591_v0, %v3309_v24 }
 0x1f9   : > { %v2926_v20 = vpack.i.bf16 %v607_v19, %v606_v31 }
 0x1fb   : > { %2927 = vrot.lane.b32.xlu0 %v2926_v20, %s3182_s19 }
 0x1fc   : > { %v561_v49 = vpop.f32.mrf.mxu2 }
 0x1fd   : > { %v592_v32 = vmul.f32 2.0, %v561_v49 }
 0x1ff   : > { %v608_v36 = vsub.f32 %v592_v32, %v3290_v17 }
 0x201   : > { %2803 = vmatmul.msk.bf16.gmra.mxu0 %vm358_vm0, %v869_v22 }
 0x204   : > { %v563_v33 = vpop.f32.mrf.mxu2 }
 0x205   : > { %v593_v45 = vmul.f32 2.0, %v563_v33 }
 0x207   : > { %v609_v50 = vsub.f32 %v593_v45, %v3293_v18 }
 0x209   : > { %v2931_v26 = vpack.i.bf16 %v609_v50, %v608_v36 }
 0x20b   : > { %2932 = vrot.lane.b32.xlu1 %v2931_v26, %s3182_s19 }
 0x20c   : > { %v566_v23 = vpop.f32.mrf.mxu2 }
 0x20d   : > { %v594_v24 = vmul.f32 2.0, %v566_v23 }
 0x20f   : > { %v610_v29 = vsub.f32 %v594_v24, %v3282_v14  ;;  %v1168_v24 = vpop.permute.xlu1 %1167 }
 0x211   : > { %2804 = vmatmul.msk.bf16.gmra.mxu0 %vm358_vm0, %v871_v39 }
 0x214   : > { %v568_v27 = vpop.f32.mrf.mxu2 }
 0x215   : > { %v595_v28 = vmul.f32 2.0, %v568_v27 }
 0x217   : > { %v611_v35 = vsub.f32 %v595_v28, %v3285_v15 }
 0x219   : > { %v2936_v37 = vpack.i.bf16 %v611_v35, %v610_v29 }
 0x21b   : > { %2937 = vrot.lane.b32.xlu2 %v2936_v37, %s3182_s19 }
 0x21c   : > { %v571_v17 = vpop.f32.mrf.mxu2 }
 0x21d   : > { %v596_v18 = vmul.f32 2.0, %v571_v17 }
 0x21f   : > { %v612_v9 = vsub.f32 %v596_v18, %v3274_v11 }
 0x221   : > { %2805 = vmatmul.msk.bf16.gmra.mxu0 %vm358_vm0, %v3509_v16 }
 0x224   : > { %v573_v30 = vpop.f32.mrf.mxu2 }
 0x225   : > { %v597_v13 = vmul.f32 2.0, %v573_v30 }
 0x227   : > { %v613_v4 = vsub.f32 %v597_v13, %v3277_v12 }
 0x229   : > { %v2941_v6 = vpack.i.bf16 %v613_v4, %v612_v9 }
 0x22b   : > { %2942 = vrot.lane.b32.xlu2 %v2941_v6, %s3182_s19 }
 0x22c   : > { %v576_v14 = vpop.f32.mrf.mxu2 }
 0x22d   : > { %v598_v15 = vmul.f32 2.0, %v576_v14 }
 0x22f   : > { %v614_v31 = vsub.f32 %v598_v15, %v3263_v7 }
 0x231   : > { %2806 = vmatmul.msk.bf16.gmra.mxu0 %vm358_vm0, %v875_v5 }
 0x234   : > { %v578_v41 = vpop.f32.mrf.mxu2 }
 0x235   : > { %v599_v0 = vmul.f32 2.0, %v578_v41 }
 0x237   : > { %v615_v16 = vsub.f32 %v599_v0, %v3266_v8 }
 0x239   : > { %v2946_v19 = vpack.i.bf16 %v615_v16, %v614_v31 }
 0x23b   : > { %2947 = vrot.lane.b32.xlu1 %v2946_v19, %s3182_s19 }
 0x23c   : > { %v581_v13 = vpop.f32.mrf.mxu2 }
 0x23d   : > { %v600_v16 = vmul.f32 2.0, %v581_v13 }
 0x23e   : > { %v949_v11 = vpop.f32.mrf.mxu0 }
 0x23f   : > { %v3561_v20 = vmul.f32 0.17677669, %v949_v11  ;;  %v616_v11 = vsub.f32 %v600_v16, %v3249_v2 }
 0x241   : > { %1005 = vmax.xlane.f32.xlu0 %v3561_v20 }
 0x244   : > { %v583_v15 = vpop.f32.mrf.mxu2 }
 0x245   : > { %v2923_v23 = vpop.permute.xlu2 %2922  ;;  %v601_v19 = vmul.f32 2.0, %v583_v15 }
 0x246   : > { %v951_v12 = vpop.f32.mrf.mxu0  ;;  %v2924_v27 = vunpack.i.l.bf16 %v2923_v23 }
 0x247   : > { %v3582_v18 = vmul.f32 0.17677669, %v951_v12  ;;  %v617_v12 = vsub.f32 %v601_v19, %v3252_v3 }
 0x248   : > { %v684_v29 = vsel %vm358_vm0, %v3356_v42, %v2924_v27 }
 0x24d   : > { %v2918_v49 = vpop.permute.xlu0 %2917 }
 0x24e   : > { %v2920_v22 = vunpack.i.h.bf16 %v2918_v49  ;;  %v2919_v32 = vunpack.i.l.bf16 %v2918_v49  ;;  %v954_v33 = vpop.f32.mrf.mxu0  ;;  %v2951_v49 = vpack.i.bf16 %v617_v12, %v616_v11 }
 0x24f   : > { %v3568_v36 = vmul.f32 0.17677669, %v954_v33 }
 0x250   : > { %v682_v45 = vsel %vm358_vm0, %v3352_v38, %v2919_v32  ;;  %v683_v7 = vsel %vm358_vm0, %v3354_v40, %v2920_v22  ;;  %v2925_v38 = vunpack.i.h.bf16 %v2923_v23 }
 0x251   : > { %v698_v8 = vpack.c.bf16 %v683_v7, %v682_v45 }
 0x252   : > { %v685_v35 = vsel %vm358_vm0, %v3361_v46, %v2925_v38 }
 0x253   : > { %2791 = vmatmul.msk.bf16.vlgmr.msra.gmra.mxu3 %vm738_vm1, %v698_v8  ;;  %v699_v17 = vpack.c.bf16 %v685_v35, %v684_v29 }
 0x254   : > { %1009 = vmax.xlane.f32.xlu2 %v3568_v36 }
 0x255   : > { %v1170_v50 = vpop.permute.xlu0 %1169 }
 0x256   : > { %v956_v26 = vpop.f32.mrf.mxu0  ;;  %1182 = vmatpush.bf16.msrb.mxu3 %v1170_v50 }
 0x257   : > { %v3572_v39 = vmul.f32 0.17677669, %v956_v26 }
 0x259   : > { %1011 = vmax.xlane.f32.xlu0 %v3572_v39 }
 0x25a   : > { %1183 = vmatpush.bf16.msrb.mxu3 %v1168_v24 }
 0x25d   : > { %v1166_v40 = vpop.permute.xlu0 %1165 }
 0x25e   : > { %v959_v28 = vpop.f32.mrf.mxu0  ;;  %1184 = vmatpush.bf16.msrb.mxu3 %v1166_v40 }
 0x25f   : > { %v3579_v37 = vmul.f32 0.17677669, %v959_v28 }
 0x261   : > { %1013 = vmax.xlane.f32.xlu2 %v3579_v37 }
 0x263   : > { %2792 = vmatmul.msk.bf16.gmra.mxu3 %vm738_vm1, %v699_v17 }
 0x265   : > { %v1164_v30 = vpop.permute.xlu0 %1163  ;;  %1007 = vmax.xlane.f32.xlu1 %v3582_v18 }
 0x266   : > { %v961_v9 = vpop.f32.mrf.mxu0  ;;  %1185 = vmatpush.bf16.msrb.mxu3 %v1164_v30 }
 0x267   : > { %v3586_v4 = vmul.f32 0.17677669, %v961_v9 }
 0x269   : > { %1015 = vmax.xlane.f32.xlu0 %v3586_v4 }
 0x26d   : > { %v2928_v42 = vpop.permute.xlu0 %2927 }
 0x26e   : > { %v2930_v46 = vunpack.i.h.bf16 %v2928_v42  ;;  %v2929_v6 = vunpack.i.l.bf16 %v2928_v42  ;;  %v964_v14 = vpop.f32.mrf.mxu0 }
 0x26f   : > { %v3589_v5 = vmul.f32 0.17677669, %v964_v14 }
 0x270   : > { %v686_v41 = vsel %vm358_vm0, %v3373_v51, %v2929_v6  ;;  %v687_v0 = vsel %vm358_vm0, %v3385_v56, %v2930_v46 }
 0x271   : > { %1017 = vmax.xlane.f32.xlu2 %v3589_v5  ;;  %v700_v31 = vpack.c.bf16 %v687_v0, %v686_v41 }
 0x273   : > { %2793 = vmatmul.msk.bf16.gmra.mxu3 %vm738_vm1, %v700_v31 }
 0x275   : > { %v2938_v7 = vpop.permute.xlu2 %2937 }
 0x276   : > { %v2940_v8 = vunpack.i.h.bf16 %v2938_v7  ;;  %v2939_v2 = vunpack.i.l.bf16 %v2938_v7  ;;  %v966_v40 = vpop.f32.mrf.mxu0 }
 0x278   : > { %v690_v3 = vsel %vm358_vm0, %v3410_v10, %v2939_v2  ;;  %v691_v50 = vsel %vm358_vm0, %v3422_v25, %v2940_v8  ;;  %v3615_v10 = vmul.f32 0.17677669, %v966_v40 }
 0x279   : > { %v702_v26 = vpack.c.bf16 %v691_v50, %v690_v3 }
 0x27d   : > { %v2933_v22 = vpop.permute.xlu1 %2932 }
 0x27e   : > { %v2935_v32 = vunpack.i.h.bf16 %v2933_v22  ;;  %v2934_v33 = vunpack.i.l.bf16 %v2933_v22  ;;  %2952 = vrot.lane.b32.xlu1 %v2951_v49, %s3182_s19  ;;  %v969_v42 = vpop.f32.mrf.mxu0 }
 0x27f   : > { %v3636_v16 = vmul.f32 0.17677669, %v969_v42 }
 0x280   : > { %v688_v51 = vsel %vm358_vm0, %v3397_v61, %v2934_v33  ;;  %v689_v56 = vsel %vm358_vm0, %v3401_v63, %v2935_v32 }
 0x281   : > { %v701_v45 = vpack.c.bf16 %v689_v56, %v688_v51 }
 0x283   : > { %2794 = vmatmul.msk.bf16.gmra.mxu3 %vm738_vm1, %v701_v45 }
 0x285   : > { %v2943_v23 = vpop.permute.xlu2 %2942 }
 0x286   : > { %v2945_v61 = vunpack.i.h.bf16 %v2943_v23  ;;  %v2944_v24 = vunpack.i.l.bf16 %v2943_v23 }
 0x288   : > { %v692_v63 = vsel %vm358_vm0, %v3436_v43, %v2944_v24  ;;  %v693_v38 = vsel %vm358_vm0, %v3440_v48, %v2945_v61 }
 0x289   : > { %v703_v27 = vpack.c.bf16 %v693_v38, %v692_v63 }
 0x293   : > { %2795 = vmatmul.msk.bf16.gmra.mxu3 %vm738_vm1, %v702_v26 }
 0x2a3   : > { %2796 = vmatmul.msk.bf16.gmra.mxu3 %vm738_vm1, %v703_v27 }
 0x2a8   : > { %1019 = vmax.xlane.f32.xlu1 %v3615_v10 }
 0x2ad   : > { %v2948_v25 = vpop.permute.xlu1 %2947 }
 0x2ae   : > { %v2950_v28 = vunpack.i.h.bf16 %v2948_v25  ;;  %v2949_v29 = vunpack.i.l.bf16 %v2948_v25 }
 0x2b0   : > { %v694_v35 = vsel %vm358_vm0, %v3451_v21, %v2949_v29  ;;  %v695_v43 = vsel %vm358_vm0, %v3456_v34, %v2950_v28  ;;  %v971_v21 = vpop.f32.mrf.mxu0 }
 0x2b1   : > { %v704_v17 = vpack.c.bf16 %v695_v43, %v694_v35  ;;  %v3670_v23 = vmul.f32 0.17677669, %v971_v21 }
 0x2b3   : > { %2797 = vmatmul.msk.bf16.gmra.mxu3 %vm738_vm1, %v704_v17 }
 0x2b4   : > { %v1006_v48 = vpop.xlane.xlu0 %1005 }
 0x2b5   : > { %v1037_v30 = vsub.f32 %v3561_v20, %v1006_v48 }
 0x2b7   : > { %v1053_v13 = vmul.f32 1.442695, %v1037_v30 }
 0x2b8   : > { %v974_v20 = vpop.f32.mrf.mxu0 }
 0x2b9   : > { %2956 = vpow2.f32 %v1053_v13  ;;  %v3677_v27 = vmul.f32 0.17677669, %v974_v20 }
 0x2bf   : > { %v3624_v9 = vpop.eup %2956 }
 0x2c0   : > { %1085 = vadd.xlane.f32.xlu0 %v3624_v9 }
 0x2c1   : > { %1161 = vrot.lane.b32.xlu1 %v3381_v55, %s3182_s19  ;;  %v976_v55 = vpop.f32.mrf.mxu0 }
 0x2c7   : > { %v1010_v14 = vpop.xlane.xlu2 %1009 }
 0x2cc   : > { %v1012_v15 = vpop.xlane.xlu0 %1011 }
 0x2cd   : > { %v1040_v0 = vsub.f32 %v3572_v39, %v1012_v15  ;;  %v979_v39 = vpop.f32.mrf.mxu0 }
 0x2ce   : > { %v3666_v3 = vmul.f32 0.17677669, %v979_v39 }
 0x2cf   : > { %v1059_v31 = vmul.f32 1.442695, %v1040_v0 }
 0x2d4   : > { %1157 = vrot.lane.b32.xlu0 %v3393_v60, %s3182_s19  ;;  %v1014_v19 = vpop.xlane.xlu2 %1013 }
 0x2d5   : > { %v1041_v60 = vsub.f32 %v3579_v37, %v1014_v19  ;;  %v981_v45 = vpop.f32.mrf.mxu0 }
 0x2d6   : > { %v3690_v17 = vpop.f32.mrf.mxu3 }
 0x2d7   : > { %v1061_v11 = vmul.f32 1.442695, %v1041_v60 }
 0x2d8   : > { %v1008_v34 = vpop.xlane.xlu1 %1007 }
 0x2d9   : > { %v1038_v46 = vsub.f32 %v3582_v18, %v1008_v34  ;;  %v1039_v18 = vsub.f32 %v3568_v36, %v1010_v14 }
 0x2db   : > { %v1055_v6 = vmul.f32 1.442695, %v1038_v46  ;;  %v1057_v33 = vmul.f32 1.442695, %v1039_v18 }
 0x2dc   : > { %v1016_v61 = vpop.xlane.xlu0 %1015 }
 0x2dd   : > { %2958 = vpow2.f32 %v1055_v6  ;;  %v984_v8 = vpop.f32.mrf.mxu0  ;;  %v1042_v63 = vsub.f32 %v3586_v4, %v1016_v61 }
 0x2de   : > { %2960 = vpow2.f32 %v1059_v31  ;;  %v3663_v2 = vmul.f32 0.17677669, %v984_v8  ;;  %v3692_v30 = vpop.f32.mrf.mxu3 }
 0x2df   : > { %2962 = vpow2.f32 %v1061_v11  ;;  %v1063_v38 = vmul.f32 1.442695, %v1042_v63 }
 0x2e0   : > { %2964 = vpow2.f32 %v1057_v33 }
 0x2e3   : > { %v3632_v41 = vpop.eup %2958 }
 0x2e4   : > { %1087 = vadd.xlane.f32.xlu2 %v3632_v41  ;;  %v3641_v32 = vpop.eup %2960  ;;  %v1018_v40 = vpop.xlane.xlu2 %1017 }
 0x2e5   : > { %v3649_v36 = vpop.eup %2962  ;;  %v986_v35 = vpop.f32.mrf.mxu0 }
 0x2e6   : > { %v3654_v7 = vpop.eup %2964  ;;  %v3687_v43 = vmul.f32 0.17677669, %v986_v35  ;;  %v3696_v14 = vpop.f32.mrf.mxu3 }
 0x2eb   : > { %1021 = vmax.xlane.f32.xlu1 %v3636_v16 }
 0x2f0   : > { %v2953_v12 = vpop.permute.xlu1 %2952 }
 0x2f1   : > { %v2955_v49 = vunpack.i.h.bf16 %v2953_v12  ;;  %v2954_v22 = vunpack.i.l.bf16 %v2953_v12 }
 0x2f3   : > { %1091 = vadd.xlane.f32.xlu1 %v3641_v32  ;;  %v696_v51 = vsel %vm358_vm0, %v3471_v54, %v2954_v22  ;;  %v697_v56 = vsel %vm358_vm0, %v3475_v1, %v2955_v49  ;;  %v3657_v54 = vmul.f32 0.17677669, %v981_v45  ;;  %v3660_v1 = vmul.f32 0.17677669, %v976_v55 }
 0x2f4   : > { %v705_v37 = vpack.c.bf16 %v697_v56, %v696_v51 }
 0x2f6   : > { %2798 = vmatmul.msk.bf16.gmra.mxu3 %vm738_vm1, %v705_v37 }
 0x2fb   : > { %1093 = vadd.xlane.f32.xlu1 %v3649_v36 }
 0x2fc   : > { %1159 = vrot.lane.b32.xlu2 %v3466_v62, %s3182_s19 }
 0x2fe   : > { %1089 = vadd.xlane.f32.xlu0 %v3654_v7 }
 0x303   : > { %1031 = vmax.xlane.f32.xlu1 %v3657_v54 }
 0x306   : > { %1027 = vmax.xlane.f32.xlu0 %v3660_v1 }
 0x30b   : > { %1033 = vmax.xlane.f32.xlu1 %v3663_v2 }
 0x30e   : > { %1029 = vmax.xlane.f32.xlu0 %v3666_v3 }
 0x31b   : > { %v1020_v62 = vpop.xlane.xlu1 %1019 }
 0x31c   : > { %v1044_v50 = vsub.f32 %v3615_v10, %v1020_v62  ;;  %v1043_v10 = vsub.f32 %v3589_v5, %v1018_v40 }
 0x31e   : > { %v1067_v26 = vmul.f32 1.442695, %v1044_v50  ;;  %v1065_v25 = vmul.f32 1.442695, %v1043_v10 }
 0x320   : > { %2966 = vpow2.f32 %v1067_v26 }
 0x321   : > { %2968 = vpow2.f32 %v1063_v38 }
 0x322   : > { %2970 = vpow2.f32 %v1065_v25 }
 0x325   : > { %1023 = vmax.xlane.f32.xlu2 %v3670_v23 }
 0x326   : > { %v3673_v24 = vpop.eup %2966 }
 0x327   : > { %1099 = vadd.xlane.f32.xlu0 %v3673_v24  ;;  %v3681_v29 = vpop.eup %2968 }
 0x328   : > { %v3684_v4 = vpop.eup %2970 }
 0x32d   : > { %1025 = vmax.xlane.f32.xlu2 %v3677_v27 }
 0x333   : > { %v1162_v28 = vpop.permute.xlu1 %1161  ;;  %v1086_v5 = vpop.xlane.xlu0 %1085 }
 0x334   : > { %1186 = vmatpush.bf16.msrb.mxu3 %v1162_v28 }
 0x335   : > { %1095 = vadd.xlane.f32.xlu2 %v3681_v29 }
 0x33d   : > { %1097 = vadd.xlane.f32.xlu2 %v3684_v4 }
 0x345   : > { %1035 = vmax.xlane.f32.xlu2 %v3687_v43 }
 0x346   : > { %v1158_v15 = vpop.permute.xlu0 %1157 }
 0x357   : > { %v1088_v48 = vpop.xlane.xlu2 %1087 }
 0x358   : > { %2972 = vrcp.f32 %v1088_v48 }
 0x359   : > { %2974 = vrcp.f32 %v1086_v5 }
 0x35e   : > { %v2973_v13 = vpop.eup %2972  ;;  %v1022_v42 = vpop.xlane.xlu1 %1021 }
 0x35f   : > { %v1045_v21 = vsub.f32 %v3636_v16, %v1022_v42  ;;  %v1160_v34 = vpop.permute.xlu2 %1159  ;;  %v2975_v46 = vpop.eup %2974  ;;  %v1134_v20 = vmul.f32 %v2973_v13, %v3632_v41 }
 0x360   : > { %1187 = vmatpush.bf16.msrb.mxu3 %v1160_v34  ;;  %v1133_v0 = vmul.f32 %v2975_v46, %v3624_v9  ;;  %v3702_v16 = vpop.f32.mrf.mxu3 }
 0x361   : > { %v1069_v6 = vmul.f32 1.442695, %v1045_v21 }
 0x362   : > { %v1149_v55 = vpack.c.bf16 %v1134_v20, %v1133_v0 }
 0x363   : > { %2976 = vpow2.f32 %v1069_v6 }
 0x364   : > { %1188 = vmatpush.bf16.msrb.mxu3 %v1158_v15 }
 0x366   : > { %v1092_v31 = vpop.xlane.xlu1 %1091 }
 0x367   : > { %1189 = vmatmul.bf16.vlgmr.msrb.gmra.mxu3 %v1149_v55  ;;  %2978 = vrcp.f32 %v1092_v31 }
 0x368   : > { %v3704_v11 = vpop.f32.mrf.mxu3 }
 0x369   : > { %v3699_v19 = vpop.eup %2976 }
 0x36a   : > { %1101 = vadd.xlane.f32.xlu0 %v3699_v19 }
 0x36d   : > { %v2979_v41 = vpop.eup %2978 }
 0x36e   : > { %v1094_v60 = vpop.xlane.xlu1 %1093  ;;  %v1136_v39 = vmul.f32 %v2979_v41, %v3641_v32 }
 0x370   : > { %v3710_v8 = vpop.f32.mrf.mxu3 }
 0x371   : > { %v1090_v18 = vpop.xlane.xlu0 %1089 }
 0x372   : > { %2980 = vrcp.f32 %v1090_v18 }
 0x376   : > { %v1032_v12 = vpop.xlane.xlu1 %1031 }
 0x377   : > { %v1050_v48 = vsub.f32 %v3657_v54, %v1032_v12 }
 0x378   : > { %v2981_v49 = vpop.eup %2980 }
 0x379   : > { %v1028_v9 = vpop.xlane.xlu0 %1027  ;;  %v1135_v22 = vmul.f32 %v2981_v49, %v3654_v7  ;;  %v3715_v7 = vpop.f32.mrf.mxu3  ;;  %v1079_v13 = vmul.f32 1.442695, %v1050_v48 }
 0x37a   : > { %v1048_v33 = vsub.f32 %v3660_v1, %v1028_v9 }
 0x37b   : > { %v1150_v51 = vpack.c.bf16 %v1136_v39, %v1135_v22 }
 0x37c   : > { %v1075_v56 = vmul.f32 1.442695, %v1048_v33 }
 0x37d   : > { %1194 = vmatmul.bf16.gmra.mxu3 %v1150_v51 }
 0x37e   : > { %2982 = vpow2.f32 %v1075_v56  ;;  %v1034_v37 = vpop.xlane.xlu1 %1033 }
 0x37f   : > { %v1051_v45 = vsub.f32 %v3663_v2, %v1034_v37 }
 0x381   : > { %v1081_v62 = vmul.f32 1.442695, %v1051_v45  ;;  %v3720_v1 = vpop.f32.mrf.mxu3  ;;  %v1030_v61 = vpop.xlane.xlu0 %1029  ;;  %v3768_v45 = vld [vmem:[%s3246_s10 + $0x8] sm:$0xff] }
 0x382   : > { %v1049_v38 = vsub.f32 %v3666_v3, %v1030_v61  ;;  %v3773_v61 = vld [vmem:[%s3246_s10 + $0x10] sm:$0xff] }
 0x383   : > { %2984 = vpow2.f32 %v1081_v62 }
 0x384   : > { %v3712_v50 = vpop.eup %2982  ;;  %v1077_v10 = vmul.f32 1.442695, %v1049_v38  ;;  %v3778_v38 = vld [vmem:[%s3246_s10 + $0x18] sm:$0xff] }
 0x385   : > { %1107 = vadd.xlane.f32.xlu0 %v3712_v50 }
 0x389   : > { %v3717_v32 = vpop.eup %2984  ;;  %v3724_v40 = vpop.f32.mrf.mxu3 }
 0x38d   : > { %1113 = vadd.xlane.f32.xlu0 %v3717_v32 }
 0x398   : > { %v1024_v26 = vpop.xlane.xlu2 %1023 }
 0x399   : > { %v1046_v2 = vsub.f32 %v3670_v23, %v1024_v26  ;;  %v3731_v23 = vpop.f32.mrf.mxu3 }
 0x39a   : > { %v1100_v55 = vpop.xlane.xlu0 %1099 }
 0x39b   : > { %v1071_v63 = vmul.f32 1.442695, %v1046_v2 }
 0x39d   : > { %2986 = vpow2.f32 %v1071_v63 }
 0x39e   : > { %2988 = vpow2.f32 %v1077_v10 }
 0x3a0   : > { %v1026_v25 = vpop.xlane.xlu2 %1025 }
 0x3a1   : > { %v1047_v28 = vsub.f32 %v3677_v27, %v1026_v25  ;;  %v3741_v20 = vpop.f32.mrf.mxu3 }
 0x3a3   : > { %v3727_v35 = vpop.eup %2986  ;;  %v1073_v5 = vmul.f32 1.442695, %v1047_v28 }
 0x3a4   : > { %1103 = vadd.xlane.f32.xlu1 %v3727_v35  ;;  %v3733_v42 = vpop.eup %2988 }
 0x3a5   : > { %2990 = vpow2.f32 %v1073_v5 }
 0x3a6   : > { %2992 = vrcp.f32 %v1094_v60 }
 0x3a8   : > { %v1096_v3 = vpop.xlane.xlu2 %1095 }
 0x3a9   : > { %2994 = vrcp.f32 %v1096_v3 }
 0x3aa   : > { %2996 = vpow2.f32 %v1079_v13 }
 0x3ab   : > { %v3735_v21 = vpop.eup %2990 }
 0x3ac   : > { %1109 = vadd.xlane.f32.xlu1 %v3733_v42  ;;  %1105 = vadd.xlane.f32.xlu2 %v3735_v21  ;;  %v2993_v27 = vpop.eup %2992 }
 0x3ad   : > { %v1137_v54 = vmul.f32 %v2993_v27, %v3649_v36  ;;  %v3747_v36 = vpop.f32.mrf.mxu3 }
 0x3af   : > { %v2995_v34 = vpop.eup %2994 }
 0x3b0   : > { %v1098_v46 = vpop.xlane.xlu2 %1097  ;;  %v1138_v6 = vmul.f32 %v2995_v34, %v3681_v29  ;;  %v3743_v0 = vpop.eup %2996 }
 0x3b1   : > { %2998 = vrcp.f32 %v1098_v46 }
 0x3b2   : > { %v1151_v15 = vpack.c.bf16 %v1138_v6, %v1137_v54  ;;  %3000 = vrcp.f32 %v1100_v55 }
 0x3b4   : > { %1111 = vadd.xlane.f32.xlu2 %v3743_v0  ;;  %1199 = vmatmul.bf16.gmra.mxu3 %v1151_v15 }
 0x3b7   : > { %v2999_v18 = vpop.eup %2998 }
 0x3b8   : > { %v1036_v31 = vpop.xlane.xlu2 %1035  ;;  %v3001_v29 = vpop.eup %3000  ;;  %v1139_v12 = vmul.f32 %v2999_v18, %v3684_v4  ;;  %v3763_v4 = vld [vmem:[%s3246_s10] sm:$0xff] }
 0x3b9   : > { %v1052_v60 = vsub.f32 %v3687_v43, %v1036_v31  ;;  %v1140_v49 = vmul.f32 %v3001_v29, %v3673_v24  ;;  %v3754_v43 = vpop.f32.mrf.mxu3 }
 0x3bb   : > { %v1083_v41 = vmul.f32 1.442695, %v1052_v60  ;;  %v1152_v9 = vpack.c.bf16 %v1140_v49, %v1139_v12 }
 0x3bd   : > { %3002 = vpow2.f32 %v1083_v41 }
 0x3c1   : > { %v3756_v39 = vpop.f32.mrf.mxu3 }
 0x3c3   : > { %v3751_v22 = vpop.eup %3002 }
 0x3c4   : > { %1115 = vadd.xlane.f32.xlu1 %v3751_v22  ;;  %1204 = vmatmul.bf16.gmra.mxu3 %v1152_v9  ;;  %v3159_v9 = vld [vmem:[%s3246_s10 + $0x28] sm:$0xff] }
 0x3c9   : > { %v3758_v33 = vpop.f32.mrf.mxu3 }
 0x3d1   : > { %v3760_v51 = vpop.f32.mrf.mxu3 }
 0x3dd   : > { %v1102_v25 = vpop.xlane.xlu0 %1101 }
 0x3de   : > { %3004 = vrcp.f32 %v1102_v25 }
 0x3e4   : > { %v3005_v5 = vpop.eup %3004 }
 0x3e5   : > { %v1141_v3 = vmul.f32 %v3005_v5, %v3699_v19  ;;  %v3797_v5 = vld [vmem:[%s3246_s10 + $0x38] sm:$0xff] }
 0x3ea   : > { %v1190_v56 = vpop.f32.mrf.mxu3 }
 0x3eb   : > { %v1230_v24 = vadd.f32 %v3763_v4, %v1190_v56 }
 0x3ed   : > { %1262 = vrot.lane.b32.xlu2 %v1230_v24, %s3182_s19 }
 0x3f2   : > { %v1192_v37 = vpop.f32.mrf.mxu3 }
 0x3f3   : > { %v1231_v62 = vadd.f32 %v3768_v45, %v1192_v37 }
 0x3f5   : > { %1264 = vrot.lane.b32.xlu0 %v1231_v62, %s3182_s19 }
 0x3f8   : > { %v1108_v46 = vpop.xlane.xlu0 %1107 }
 0x400   : > { %v1195_v26 = vpop.f32.mrf.mxu3  ;;  %v1114_v62 = vpop.xlane.xlu0 %1113 }
 0x401   : > { %v1232_v2 = vadd.f32 %v3773_v61, %v1195_v26 }
 0x403   : > { %1266 = vrot.lane.b32.xlu1 %v1232_v2, %s3182_s19  ;;  %v3160_v2 = vld [vmem:[%s3246_s10 + $0x30] sm:$0xff] }
 0x408   : > { %v1197_v63 = vpop.f32.mrf.mxu3 }
 0x409   : > { %v1233_v10 = vadd.f32 %v3778_v38, %v1197_v63 }
 0x40b   : > { %1268 = vrot.lane.b32.xlu0 %v1233_v10, %s3182_s19 }
 0x417   : > { %v1104_v28 = vpop.xlane.xlu1 %1103 }
 0x418   : > { %3006 = vrcp.f32 %v1104_v28 }
 0x41e   : > { %v3007_v48 = vpop.eup %3006 }
 0x41f   : > { %v1142_v13 = vmul.f32 %v3007_v48, %v3727_v35  ;;  %v1106_v27 = vpop.xlane.xlu2 %1105  ;;  %v1110_v18 = vpop.xlane.xlu1 %1109  ;;  %v3158_v35 = vld [vmem:[%s3246_s10 + $0x20] sm:$0xff] }
 0x420   : > { %3008 = vrcp.f32 %v1106_v27  ;;  %v812_v27 = vadd.f32 %v3690_v17, %v3387_v57 }
 0x421   : > { %v1153_v34 = vpack.c.bf16 %v1142_v13, %v1141_v3  ;;  %3010 = vrcp.f32 %v1108_v46  ;;  %v813_v13 = vadd.f32 %v3692_v30, %v3389_v58 }
 0x423   : > { %1209 = vmatmul.bf16.gmra.mxu3 %v1153_v34 }
 0x426   : > { %v3009_v54 = vpop.eup %3008 }
 0x427   : > { %v3011_v6 = vpop.eup %3010  ;;  %v1143_v15 = vmul.f32 %v3009_v54, %v3735_v21  ;;  %v1112_v31 = vpop.xlane.xlu2 %1111  ;;  %v814_v54 = vadd.f32 %v3696_v14, %v3459_v44 }
 0x428   : > { %v1144_v55 = vmul.f32 %v3011_v6, %v3712_v50  ;;  %3012 = vrcp.f32 %v1112_v31 }
 0x429   : > { %3014 = vrcp.f32 %v1110_v18  ;;  %v830_v57 = vadd.f32 %v3773_v61, %v814_v54  ;;  %v3168_v54 = vld [vmem:[%s3246_s10 + $0x70] sm:$0xff] }
 0x42a   : > { %v1154_v60 = vpack.c.bf16 %v1144_v55, %v1143_v15  ;;  %v815_v55 = vadd.f32 %v3702_v16, %v3462_v59 }
 0x42c   : > { %v831_v61 = vadd.f32 %v3778_v38, %v815_v55 }
 0x42e   : > { %v3013_v29 = vpop.eup %3012 }
 0x42f   : > { %v3015_v12 = vpop.eup %3014  ;;  %v1146_v49 = vmul.f32 %v3013_v29, %v3743_v0 }
 0x430   : > { %v1145_v50 = vmul.f32 %v3015_v12, %v3733_v42 }
 0x432   : > { %v1155_v37 = vpack.c.bf16 %v1146_v49, %v1145_v50  ;;  %v3163_v50 = vld [vmem:[%s3246_s10 + $0x48] sm:$0xff] }
 0x433   : > { %1214 = vmatmul.bf16.gmra.mxu3 %v1154_v60  ;;  %v816_v60 = vadd.f32 %v3704_v11, %v3375_v52 }
 0x437   : > { %v1200_v19 = vpop.f32.mrf.mxu3  ;;  %v1116_v24 = vpop.xlane.xlu1 %1115 }
 0x438   : > { %v1234_v41 = vadd.f32 %v3158_v35, %v1200_v19  ;;  %3016 = vrcp.f32 %v1116_v24 }
 0x439   : > { %3018 = vrcp.f32 %v1114_v62 }
 0x43a   : > { %1270 = vrot.lane.b32.xlu2 %v1234_v41, %s3182_s19  ;;  %v832_v41 = vadd.f32 %v3158_v35, %v816_v60  ;;  %v817_v35 = vadd.f32 %v3710_v8, %v3377_v53 }
 0x43e   : > { %v3017_v10 = vpop.eup %3016 }
 0x43f   : > { %v1202_v21 = vpop.f32.mrf.mxu3  ;;  %v3019_v0 = vpop.eup %3018  ;;  %v1148_v42 = vmul.f32 %v3017_v10, %v3751_v22  ;;  %v829_v22 = vadd.f32 %v3768_v45, %v813_v13  ;;  %v3164_v10 = vld [vmem:[%s3246_s10 + $0x50] sm:$0xff] }
 0x440   : > { %v1235_v56 = vadd.f32 %v3159_v9, %v1202_v21  ;;  %v1147_v28 = vmul.f32 %v3019_v0, %v3717_v32  ;;  %v828_v32 = vadd.f32 %v3763_v4, %v812_v27  ;;  %v3162_v21 = vld [vmem:[%s3246_s10 + $0x40] sm:$0xff] }
 0x441   : > { %v3166_v27 = vld [vmem:[%s3246_s10 + $0x60] sm:$0xff] }
 0x442   : > { %1272 = vrot.lane.b32.xlu1 %v1235_v56, %s3182_s19  ;;  %v1156_v3 = vpack.c.bf16 %v1148_v42, %v1147_v28 }
 0x443   : > { %1219 = vmatmul.bf16.gmra.mxu3 %v1155_v37  ;;  %v833_v37 = vadd.f32 %v3159_v9, %v817_v35 }
 0x447   : > { %v1205_v26 = vpop.f32.mrf.mxu3  ;;  %v1263_v46 = vpop.permute.xlu2 %1262 }
 0x448   : > { %v1236_v63 = vadd.f32 %v3160_v2, %v1205_v26  ;;  %v3813_v15 = vsel %vm358_vm0, %v828_v32, %v1263_v46  ;;  %v818_v26 = vadd.f32 %v3715_v7, %v3363_v47 }
 0x449   : > { %v1326_v17 = vsel %vm738_vm1, %v3813_v15, 0.0 }
 0x44a   : > { %1274 = vrot.lane.b32.xlu0 %v1236_v63, %s3182_s19  ;;  %v834_v8 = vadd.f32 %v3160_v2, %v818_v26 }
 0x44f   : > { %v1207_v25 = vpop.f32.mrf.mxu3 }
 0x450   : > { %v1237_v48 = vadd.f32 %v3797_v5, %v1207_v25 }
 0x452   : > { %1276 = vrot.lane.b32.xlu2 %v1237_v48, %s3182_s19  ;;  %v3165_v48 = vld [vmem:[%s3246_s10 + $0x58] sm:$0xff] }
 0x453   : > { %1224 = vmatmul.bf16.gmra.mxu3 %v1156_v3 }
 0x467   : > { %v1265_v34 = vpop.permute.xlu0 %1264 }
 0x468   : > { %v3810_v6 = vsel %vm358_vm0, %v829_v22, %v1265_v34  ;;  %v3167_v22 = vld [vmem:[%s3246_s10 + $0x68] sm:$0xff] }
 0x469   : > { %v1327_v58 = vsel %vm738_vm1, %v3810_v6, 0.0 }
 0x46a   : > { %v1328_v45 = vadd.f32 %v1327_v58, %v1326_v17  ;;  %v3169_v17 = vld [vmem:[%s3246_s10 + $0x78] sm:$0xff] }
 0x475   : > { %v1267_v30 = vpop.permute.xlu1 %1266 }
 0x476   : > { %v3821_v4 = vsel %vm358_vm0, %v830_v57, %v1267_v30 }
 0x477   : > { %v1329_v44 = vsel %vm738_vm1, %v3821_v4, 0.0 }
 0x478   : > { %v1330_v14 = vadd.f32 %v1329_v44, %v1328_v45  ;;  %v4840_v45 = vld [vmem:[#allocation2_spill] sm:$0xff] }
 0x479   : > { %v819_v44 = vadd.f32 %v3720_v1, %v4840_v45  ;;  %v4847_v45 = vld [vmem:[#allocation9_spill] sm:$0xff] }
 0x47b   : > { %v835_v55 = vadd.f32 %v3797_v5, %v819_v44  ;;  %v3183_v44 = vmov 128.0  }
 0x47c   : > { %3020 = vrcp.f32 %v3183_v44 }
 0x47d   : > { %v1269_v31 = vpop.permute.xlu0 %1268 }
 0x47e   : > { %v3831_v18 = vsel %vm358_vm0, %v831_v61, %v1269_v31  ;;  %v4841_v31 = vld [vmem:[#allocation5_spill] sm:$0xff] }
 0x47f   : > { %v1331_v19 = vsel %vm738_vm1, %v3831_v18, 0.0  ;;  %v820_v61 = vadd.f32 %v3724_v40, %v4841_v31  ;;  %v4848_v31 = vld [vmem:[#allocation10_spill] sm:$0xff] }
 0x480   : > { %v1332_v12 = vadd.f32 %v1331_v19, %v1330_v14 }
 0x481   : > { %v836_v19 = vadd.f32 %v3162_v21, %v820_v61  ;;  %v827_v61 = vadd.f32 %v3760_v51, %v4848_v31 }
 0x494   : > { %v1271_v29 = vpop.permute.xlu2 %1270 }
 0x495   : > { %v3836_v49 = vsel %vm358_vm0, %v832_v41, %v1271_v29 }
 0x496   : > { %v1333_v59 = vsel %vm738_vm1, %v3836_v49, 0.0 }
 0x497   : > { %v1334_v16 = vadd.f32 %v1333_v59, %v1332_v12 }
 0x4a6   : > { %v1210_v38 = vpop.f32.mrf.mxu3 }
 0x4a7   : > { %v1238_v52 = vadd.f32 %v3162_v21, %v1210_v38  ;;  %v4843_v38 = vld [vmem:[#allocation3_spill] sm:$0xff] }
 0x4a8   : > { %v822_v40 = vadd.f32 %v3741_v20, %v4843_v38 }
 0x4a9   : > { %1278 = vrot.lane.b32.xlu1 %v1238_v52, %s3182_s19 }
 0x4ac   : > { %v1277_v14 = vpop.permute.xlu2 %1276 }
 0x4ad   : > { %v3876_v60 = vsel %vm358_vm0, %v835_v55, %v1277_v14  ;;  %v3021_v55 = vpop.eup %3020 }
 0x4ae   : > { %v1212_v11 = vpop.f32.mrf.mxu3  ;;  %v1339_v41 = vsel %vm738_vm1, %v3876_v60, 0.0  ;;  %vm1368_vm2 = vweird.f32 %v3021_v55 }
 0x4af   : > { %v1239_v56 = vadd.f32 %v3163_v50, %v1212_v11 }
 0x4b1   : > { %1280 = vrot.lane.b32.xlu0 %v1239_v56, %s3182_s19  ;;  %v838_v56 = vadd.f32 %v3164_v10, %v822_v40 }
 0x4b4   : > { %v1273_v24 = vpop.permute.xlu1 %1272 }
 0x4b5   : > { %v3849_v63 = vsel %vm358_vm0, %v833_v37, %v1273_v24 }
 0x4b6   : > { %v1215_v62 = vpop.f32.mrf.mxu3  ;;  %v1335_v53 = vsel %vm738_vm1, %v3849_v63, 0.0 }
 0x4b7   : > { %v1240_v0 = vadd.f32 %v3164_v10, %v1215_v62  ;;  %v1336_v25 = vadd.f32 %v1335_v53, %v1334_v16  ;;  %v4842_v16 = vld [vmem:[#allocation6_spill] sm:$0xff]  ;;  %v4845_v10 = vld [vmem:[#allocation7_spill] sm:$0xff] }
 0x4b8   : > { %v821_v5 = vadd.f32 %v3731_v23, %v4842_v16 }
 0x4b9   : > { %1282 = vrot.lane.b32.xlu2 %v1240_v0, %s3182_s19 }
 0x4ba   : > { %v837_v21 = vadd.f32 %v3163_v50, %v821_v5 }
 0x4bc   : > { %v1275_v42 = vpop.permute.xlu0 %1274 }
 0x4bd   : > { %v3856_v9 = vsel %vm358_vm0, %v834_v8, %v1275_v42  ;;  %v4844_v8 = vld [vmem:[#allocation4_spill] sm:$0xff] }
 0x4be   : > { %v1337_v47 = vsel %vm738_vm1, %v3856_v9, 0.0  ;;  %v1217_v7 = vpop.f32.mrf.mxu3  ;;  %v823_v23 = vadd.f32 %v3747_v36, %v4844_v8 }
 0x4bf   : > { %v1338_v28 = vadd.f32 %v1337_v47, %v1336_v25  ;;  %v1241_v3 = vadd.f32 %v3165_v48, %v1217_v7  ;;  %v824_v47 = vadd.f32 %v3754_v43, %v4845_v10  ;;  %v4846_v7 = vld [vmem:[#allocation8_spill] sm:$0xff]  ;;  %v826_v43 = vadd.f32 %v3758_v33, %v4847_v45 }
 0x4c0   : > { %v839_v42 = vadd.f32 %v3165_v48, %v823_v23 }
 0x4c1   : > { %1284 = vrot.lane.b32.xlu1 %v1241_v3, %s3182_s19  ;;  %v1340_v59 = vadd.f32 %v1339_v41, %v1338_v28  ;;  %v825_v28 = vadd.f32 %v3756_v39, %v4846_v7  ;;  %v842_v39 = vadd.f32 %v3168_v54, %v826_v43  ;;  %v1364_v41 = vmul.f32 128.0, %v3021_v55 }
 0x4c3   : > { %v1365_v33 = vsub.f32 1.0, %v1364_v41 }
 0x4c5   : > { %v1366_v38 = vmul.f32 %v3021_v55, %v1365_v33 }
 0x4c6   : > { %v1220_v13 = vpop.f32.mrf.mxu3 }
 0x4c7   : > { %v1242_v34 = vadd.f32 %v3166_v27, %v1220_v13 }
 0x4c9   : > { %1286 = vrot.lane.b32.xlu0 %v1242_v34, %s3182_s19  ;;  %v840_v34 = vadd.f32 %v3166_v27, %v824_v47 }
 0x4ce   : > { %v1222_v2 = vpop.f32.mrf.mxu3 }
 0x4cf   : > { %v1243_v46 = vadd.f32 %v3167_v22, %v1222_v2  ;;  %v841_v2 = vadd.f32 %v3167_v22, %v825_v28 }
 0x4d1   : > { %1288 = vrot.lane.b32.xlu2 %v1243_v46, %s3182_s19 }
 0x4d6   : > { %v1225_v32 = vpop.f32.mrf.mxu3 }
 0x4d7   : > { %v1244_v58 = vadd.f32 %v3168_v54, %v1225_v32 }
 0x4d9   : > { %1290 = vrot.lane.b32.xlu1 %v1244_v58, %s3182_s19 }
 0x4de   : > { %v1227_v57 = vpop.f32.mrf.mxu3 }
 0x4df   : > { %v1245_v30 = vadd.f32 %v3169_v17, %v1227_v57 }
 0x4e1   : > { %1292 = vrot.lane.b32.xlu0 %v1245_v30, %s3182_s19 }
 0x513   : > { %v1283_v11 = vpop.permute.xlu2 %1282 }
 0x514   : > { %v1320_v24 = vsel %vm358_vm0, %v838_v56, %v1283_v11  ;;  %v1367_v11 = vadd.f32 %v3021_v55, %v1366_v38 }
 0x515   : > { %v1345_v0 = vsel %vm738_vm1, %v1320_v24, 0.0 }
 0x516   : > { %v3916_v56 = vsel %vm1368_vm2, %v3021_v55, %v1367_v11 }
 0x51b   : > { %v1279_v29 = vpop.permute.xlu1 %1278 }
 0x51c   : > { %v3881_v12 = vsel %vm358_vm0, %v836_v19, %v1279_v29  ;;  %v843_v29 = vadd.f32 %v3169_v17, %v827_v61 }
 0x51d   : > { %v1341_v1 = vsel %vm738_vm1, %v3881_v12, 0.0 }
 0x51e   : > { %v1342_v52 = vadd.f32 %v1341_v1, %v1340_v59 }
 0x523   : > { %v1281_v35 = vpop.permute.xlu0 %1280 }
 0x524   : > { %v1319_v37 = vsel %vm358_vm0, %v837_v21, %v1281_v35 }
 0x525   : > { %v1343_v62 = vsel %vm738_vm1, %v1319_v37, 0.0 }
 0x526   : > { %v1344_v26 = vadd.f32 %v1343_v62, %v1342_v52 }
 0x528   : > { %v1346_v53 = vadd.f32 %v1345_v0, %v1344_v26 }
 0x52b   : > { %v1289_v13 = vpop.permute.xlu2 %1288 }
 0x52c   : > { %v1323_v32 = vsel %vm358_vm0, %v841_v2, %v1289_v13 }
 0x52d   : > { %v1351_v57 = vsel %vm738_vm1, %v1323_v32, 0.0 }
 0x533   : > { %v1285_v20 = vpop.permute.xlu1 %1284 }
 0x534   : > { %v1321_v25 = vsel %vm358_vm0, %v839_v42, %v1285_v20 }
 0x535   : > { %v1347_v50 = vsel %vm738_vm1, %v1321_v25, 0.0 }
 0x536   : > { %v1348_v3 = vadd.f32 %v1347_v50, %v1346_v53 }
 0x53b   : > { %v1287_v46 = vpop.permute.xlu0 %1286 }
 0x53c   : > { %v1322_v36 = vsel %vm358_vm0, %v840_v34, %v1287_v46 }
 0x53d   : > { %v1349_v48 = vsel %vm738_vm1, %v1322_v36, 0.0 }
 0x53e   : > { %v1350_v58 = vadd.f32 %v1349_v48, %v1348_v3 }
 0x540   : > { %v1352_v30 = vadd.f32 %v1351_v57, %v1350_v58 }
 0x54b   : > { %v1291_v14 = vpop.permute.xlu1 %1290 }
 0x54c   : > { %v1324_v27 = vsel %vm358_vm0, %v842_v39, %v1291_v14 }
 0x54d   : > { %v1353_v22 = vsel %vm738_vm1, %v1324_v27, 0.0 }
 0x54e   : > { %v1354_v19 = vadd.f32 %v1353_v22, %v1352_v30 }
 0x553   : > { %v1293_v59 = vpop.permute.xlu0 %1292 }
 0x554   : > { %v3912_v1 = vsel %vm358_vm0, %v843_v29, %v1293_v59 }
 0x555   : > { %v1355_v54 = vsel %vm738_vm1, %v3912_v1, 0.0 }
 0x556   : > { %v1356_v16 = vadd.f32 %v1355_v54, %v1354_v19 }
 0x558   : > { %v1357_v5 = vrot.slane %v1356_v16, 4 }
 0x55a   : > { %v1358_v40 = vadd.f32 %v1357_v5, %v1356_v16 }
 0x55c   : > { %v1359_v52 = vrot.slane %v1358_v40, 2 }
 0x55e   : > { %v1360_v21 = vadd.f32 %v1359_v52, %v1358_v40 }
 0x560   : > { %v1361_v51 = vrot.slane %v1360_v21, 1 }
 0x562   : > { %v1362_v17 = vadd.f32 %v1361_v51, %v1360_v21 }
 0x564   : > { %v1370_v35 = vmul.f32 %v3916_v56, %v1362_v17 }
 0x566   : > { %v3920_v62 = vsub.f32 %v3813_v15, %v1370_v35  ;;  %v3923_v26 = vsub.f32 %v3810_v6, %v1370_v35  ;;  %v3926_v0 = vsub.f32 %v3821_v4, %v1370_v35  ;;  %v3929_v53 = vsub.f32 %v3836_v49, %v1370_v35 }
 0x567   : > { %v3932_v8 = vsub.f32 %v3856_v9, %v1370_v35  ;;  %v3935_v23 = vsub.f32 %v3881_v12, %v1370_v35  ;;  %v3937_v42 = vsub.f32 %v1319_v37, %v1370_v35  ;;  %v3939_v20 = vsub.f32 %v1320_v24, %v1370_v35 }
 0x568   : > { %v3941_v15 = vsub.f32 %v1321_v25, %v1370_v35  ;;  %v3943_v6 = vsub.f32 %v1322_v36, %v1370_v35  ;;  %v3945_v50 = vsub.f32 %v1323_v32, %v1370_v35  ;;  %v3947_v4 = vsub.f32 %v1324_v27, %v1370_v35 }
 0x569   : > { %v3950_v49 = vsub.f32 %v3831_v18, %v1370_v35  ;;  %v1387_v9 = vmul.f32 %v3920_v62, %v3920_v62  ;;  %v1388_v12 = vmul.f32 %v3923_v26, %v3923_v26  ;;  %v1389_v24 = vmul.f32 %v3926_v0, %v3926_v0 }
 0x56a   : > { %v3959_v37 = vsub.f32 %v3849_v63, %v1370_v35  ;;  %v1391_v7 = vmul.f32 %v3929_v53, %v3929_v53  ;;  %v3969_v13 = vsub.f32 %v3876_v60, %v1370_v35  ;;  %v1393_v46 = vmul.f32 %v3932_v8, %v3932_v8 }
 0x56b   : > { %v1390_v25 = vmul.f32 %v3950_v49, %v3950_v49  ;;  %v1403_v10 = vsel %vm738_vm1, %v1387_v9, 0.0  ;;  %v1404_v18 = vsel %vm738_vm1, %v1388_v12, 0.0  ;;  %v1406_v28 = vsel %vm738_vm1, %v1389_v24, 0.0 }
 0x56c   : > { %v1405_v47 = vadd.f32 %v1404_v18, %v1403_v10  ;;  %v1392_v63 = vmul.f32 %v3959_v37, %v3959_v37  ;;  %v1410_v32 = vsel %vm738_vm1, %v1391_v7, 0.0  ;;  %v1394_v48 = vmul.f32 %v3969_v13, %v3969_v13 }
 0x56d   : > { %v1408_v34 = vsel %vm738_vm1, %v1390_v25, 0.0  ;;  %v1395_v60 = vmul.f32 %v3935_v23, %v3935_v23  ;;  %v1414_v30 = vsel %vm738_vm1, %v1393_v46, 0.0  ;;  %v1396_v43 = vmul.f32 %v3937_v42, %v3937_v42 }
 0x56e   : > { %v1407_v3 = vadd.f32 %v1406_v28, %v1405_v47  ;;  %v1412_v58 = vsel %vm738_vm1, %v1392_v63, 0.0  ;;  %v1416_v44 = vsel %vm738_vm1, %v1394_v48, 0.0  ;;  %v1397_v14 = vmul.f32 %v3939_v20, %v3939_v20 }
 0x56f   : > { %v1418_v27 = vsel %vm738_vm1, %v1395_v60, 0.0  ;;  %v1398_v55 = vmul.f32 %v3941_v15, %v3941_v15  ;;  %v1420_v31 = vsel %vm738_vm1, %v1396_v43, 0.0  ;;  %v1399_v19 = vmul.f32 %v3943_v6, %v3943_v6 }
 0x570   : > { %v1409_v2 = vadd.f32 %v1408_v34, %v1407_v3  ;;  %v1422_v41 = vsel %vm738_vm1, %v1397_v14, 0.0  ;;  %v3996_v59 = vsub.f32 %v3912_v1, %v1370_v35  ;;  %v1400_v33 = vmul.f32 %v3945_v50, %v3945_v50 }
 0x571   : > { %v1424_v54 = vsel %vm738_vm1, %v1398_v55, 0.0  ;;  %v1401_v5 = vmul.f32 %v3947_v4, %v3947_v4  ;;  %v1426_v38 = vsel %vm738_vm1, %v1399_v19, 0.0 }
 0x572   : > { %v1411_v36 = vadd.f32 %v1410_v32, %v1409_v2  ;;  %v1402_v52 = vmul.f32 %v3996_v59, %v3996_v59  ;;  %v1428_v11 = vsel %vm738_vm1, %v1400_v33, 0.0  ;;  %v3170_v32 = vld [vmem:[%s4820_s6] sm:$0xff] }
 0x573   : > { %v1430_v1 = vsel %vm738_vm1, %v1401_v5, 0.0 }
 0x574   : > { %v1413_v57 = vadd.f32 %v1412_v58, %v1411_v36  ;;  %v1432_v17 = vsel %vm738_vm1, %v1402_v52, 0.0  ;;  %v4013_v36 = vperm.slane %v3170_v32, 1 }
 0x576   : > { %v1415_v45 = vadd.f32 %v1414_v30, %v1413_v57  ;;  %v4016_v57 = vperm.slane %v3170_v32, 2 }
 0x578   : > { %v1417_v39 = vadd.f32 %v1416_v44, %v1415_v45 }
 0x57a   : > { %v1419_v22 = vadd.f32 %v1418_v27, %v1417_v39 }
 0x57c   : > { %v1421_v61 = vadd.f32 %v1420_v31, %v1419_v22 }
 0x57e   : > { %v1423_v29 = vadd.f32 %v1422_v41, %v1421_v61 }
 0x580   : > { %v1425_v16 = vadd.f32 %v1424_v54, %v1423_v29  ;;  %v2899_v29 = vld [vmem:[%s4818_s4 + $0x8] sm:$0xff] }
 0x581   : > { %1956 = vmatpush.bf16.msrb.mxu1 %v2899_v29 }
 0x582   : > { %v1427_v40 = vadd.f32 %v1426_v38, %v1425_v16 }
 0x584   : > { %v1429_v21 = vadd.f32 %v1428_v11, %v1427_v40 }
 0x586   : > { %v1431_v51 = vadd.f32 %v1430_v1, %v1429_v21 }
 0x588   : > { %v1433_v35 = vadd.f32 %v1432_v17, %v1431_v51 }
 0x58a   : > { %v1434_v9 = vrot.slane %v1433_v35, 4 }
 0x58c   : > { %v1435_v12 = vadd.f32 %v1434_v9, %v1433_v35 }
 0x58e   : > { %v1436_v24 = vrot.slane %v1435_v12, 2 }
 0x590   : > { %v1437_v25 = vadd.f32 %v1436_v24, %v1435_v12 }
 0x592   : > { %v1438_v10 = vrot.slane %v1437_v25, 1 }
 0x594   : > { %v1439_v18 = vadd.f32 %v1438_v10, %v1437_v25 }
 0x596   : > { %v1440_v47 = vmul.f32 %v1439_v18, %v3916_v56 }
 0x598   : > { %v1441_v7 = vadd.f32 1e-05, %v1440_v47 }
 0x59a   : > { %3022 = vrsqrt.f32 %v1441_v7  ;;  %vm1448_vm4 = vweird.f32 %v1441_v7 }
 0x5a0   : > { %v3023_v28 = vpop.eup %3022 }
 0x5a1   : > { %v1443_v3 = vmul.f32 %v3023_v28, %v1441_v7  ;;  %vm1449_vm3 = vweird.f32 %v3023_v28 }
 0x5a2   : > { %vm1450_vm5 = vmor %vm1448_vm4, %vm1449_vm3 }
 0x5a3   : > { %v1444_v63 = vmul.f32 %v3023_v28, %v1443_v3 }
 0x5a5   : > { %v1445_v34 = vmul.f32 0.5, %v1444_v63 }
 0x5a7   : > { %v1446_v2 = vsub.f32 1.5, %v1445_v34 }
 0x5a9   : > { %v1447_v46 = vmul.f32 %v3023_v28, %v1446_v2 }
 0x5ab   : > { %v1451_v48 = vsel %vm1450_vm5, %v3023_v28, %v1447_v46 }
 0x5ac   : > { %v1454_v58 = vmul.f32 %v1451_v48, %v3926_v0  ;;  %v1453_v60 = vmul.f32 %v1451_v48, %v3923_v26  ;;  %v1452_v30 = vmul.f32 %v1451_v48, %v3920_v62  ;;  %v1457_v39 = vmul.f32 %v1451_v48, %v3959_v37 }
 0x5ad   : > { %v1456_v26 = vmul.f32 %v1451_v48, %v3929_v53  ;;  %v1455_v62 = vmul.f32 %v1451_v48, %v3950_v49  ;;  %v1460_v49 = vmul.f32 %v1451_v48, %v3935_v23  ;;  %v1459_v61 = vmul.f32 %v1451_v48, %v3969_v13 }
 0x5ae   : > { %v1471_v45 = vmul.f32 %v4013_v36, %v1454_v58  ;;  %v1470_v43 = vmul.f32 %v4013_v36, %v1453_v60  ;;  %v1469_v44 = vmul.f32 %v4013_v36, %v1452_v30  ;;  %v1474_v37 = vmul.f32 %v4013_v36, %v1457_v39 }
 0x5af   : > { %v1473_v22 = vmul.f32 %v4013_v36, %v1456_v26  ;;  %v1472_v55 = vmul.f32 %v4013_v36, %v1455_v62  ;;  %v1458_v41 = vmul.f32 %v1451_v48, %v3932_v8  ;;  %v1477_v23 = vmul.f32 %v4013_v36, %v1460_v49 }
 0x5b0   : > { %v4025_v14 = vadd.f32 %v4016_v57, %v1471_v45  ;;  %v4028_v27 = vadd.f32 %v4016_v57, %v1470_v43  ;;  %v1486_v0 = vadd.f32 %v4016_v57, %v1469_v44  ;;  %v4042_v31 = vadd.f32 %v4016_v57, %v1474_v37 }
 0x5b1   : > { %v4045_v53 = vadd.f32 %v4016_v57, %v1473_v22  ;;  %v1489_v19 = vadd.f32 %v4016_v57, %v1472_v55  ;;  %v1476_v13 = vmul.f32 %v4013_v36, %v1459_v61  ;;  %v1475_v33 = vmul.f32 %v4013_v36, %v1458_v41 }
 0x5b2   : > { %1522 = vrot.lane.b32.xlu0 %v4025_v14, %s3181_s18  ;;  %1520 = vrot.lane.b32.xlu1 %v4028_v27, %s3181_s18  ;;  %v4063_v8 = vadd.f32 %v4016_v57, %v1477_v23  ;;  %v1463_v16 = vmul.f32 %v1451_v48, %v3941_v15  ;;  %v1462_v5 = vmul.f32 %v1451_v48, %v3939_v20 }
 0x5b3   : > { %1518 = vrot.lane.b32.xlu2 %v1486_v0, %s3181_s18  ;;  %v4066_v54 = vadd.f32 %v4016_v57, %v1476_v13  ;;  %v4071_v38 = vadd.f32 %v4016_v57, %v1475_v33  ;;  %v1461_v40 = vmul.f32 %v1451_v48, %v3937_v42  ;;  %v1466_v21 = vmul.f32 %v1451_v48, %v3947_v4 }
 0x5b4   : > { %v1480_v52 = vmul.f32 %v4013_v36, %v1463_v16  ;;  %v1479_v15 = vmul.f32 %v4013_v36, %v1462_v5  ;;  %v1465_v1 = vmul.f32 %v1451_v48, %v3945_v50  ;;  %v1464_v17 = vmul.f32 %v1451_v48, %v3943_v6 }
 0x5b5   : > { %v1478_v20 = vmul.f32 %v4013_v36, %v1461_v40  ;;  %v1483_v35 = vmul.f32 %v4013_v36, %v1466_v21  ;;  %v1467_v12 = vmul.f32 %v1451_v48, %v3996_v59 }
 0x5b6   : > { %v4084_v11 = vadd.f32 %v4016_v57, %v1480_v52  ;;  %v4087_v42 = vadd.f32 %v4016_v57, %v1479_v15  ;;  %v1482_v4 = vmul.f32 %v4013_v36, %v1465_v1  ;;  %v1481_v50 = vmul.f32 %v4013_v36, %v1464_v17 }
 0x5b7   : > { %v4092_v51 = vadd.f32 %v4016_v57, %v1478_v20  ;;  %v4105_v9 = vadd.f32 %v4016_v57, %v1483_v35  ;;  %v1484_v25 = vmul.f32 %v4013_v36, %v1467_v12 }
 0x5b8   : > { %v4108_v6 = vadd.f32 %v4016_v57, %v1482_v4  ;;  %v4112_v24 = vadd.f32 %v4016_v57, %v1481_v50 }
 0x5b9   : > { %v4122_v10 = vadd.f32 %v4016_v57, %v1484_v25  ;;  %v2898_v57 = vld [vmem:[%s4818_s4] sm:$0xff] }
 0x5ba   : > { %1528 = vrot.lane.b32.xlu0 %v4042_v31, %s3181_s18  ;;  %1526 = vrot.lane.b32.xlu1 %v4045_v53, %s3181_s18 }
 0x5bb   : > { %1524 = vrot.lane.b32.xlu2 %v1489_v19, %s3181_s18  ;;  %1957 = vmatpush.bf16.msrb.mxu1 %v2898_v57 }
 0x5c2   : > { %1534 = vrot.lane.b32.xlu0 %v4063_v8, %s3181_s18  ;;  %1532 = vrot.lane.b32.xlu1 %v4066_v54, %s3181_s18 }
 0x5c3   : > { %1530 = vrot.lane.b32.xlu2 %v4071_v38, %s3181_s18 }
 0x5ca   : > { %1540 = vrot.lane.b32.xlu0 %v4084_v11, %s3181_s18  ;;  %1538 = vrot.lane.b32.xlu1 %v4087_v42, %s3181_s18 }
 0x5cb   : > { %1536 = vrot.lane.b32.xlu2 %v4092_v51, %s3181_s18 }
 0x5d2   : > { %1546 = vrot.lane.b32.xlu0 %v4105_v9, %s3181_s18  ;;  %1544 = vrot.lane.b32.xlu1 %v4108_v6, %s3181_s18 }
 0x5d3   : > { %1542 = vrot.lane.b32.xlu2 %v4112_v24, %s3181_s18 }
 0x5db   : > { %1548 = vrot.lane.b32.xlu2 %v4122_v10, %s3181_s18 }
 0x60d   : > { %v1519_v59 = vpop.permute.xlu2 %1518 }
 0x60e   : > { %v4126_v18 = vadd.f32 %v1519_v59, %v1486_v0 }
 0x610   : > { %v2807_v47 = vmul.f32 -1.442695, %v4126_v18 }
 0x612   : > { %3024 = vpow2.f32 %v2807_v47 }
 0x615   : > { %v1525_v7 = vpop.permute.xlu2 %1524 }
 0x616   : > { %v4129_v3 = vadd.f32 %v1525_v7, %v1489_v19 }
 0x618   : > { %v3025_v28 = vpop.eup %3024  ;;  %v2810_v34 = vmul.f32 -1.442695, %v4129_v3 }
 0x619   : > { %v1630_v63 = vadd.f32 1.0, %v3025_v28 }
 0x61b   : > { %3026 = vrcp.f32 %v1630_v63  ;;  %vm1651_vm7 = vweird.f32 %v1630_v63  ;;  %v1657_v13 = vand.u32 2147483648, %v1630_v63  ;;  %v1655_v40 = vand.u32 2147483647, %v1630_v63 }
 0x61c   : > { %3028 = vpow2.f32 %v2810_v34 }
 0x61d   : > { %v1531_v52 = vpop.permute.xlu2 %1530  ;;  %v1658_v25 = vor.u32 1.1754944e-38, %v1657_v13  ;;  %vm1656_vm10 = vcmp.eq.f32.partialorder %v1655_v40, 8.507059e+37 }
 0x61e   : > { %v4177_v59 = vadd.f32 %v1531_v52, %v4071_v38 }
 0x621   : > { %v3027_v60 = vpop.eup %3026 }
 0x622   : > { %v3029_v43 = vpop.eup %3028  ;;  %v1647_v44 = vmul.f32 %v3027_v60, %v1630_v63  ;;  %vm1652_vm6 = vweird.f32 %v3027_v60 }
 0x623   : > { %v4151_v62 = vadd.f32 1.0, %v3029_v43  ;;  %vm4161_vm8 = vmor %vm1651_vm7, %vm1652_vm6 }
 0x624   : > { %v1523_v2 = vpop.permute.xlu0 %1522  ;;  %v1521_v46 = vpop.permute.xlu1 %1520  ;;  %v1648_v22 = vsub.f32 1.0, %v1647_v44 }
 0x625   : > { %v4133_v32 = vadd.f32 %v1523_v2, %v4025_v14  ;;  %v4136_v36 = vadd.f32 %v1521_v46, %v4028_v27  ;;  %vm1696_vm3 = vweird.f32 %v4151_v62 }
 0x627   : > { %v2809_v48 = vmul.f32 -1.442695, %v4133_v32  ;;  %v2808_v58 = vmul.f32 -1.442695, %v4136_v36 }
 0x629   : > { %3030 = vpow2.f32 %v2809_v48  ;;  %v2813_v48 = vmul.f32 -1.442695, %v4177_v59 }
 0x62a   : > { %3032 = vpow2.f32 %v2808_v58 }
 0x62c   : > { %v1529_v30 = vpop.permute.xlu0 %1528  ;;  %v1527_v45 = vpop.permute.xlu1 %1526 }
 0x62d   : > { %v4144_v39 = vadd.f32 %v1529_v30, %v4042_v31  ;;  %v4147_v27 = vadd.f32 %v1527_v45, %v4045_v53  ;;  %v1649_v31 = vmul.f32 %v3027_v60, %v1648_v22 }
 0x62f   : > { %v3031_v14 = vpop.eup %3030  ;;  %v2812_v55 = vmul.f32 -1.442695, %v4144_v39  ;;  %v2811_v49 = vmul.f32 -1.442695, %v4147_v27  ;;  %v1650_v19 = vadd.f32 %v3027_v60, %v1649_v31 }
 0x630   : > { %v3033_v0 = vpop.eup %3032  ;;  %v4149_v26 = vadd.f32 1.0, %v3031_v14 }
 0x631   : > { %v1631_v37 = vadd.f32 1.0, %v3033_v0  ;;  %v1654_v21 = vsel %vm4161_vm8, %v3027_v60, %v1650_v19  ;;  %v1700_v19 = vand.u32 2147483647, %v4151_v62 }
 0x632   : > { %3034 = vrcp.f32 %v4149_v26  ;;  %v1659_v63 = vsel %vm1656_vm10, %v1658_v25, %v1654_v21  ;;  %v1687_v0 = vand.u32 2147483648, %v4149_v26  ;;  %vm1681_vm2 = vweird.f32 %v4149_v26 }
 0x633   : > { %3036 = vrcp.f32 %v1631_v37  ;;  %v1670_v17 = vand.u32 2147483647, %v1631_v37  ;;  %v1672_v35 = vand.u32 2147483648, %v1631_v37  ;;  %vm1666_vm11 = vweird.f32 %v1631_v37 }
 0x634   : > { %3038 = vrcp.f32 %v4151_v62  ;;  %v1533_v33 = vpop.permute.xlu1 %1532  ;;  %v1886_v58 = vmul.f32 %v1659_v63, %v4126_v18  ;;  %v1685_v22 = vand.u32 2147483647, %v4149_v26  ;;  %v1535_v31 = vpop.permute.xlu0 %1534  ;;  %vm1701_vm7 = vcmp.eq.f32.partialorder %v1700_v19, 8.507059e+37 }
 0x635   : > { %3040 = vpow2.f32 %v2812_v55  ;;  %v4174_v12 = vadd.f32 %v1533_v33, %v4066_v54  ;;  %v1673_v2 = vor.u32 1.1754944e-38, %v1672_v35  ;;  %vm1671_vm13 = vcmp.eq.f32.partialorder %v1670_v17, 8.507059e+37 }
 0x636   : > { %3042 = vpow2.f32 %v2811_v49  ;;  %v1702_v55 = vand.u32 2147483648, %v4151_v62  ;;  %vm1686_vm6 = vcmp.eq.f32.partialorder %v1685_v22, 8.507059e+37  ;;  %v4217_v40 = vadd.f32 %v1535_v31, %v4063_v8 }
 0x637   : > { %v2814_v54 = vmul.f32 -1.442695, %v4174_v12 }
 0x638   : > { %v4157_v53 = vpop.eup %3034 }
 0x639   : > { %v3037_v61 = vpop.eup %3036  ;;  %v1677_v15 = vmul.f32 %v4157_v53, %v4149_v26  ;;  %vm1682_vm14 = vweird.f32 %v4157_v53 }
 0x63a   : > { %v4159_v41 = vpop.eup %3038  ;;  %v1662_v29 = vmul.f32 %v3037_v61, %v1631_v37  ;;  %vm1667_vm9 = vweird.f32 %v3037_v61  ;;  %vm4203_vm4 = vmor %vm1681_vm2, %vm1682_vm14 }
 0x63b   : > { %v3041_v23 = vpop.eup %3040  ;;  %v1692_v1 = vmul.f32 %v4159_v41, %v4151_v62  ;;  %v1678_v7 = vsub.f32 1.0, %v1677_v15  ;;  %vm1668_vm12 = vmor %vm1666_vm11, %vm1667_vm9  ;;  %vm1697_vm15 = vweird.f32 %v4159_v41  ;;  %v1703_v62 = vor.u32 1.1754944e-38, %v1702_v55 }
 0x63c   : > { %v3043_v16 = vpop.eup %3042  ;;  %v1663_v20 = vsub.f32 1.0, %v1662_v29  ;;  %v4171_v50 = vadd.f32 1.0, %v3041_v23  ;;  %v1537_v23 = vpop.permute.xlu2 %1536  ;;  %vm1698_vm5 = vmor %vm1696_vm3, %vm1697_vm15 }
 0x63d   : > { %v4179_v47 = vadd.f32 1.0, %v3043_v16  ;;  %v1693_v34 = vsub.f32 1.0, %v1692_v1  ;;  %v1679_v57 = vmul.f32 %v4157_v53, %v1678_v7  ;;  %v1688_v16 = vor.u32 1.1754944e-38, %v1687_v0 }
 0x63e   : > { %v1664_v4 = vmul.f32 %v3037_v61, %v1663_v20  ;;  %3044 = vrcp.f32 %v4171_v50  ;;  %vm1726_vm10 = vweird.f32 %v4171_v50 }
 0x63f   : > { %3046 = vrcp.f32 %v4179_v47  ;;  %v1694_v30 = vmul.f32 %v4159_v41, %v1693_v34  ;;  %v1680_v44 = vadd.f32 %v4157_v53, %v1679_v57  ;;  %v1541_v57 = vpop.permute.xlu0 %1540 }
 0x640   : > { %v1665_v28 = vadd.f32 %v3037_v61, %v1664_v4  ;;  %3048 = vpow2.f32 %v2814_v54  ;;  %v4268_v49 = vadd.f32 %v1541_v57, %v4084_v11 }
 0x641   : > { %3050 = vpow2.f32 %v2813_v48  ;;  %v1695_v37 = vadd.f32 %v4159_v41, %v1694_v30  ;;  %v1684_v29 = vsel %vm4203_vm4, %v4157_v53, %v1680_v44  ;;  %v4220_v53 = vadd.f32 %v1537_v23, %v4092_v51  ;;  %v1539_v30 = vpop.permute.xlu1 %1538 }
 0x642   : > { %v1669_v46 = vsel %vm1668_vm12, %v3037_v61, %v1665_v28  ;;  %v1689_v52 = vsel %vm1686_vm6, %v1688_v16, %v1684_v29  ;;  %vm1711_vm12 = vweird.f32 %v4179_v47 }
 0x643   : > { %v1674_v38 = vsel %vm1671_vm13, %v1673_v2, %v1669_v46  ;;  %v1699_v5 = vsel %vm1698_vm5, %v4159_v41, %v1695_v37  ;;  %v1888_v35 = vmul.f32 %v1689_v52, %v4133_v32  ;;  %v2815_v41 = vmul.f32 -1.442695, %v4217_v40  ;;  %v2903_v52 = vld [vmem:[%s4819_s5 + $0x18] sm:$0xff] }
 0x644   : > { %v1887_v60 = vmul.f32 %v1674_v38, %v4136_v36  ;;  %v4189_v43 = vpop.eup %3044  ;;  %v1704_v17 = vsel %vm1701_vm7, %v1703_v62, %v1699_v5  ;;  %v2816_v8 = vmul.f32 -1.442695, %v4220_v53  ;;  %v1732_v2 = vand.u32 2147483648, %v4171_v50  ;;  %2403 = vmatpush.bf16.msrb.mxu2 %v2903_v52  ;;  %v1543_v48 = vpop.permute.xlu2 %1542 }
 0x645   : > { %v4194_v14 = vpop.eup %3046  ;;  %v1722_v26 = vmul.f32 %v4189_v43, %v4171_v50  ;;  %v1889_v4 = vmul.f32 %v1704_v17, %v4129_v3  ;;  %vm1727_vm8 = vweird.f32 %v4189_v43  ;;  %v1717_v46 = vand.u32 2147483648, %v4179_v47 }
 0x646   : > { %v1902_v45 = vpack.c.bf16 %v1887_v60, %v1886_v58  ;;  %v3049_v61 = vpop.eup %3048  ;;  %v1707_v13 = vmul.f32 %v4194_v14, %v4179_v47  ;;  %vm1712_vm9 = vweird.f32 %v4194_v14  ;;  %vm4246_vm11 = vmor %vm1726_vm10, %vm1727_vm8  ;;  %v1730_v38 = vand.u32 2147483647, %v4171_v50 }
 0x647   : > { %v3051_v33 = vpop.eup %3050  ;;  %v4222_v15 = vadd.f32 1.0, %v3049_v61  ;;  %v1723_v21 = vsub.f32 1.0, %v1722_v26  ;;  %v1903_v7 = vpack.c.bf16 %v1889_v4, %v1888_v35  ;;  %v1715_v58 = vand.u32 2147483647, %v4179_v47  ;;  %vm4253_vm13 = vmor %vm1711_vm12, %vm1712_vm9 }
 0x648   : > { %2831 = vmatmul.msk.bf16.vlgmr.msrb.gmra.mxu1 %vm358_vm0, %v1902_v45  ;;  %v4224_v20 = vadd.f32 1.0, %v3051_v33  ;;  %v1708_v1 = vsub.f32 1.0, %v1707_v13  ;;  %v1733_v22 = vor.u32 1.1754944e-38, %v1732_v2  ;;  %v1718_v55 = vor.u32 1.1754944e-38, %v1717_v46 }
 0x649   : > { %3052 = vrcp.f32 %v4222_v15  ;;  %v1724_v51 = vmul.f32 %v4189_v43, %v1723_v21  ;;  %vm1731_vm14 = vcmp.eq.f32.partialorder %v1730_v38, 8.507059e+37  ;;  %vm1716_vm15 = vcmp.eq.f32.partialorder %v1715_v58, 8.507059e+37 }
 0x64a   : > { %3054 = vrcp.f32 %v4224_v20  ;;  %v1709_v25 = vmul.f32 %v4194_v14, %v1708_v1  ;;  %v2818_v26 = vmul.f32 -1.442695, %v4268_v49  ;;  %v1762_v17 = vand.u32 2147483648, %v4222_v15 }
 0x64b   : > { %3056 = vpow2.f32 %v2815_v41  ;;  %v1725_v28 = vadd.f32 %v4189_v43, %v1724_v51  ;;  %vm1756_vm4 = vweird.f32 %v4222_v15  ;;  %v1760_v41 = vand.u32 2147483647, %v4222_v15 }
 0x64c   : > { %3058 = vpow2.f32 %v2816_v8  ;;  %v1710_v63 = vadd.f32 %v4194_v14, %v1709_v25  ;;  %vm1741_vm5 = vweird.f32 %v4224_v20  ;;  %v1747_v4 = vand.u32 2147483648, %v4224_v20  ;;  %v1545_v25 = vpop.permute.xlu1 %1544 }
 0x64d   : > { %v1729_v44 = vsel %vm4246_vm11, %v4189_v43, %v1725_v28  ;;  %v4271_v43 = vadd.f32 %v1539_v30, %v4087_v42  ;;  %v1763_v38 = vor.u32 1.1754944e-38, %v1762_v17  ;;  %vm1761_vm8 = vcmp.eq.f32.partialorder %v1760_v41, 8.507059e+37  ;;  %v1549_v17 = vpop.permute.xlu2 %1548 }
 0x64e   : > { %v1714_v0 = vsel %vm4253_vm13, %v4194_v14, %v1710_v63  ;;  %v1734_v31 = vsel %vm1731_vm14, %v1733_v22, %v1729_v44  ;;  %v1745_v63 = vand.u32 2147483647, %v4224_v20  ;;  %v1748_v60 = vor.u32 1.1754944e-38, %v1747_v4 }
 0x64f   : > { %v4239_v34 = vpop.eup %3052  ;;  %v1719_v61 = vsel %vm1716_vm15, %v1718_v55, %v1714_v0  ;;  %v1891_v13 = vmul.f32 %v1734_v31, %v4144_v39  ;;  %v2817_v33 = vmul.f32 -1.442695, %v4271_v43 }
 0x650   : > { %v4244_v54 = vpop.eup %3054  ;;  %v1752_v50 = vmul.f32 %v4239_v34, %v4222_v15  ;;  %v1890_v11 = vmul.f32 %v1719_v61, %v4147_v27  ;;  %vm1757_vm2 = vweird.f32 %v4239_v34  ;;  %vm1746_vm9 = vcmp.eq.f32.partialorder %v1745_v63, 8.507059e+37 }
 0x651   : > { %v3057_v45 = vpop.eup %3056  ;;  %v1737_v47 = vmul.f32 %v4244_v54, %v4224_v20  ;;  %vm1742_vm3 = vweird.f32 %v4244_v54  ;;  %vm4302_vm6 = vmor %vm1756_vm4, %vm1757_vm2  ;;  %v4324_v20 = vadd.f32 %v1545_v25, %v4108_v6 }
 0x652   : > { %v3059_v37 = vpop.eup %3058  ;;  %v4273_v14 = vadd.f32 1.0, %v3057_v45  ;;  %v1753_v29 = vsub.f32 1.0, %v1752_v50  ;;  %v1904_v5 = vpack.c.bf16 %v1891_v13, %v1890_v11  ;;  %vm4306_vm7 = vmor %vm1741_vm5, %vm1742_vm3 }
 0x653   : > { %v4275_v19 = vadd.f32 1.0, %v3059_v37  ;;  %v1738_v23 = vsub.f32 1.0, %v1737_v47  ;;  %v2820_v37 = vmul.f32 -1.442695, %v4324_v20 }
 0x654   : > { %3060 = vrcp.f32 %v4273_v14  ;;  %v1754_v42 = vmul.f32 %v4239_v34, %v1753_v29  ;;  %vm1771_vm12 = vweird.f32 %v4273_v14  ;;  %v1775_v13 = vand.u32 2147483647, %v4273_v14 }
 0x655   : > { %3062 = vrcp.f32 %v4275_v19  ;;  %v1739_v16 = vmul.f32 %v4244_v54, %v1738_v23  ;;  %v1777_v23 = vand.u32 2147483648, %v4273_v14  ;;  %vm1786_vm13 = vweird.f32 %v4275_v19 }
 0x656   : > { %3064 = vpow2.f32 %v2818_v26  ;;  %v1755_v62 = vadd.f32 %v4239_v34, %v1754_v42  ;;  %v1792_v11 = vand.u32 2147483648, %v4275_v19  ;;  %v1547_v42 = vpop.permute.xlu0 %1546  ;;  %vm1776_vm2 = vcmp.eq.f32.partialorder %v1775_v13, 8.507059e+37 }
 0x657   : > { %3066 = vpow2.f32 %v2817_v33  ;;  %v1740_v1 = vadd.f32 %v4244_v54, %v1739_v16  ;;  %v4367_v4 = vadd.f32 %v1547_v42, %v4105_v9 }
 0x658   : > { %2832 = vmatmul.msk.bf16.gmra.mxu1 %vm358_vm0, %v1903_v7  ;;  %v1759_v2 = vsel %vm4302_vm6, %v4239_v34, %v1755_v62  ;;  %v4329_v34 = vadd.f32 %v1543_v48, %v4112_v24 }
 0x659   : > { %v1744_v46 = vsel %vm4306_vm7, %v4244_v54, %v1740_v1  ;;  %v1764_v30 = vsel %vm1761_vm8, %v1763_v38, %v1759_v2  ;;  %v1778_v1 = vor.u32 1.1754944e-38, %v1777_v23 }
 0x65a   : > { %v4291_v21 = vpop.eup %3060  ;;  %v1749_v44 = vsel %vm1746_vm9, %v1748_v60, %v1744_v46  ;;  %v1893_v50 = vmul.f32 %v1764_v30, %v4174_v12  ;;  %v2819_v47 = vmul.f32 -1.442695, %v4329_v34  ;;  %v2902_v30 = vld [vmem:[%s4819_s5 + $0x10] sm:$0xff] }
 0x65b   : > { %v4296_v35 = vpop.eup %3062  ;;  %v1767_v15 = vmul.f32 %v4291_v21, %v4273_v14  ;;  %v1892_v6 = vmul.f32 %v1749_v44, %v4177_v59  ;;  %vm1772_vm10 = vweird.f32 %v4291_v21  ;;  %2404 = vmatpush.bf16.msrb.mxu2 %v2902_v30 }
 0x65c   : > { %v3065_v8 = vpop.eup %3064  ;;  %v1782_v58 = vmul.f32 %v4296_v35, %v4275_v19  ;;  %vm1787_vm11 = vweird.f32 %v4296_v35  ;;  %vm4353_vm14 = vmor %vm1771_vm12, %vm1772_vm10 }
 0x65d   : > { %v3067_v7 = vpop.eup %3066  ;;  %v4321_v57 = vadd.f32 1.0, %v3065_v8  ;;  %v1768_v54 = vsub.f32 1.0, %v1767_v15  ;;  %v1905_v55 = vpack.c.bf16 %v1893_v50, %v1892_v6  ;;  %vm1788_vm15 = vmor %vm1786_vm13, %vm1787_vm11 }
 0x65e   : > { %v4326_v45 = vadd.f32 1.0, %v3067_v7  ;;  %v1783_v0 = vsub.f32 1.0, %v1782_v58 }
 0x65f   : > { %3068 = vrcp.f32 %v4321_v57  ;;  %v1769_v22 = vmul.f32 %v4291_v21, %v1768_v54  ;;  %vm1816_vm6 = vweird.f32 %v4321_v57  ;;  %v1822_v44 = vand.u32 2147483648, %v4321_v57 }
 0x660   : > { %3070 = vrcp.f32 %v4326_v45  ;;  %v1784_v24 = vmul.f32 %v4296_v35, %v1783_v0  ;;  %v1807_v0 = vand.u32 2147483648, %v4326_v45  ;;  %vm1801_vm8 = vweird.f32 %v4326_v45 }
 0x661   : > { %3072 = vpow2.f32 %v2820_v37  ;;  %v1770_v61 = vadd.f32 %v4291_v21, %v1769_v22  ;;  %v1820_v37 = vand.u32 2147483647, %v4321_v57  ;;  %v1805_v6 = vand.u32 2147483647, %v4326_v45 }
 0x662   : > { %3074 = vpow2.f32 %v2819_v47  ;;  %v1785_v26 = vadd.f32 %v4296_v35, %v1784_v24  ;;  %v1823_v23 = vor.u32 1.1754944e-38, %v1822_v44 }
 0x663   : > { %v1774_v62 = vsel %vm4353_vm14, %v4291_v21, %v1770_v61  ;;  %v4372_v21 = vadd.f32 %v1549_v17, %v4122_v10  ;;  %vm1821_vm10 = vcmp.eq.f32.partialorder %v1820_v37, 8.507059e+37  ;;  %vm1806_vm11 = vcmp.eq.f32.partialorder %v1805_v6, 8.507059e+37 }
 0x664   : > { %v1789_v8 = vsel %vm1788_vm15, %v4296_v35, %v1785_v26  ;;  %v1779_v51 = vsel %vm1776_vm2, %v1778_v1, %v1774_v62  ;;  %v2821_v35 = vmul.f32 -1.442695, %v4367_v4  ;;  %v1808_v26 = vor.u32 1.1754944e-38, %v1807_v0 }
 0x665   : > { %v4339_v31 = vpop.eup %3068  ;;  %v1894_v2 = vmul.f32 %v1779_v51, %v4217_v40  ;;  %v2822_v46 = vmul.f32 -1.442695, %v4372_v21 }
 0x666   : > { %v4344_v29 = vpop.eup %3070  ;;  %v1812_v52 = vmul.f32 %v4339_v31, %v4321_v57  ;;  %vm1817_vm4 = vweird.f32 %v4339_v31 }
 0x667   : > { %v3073_v16 = vpop.eup %3072  ;;  %v1797_v14 = vmul.f32 %v4344_v29, %v4326_v45  ;;  %vm1802_vm5 = vweird.f32 %v4344_v29  ;;  %vm4395_vm7 = vmor %vm1816_vm6, %vm1817_vm4 }
 0x668   : > { %2833 = vmatmul.msk.bf16.gmra.mxu1 %vm358_vm0, %v1904_v5  ;;  %v1790_v5 = vand.u32 2147483647, %v4275_v19  ;;  %v3075_v41 = vpop.eup %3074  ;;  %v1793_v19 = vor.u32 1.1754944e-38, %v1792_v11  ;;  %v4369_v25 = vadd.f32 1.0, %v3073_v16  ;;  %v1813_v7 = vsub.f32 1.0, %v1812_v52  ;;  %vm1803_vm9 = vmor %vm1801_vm8, %vm1802_vm5 }
 0x669   : > { %v1798_v28 = vsub.f32 1.0, %v1797_v14  ;;  %v4374_v15 = vadd.f32 1.0, %v3075_v41 }
 0x66a   : > { %vm1791_vm3 = vcmp.eq.f32.partialorder %v1790_v5, 8.507059e+37  ;;  %3076 = vrcp.f32 %v4369_v25  ;;  %v1814_v48 = vmul.f32 %v4339_v31, %v1813_v7  ;;  %v1852_v41 = vand.u32 2147483648, %v4369_v25 }
 0x66b   : > { %v1794_v63 = vsel %vm1791_vm3, %v1793_v19, %v1789_v8  ;;  %v1799_v10 = vmul.f32 %v4344_v29, %v1798_v28  ;;  %3078 = vrcp.f32 %v4374_v15  ;;  %vm1846_vm14 = vweird.f32 %v4369_v25 }
 0x66c   : > { %v1895_v9 = vmul.f32 %v1794_v63, %v4220_v53  ;;  %3080 = vpow2.f32 %v2821_v35  ;;  %v1815_v58 = vadd.f32 %v4339_v31, %v1814_v48  ;;  %v1850_v19 = vand.u32 2147483647, %v4369_v25 }
 0x66d   : > { %3082 = vpow2.f32 %v2822_v46  ;;  %v1800_v60 = vadd.f32 %v4344_v29, %v1799_v10  ;;  %v1837_v7 = vand.u32 2147483648, %v4374_v15  ;;  %vm1831_vm2 = vweird.f32 %v4374_v15 }
 0x66e   : > { %v1906_v38 = vpack.c.bf16 %v1895_v9, %v1894_v2  ;;  %v1819_v24 = vsel %vm4395_vm7, %v4339_v31, %v1815_v58  ;;  %v1835_v28 = vand.u32 2147483647, %v4374_v15  ;;  %v1853_v35 = vor.u32 1.1754944e-38, %v1852_v41 }
 0x66f   : > { %v1824_v45 = vsel %vm1821_vm10, %v1823_v23, %v1819_v24  ;;  %vm1851_vm4 = vcmp.eq.f32.partialorder %v1850_v19, 8.507059e+37  ;;  %v1838_v48 = vor.u32 1.1754944e-38, %v1837_v7 }
 0x670   : > { %v3077_v54 = vpop.eup %3076  ;;  %v1897_v62 = vmul.f32 %v1824_v45, %v4268_v49  ;;  %vm1836_vm5 = vcmp.eq.f32.partialorder %v1835_v28, 8.507059e+37 }
 0x671   : > { %v3079_v47 = vpop.eup %3078  ;;  %v1842_v61 = vmul.f32 %v3077_v54, %v4369_v25  ;;  %vm1847_vm12 = vweird.f32 %v3077_v54 }
 0x672   : > { %v3081_v22 = vpop.eup %3080  ;;  %v1827_v57 = vmul.f32 %v3079_v47, %v4374_v15  ;;  %vm1832_vm13 = vweird.f32 %v3079_v47  ;;  %vm1848_vm15 = vmor %vm1846_vm14, %vm1847_vm12 }
 0x673   : > { %v3083_v13 = vpop.eup %3082  ;;  %v1644_v33 = vadd.f32 1.0, %v3081_v22  ;;  %v1843_v42 = vsub.f32 1.0, %v1842_v61  ;;  %vm1833_vm3 = vmor %vm1831_vm2, %vm1832_vm13 }
 0x674   : > { %v1645_v16 = vadd.f32 1.0, %v3083_v13  ;;  %v1828_v5 = vsub.f32 1.0, %v1827_v57 }
 0x675   : > { %3084 = vrcp.f32 %v1644_v33  ;;  %vm1861_vm8 = vweird.f32 %v1644_v33  ;;  %v1865_v6 = vand.u32 2147483647, %v1644_v33 }
 0x676   : > { %3086 = vrcp.f32 %v1645_v16  ;;  %v1829_v52 = vmul.f32 %v3079_v47, %v1828_v5  ;;  %vm1876_vm10 = vweird.f32 %v1645_v16  ;;  %v1880_v22 = vand.u32 2147483647, %v1645_v16 }
 0x677   : > { %vm1866_vm12 = vcmp.eq.f32.partialorder %v1865_v6, 8.507059e+37 }
 0x678   : > { %2834 = vmatmul.msk.bf16.gmra.mxu1 %vm358_vm0, %v1905_v55  ;;  %v1804_v55 = vsel %vm1803_vm9, %v4344_v29, %v1800_v60  ;;  %v1844_v29 = vmul.f32 %v3077_v54, %v1843_v42  ;;  %v1830_v8 = vadd.f32 %v3079_v47, %v1829_v52  ;;  %vm1881_vm13 = vcmp.eq.f32.partialorder %v1880_v22, 8.507059e+37 }
 0x679   : > { %v1809_v11 = vsel %vm1806_vm11, %v1808_v26, %v1804_v55 }
 0x67a   : > { %v1896_v31 = vmul.f32 %v1809_v11, %v4271_v43  ;;  %v1845_v1 = vadd.f32 %v3077_v54, %v1844_v29  ;;  %v1834_v9 = vsel %vm1833_vm3, %v3079_v47, %v1830_v8  ;;  %v1882_v47 = vand.u32 2147483648, %v1645_v16 }
 0x67b   : > { %v3085_v17 = vpop.eup %3084  ;;  %v1839_v25 = vsel %vm1836_vm5, %v1838_v48, %v1834_v9  ;;  %v2900_v9 = vld [vmem:[%s4819_s5] sm:$0xff] }
 0x67c   : > { %v1907_v14 = vpack.c.bf16 %v1897_v62, %v1896_v31  ;;  %v3087_v51 = vpop.eup %3086  ;;  %v1857_v63 = vmul.f32 %v3085_v17, %v1644_v33  ;;  %v1849_v2 = vsel %vm1848_vm15, %v3077_v54, %v1845_v1  ;;  %v1898_v30 = vmul.f32 %v1839_v25, %v4329_v34 }
 0x67d   : > { %v1872_v46 = vmul.f32 %v3087_v51, %v1645_v16  ;;  %v1854_v10 = vsel %vm1851_vm4, %v1853_v35, %v1849_v2  ;;  %vm1862_vm6 = vweird.f32 %v3085_v17  ;;  %v1867_v54 = vand.u32 2147483648, %v1644_v33 }
 0x67e   : > { %v1899_v60 = vmul.f32 %v1854_v10, %v4324_v20  ;;  %vm1877_vm7 = vweird.f32 %v3087_v51  ;;  %vm1863_vm9 = vmor %vm1861_vm8, %vm1862_vm6  ;;  %v1883_v23 = vor.u32 1.1754944e-38, %v1882_v47 }
 0x67f   : > { %v1873_v58 = vsub.f32 1.0, %v1872_v46  ;;  %vm1878_vm11 = vmor %vm1876_vm10, %vm1877_vm7  ;;  %v1868_v55 = vor.u32 1.1754944e-38, %v1867_v54 }
 0x680   : > { %v1908_v15 = vpack.c.bf16 %v1899_v60, %v1898_v30 }
 0x681   : > { %v1874_v0 = vmul.f32 %v3087_v51, %v1873_v58 }
 0x683   : > { %v1875_v37 = vadd.f32 %v3087_v51, %v1874_v0 }
 0x685   : > { %v1879_v61 = vsel %vm1878_vm11, %v3087_v51, %v1875_v37 }
 0x686   : > { %v1884_v13 = vsel %vm1881_vm13, %v1883_v23, %v1879_v61 }
 0x687   : > { %v1901_v45 = vmul.f32 %v1884_v13, %v4372_v21 }
 0x688   : > { %2835 = vmatmul.msk.bf16.gmra.mxu1 %vm358_vm0, %v1906_v38  ;;  %v1858_v38 = vsub.f32 1.0, %v1857_v63 }
 0x68a   : > { %v1859_v44 = vmul.f32 %v3085_v17, %v1858_v38 }
 0x68c   : > { %v1860_v50 = vadd.f32 %v3085_v17, %v1859_v44 }
 0x68e   : > { %v1864_v24 = vsel %vm1863_vm9, %v3085_v17, %v1860_v50 }
 0x68f   : > { %v1869_v26 = vsel %vm1866_vm12, %v1868_v55, %v1864_v24 }
 0x690   : > { %v1900_v57 = vmul.f32 %v1869_v26, %v4367_v4 }
 0x692   : > { %v1909_v11 = vpack.c.bf16 %v1901_v45, %v1900_v57 }
 0x698   : > { %2836 = vmatmul.msk.bf16.gmra.mxu1 %vm358_vm0, %v1907_v14  ;;  %v2901_v14 = vld [vmem:[%s4819_s5 + $0x8] sm:$0xff] }
 0x699   : > { %2405 = vmatpush.bf16.msrb.mxu2 %v2901_v14 }
 0x69d   : > { %2406 = vmatpush.bf16.msrb.mxu2 %v2900_v9 }
 0x6a8   : > { %2837 = vmatmul.msk.bf16.gmra.mxu1 %vm358_vm0, %v1908_v15 }
 0x6b8   : > { %2838 = vmatmul.msk.bf16.gmra.mxu1 %vm358_vm0, %v1909_v11 }
 0x6c5   : > { %v4423_v33 = vpop.f32.mrf.mxu1 }
 0x6c6   : > { %v1999_v42 = vmax.f32 %v4423_v33, 0.0 }
 0x6c8   : > { %v2839_v16 = vmul.f32 -1.442695, %v1999_v42 }
 0x6ca   : > { %3088 = vpow2.f32 %v2839_v16 }
 0x6cd   : > { %v4428_v5 = vpop.f32.mrf.mxu1 }
 0x6ce   : > { %v2000_v62 = vmax.f32 %v4428_v5, 0.0 }
 0x6d0   : > { %v3089_v31 = vpop.eup %3088  ;;  %v2840_v29 = vmul.f32 -1.442695, %v2000_v62 }
 0x6d1   : > { %v2063_v52 = vadd.f32 1.0, %v3089_v31 }
 0x6d2   : > { %3090 = vpow2.f32 %v2840_v29 }
 0x6d3   : > { %3092 = vrcp.f32 %v2063_v52  ;;  %v2090_v60 = vand.u32 2147483648, %v2063_v52  ;;  %vm2084_vm15 = vweird.f32 %v2063_v52  ;;  %v2088_v30 = vand.u32 2147483647, %v2063_v52 }
 0x6d5   : > { %v4434_v1 = vpop.f32.mrf.mxu1  ;;  %v2091_v22 = vor.u32 1.1754944e-38, %v2090_v60  ;;  %vm2089_vm4 = vcmp.eq.f32.partialorder %v2088_v30, 8.507059e+37 }
 0x6d6   : > { %v2001_v17 = vmax.f32 %v4434_v1, 0.0 }
 0x6d8   : > { %v3091_v41 = vpop.eup %3090  ;;  %v2841_v8 = vmul.f32 -1.442695, %v2001_v17 }
 0x6d9   : > { %v3093_v19 = vpop.eup %3092  ;;  %v2064_v51 = vadd.f32 1.0, %v3091_v41 }
 0x6da   : > { %v2080_v7 = vmul.f32 %v3093_v19, %v2063_v52  ;;  %3094 = vpow2.f32 %v2841_v8  ;;  %vm2085_vm14 = vweird.f32 %v3093_v19 }
 0x6db   : > { %3096 = vrcp.f32 %v2064_v51  ;;  %vm4450_vm2 = vmor %vm2084_vm15, %vm2085_vm14  ;;  %v2103_v15 = vand.u32 2147483647, %v2064_v51  ;;  %v2105_v50 = vand.u32 2147483648, %v2064_v51  ;;  %vm2099_vm5 = vweird.f32 %v2064_v51 }
 0x6dc   : > { %v2081_v28 = vsub.f32 1.0, %v2080_v7 }
 0x6dd   : > { %v4439_v63 = vpop.f32.mrf.mxu1  ;;  %v2106_v13 = vor.u32 1.1754944e-38, %v2105_v50  ;;  %vm2104_vm7 = vcmp.eq.f32.partialorder %v2103_v15, 8.507059e+37 }
 0x6de   : > { %v2082_v2 = vmul.f32 %v3093_v19, %v2081_v28  ;;  %v2002_v35 = vmax.f32 %v4439_v63, 0.0 }
 0x6e0   : > { %v3095_v46 = vpop.eup %3094  ;;  %v2842_v48 = vmul.f32 -1.442695, %v2002_v35  ;;  %v2083_v25 = vadd.f32 %v3093_v19, %v2082_v2 }
 0x6e1   : > { %v3097_v10 = vpop.eup %3096  ;;  %v4447_v38 = vadd.f32 1.0, %v3095_v46 }
 0x6e2   : > { %v2095_v58 = vmul.f32 %v3097_v10, %v2064_v51  ;;  %3098 = vpow2.f32 %v2842_v48  ;;  %v2087_v37 = vsel %vm4450_vm2, %v3093_v19, %v2083_v25  ;;  %vm2100_vm3 = vweird.f32 %v3097_v10 }
 0x6e3   : > { %3100 = vrcp.f32 %v4447_v38  ;;  %v2092_v26 = vsel %vm2089_vm4, %v2091_v22, %v2087_v37  ;;  %vm2101_vm6 = vmor %vm2099_vm5, %vm2100_vm3  ;;  %vm2114_vm9 = vweird.f32 %v4447_v38 }
 0x6e4   : > { %v2096_v44 = vsub.f32 1.0, %v2095_v58  ;;  %v2319_v5 = vmul.f32 %v2092_v26, %v1999_v42  ;;  %v2120_v42 = vand.u32 2147483648, %v4447_v38 }
 0x6e5   : > { %v4454_v54 = vpop.f32.mrf.mxu1 }
 0x6e6   : > { %v2097_v6 = vmul.f32 %v3097_v10, %v2096_v44  ;;  %v2003_v47 = vmax.f32 %v4454_v54, 0.0  ;;  %v2121_v44 = vor.u32 1.1754944e-38, %v2120_v42 }
 0x6e8   : > { %v3099_v24 = vpop.eup %3098  ;;  %v2098_v55 = vadd.f32 %v3097_v10, %v2097_v6  ;;  %v2843_v61 = vmul.f32 -1.442695, %v2003_v47 }
 0x6e9   : > { %v3101_v23 = vpop.eup %3100  ;;  %v2066_v57 = vadd.f32 1.0, %v3099_v24 }
 0x6ea   : > { %v2102_v45 = vsel %vm2101_vm6, %v3097_v10, %v2098_v55  ;;  %v2110_v11 = vmul.f32 %v3101_v23, %v4447_v38  ;;  %3102 = vpow2.f32 %v2843_v61  ;;  %vm2115_vm8 = vweird.f32 %v3101_v23 }
 0x6eb   : > { %v2107_v16 = vsel %vm2104_vm7, %v2106_v13, %v2102_v45  ;;  %3104 = vrcp.f32 %v2066_v57  ;;  %vm4476_vm10 = vmor %vm2114_vm9, %vm2115_vm8  ;;  %v2133_v48 = vand.u32 2147483647, %v2066_v57  ;;  %v2135_v10 = vand.u32 2147483648, %v2066_v57 }
 0x6ec   : > { %v2320_v31 = vmul.f32 %v2107_v16, %v2000_v62  ;;  %v2111_v29 = vsub.f32 1.0, %v2110_v11  ;;  %v2118_v62 = vand.u32 2147483647, %v4447_v38  ;;  %vm2129_vm13 = vweird.f32 %v2066_v57 }
 0x6ed   : > { %v4464_v52 = vpop.f32.mrf.mxu1  ;;  %v2136_v6 = vor.u32 1.1754944e-38, %v2135_v10  ;;  %vm2134_vm15 = vcmp.eq.f32.partialorder %v2133_v48, 8.507059e+37 }
 0x6ee   : > { %v2335_v14 = vpack.c.bf16 %v2320_v31, %v2319_v5  ;;  %v2112_v41 = vmul.f32 %v3101_v23, %v2111_v29  ;;  %v2004_v8 = vmax.f32 %v4464_v52, 0.0  ;;  %vm2119_vm12 = vcmp.eq.f32.partialorder %v2118_v62, 8.507059e+37 }
 0x6f0   : > { %v3103_v19 = vpop.eup %3102  ;;  %v2844_v51 = vmul.f32 -1.442695, %v2004_v8  ;;  %2871 = vmatmul.msk.bf16.vlgmr.msrb.gmra.mxu2 %vm738_vm1, %v2335_v14  ;;  %v2113_v2 = vadd.f32 %v3101_v23, %v2112_v41 }
 0x6f1   : > { %v3105_v7 = vpop.eup %3104  ;;  %v4470_v28 = vadd.f32 1.0, %v3103_v19 }
 0x6f2   : > { %v2125_v33 = vmul.f32 %v3105_v7, %v2066_v57  ;;  %3106 = vpow2.f32 %v2844_v51  ;;  %v2117_v58 = vsel %vm4476_vm10, %v3101_v23, %v2113_v2  ;;  %vm2130_vm11 = vweird.f32 %v3105_v7 }
 0x6f3   : > { %3108 = vrcp.f32 %v4470_v28  ;;  %v2122_v37 = vsel %vm2119_vm12, %v2121_v44, %v2117_v58  ;;  %vm2131_vm14 = vmor %vm2129_vm13, %vm2130_vm11  ;;  %v2150_v63 = vand.u32 2147483648, %v4470_v28  ;;  %vm2144_vm3 = vweird.f32 %v4470_v28 }
 0x6f4   : > { %v2126_v9 = vsub.f32 1.0, %v2125_v33  ;;  %v2321_v23 = vmul.f32 %v2122_v37, %v2001_v17 }
 0x6f5   : > { %v4480_v25 = vpop.f32.mrf.mxu1 }
 0x6f6   : > { %v2127_v60 = vmul.f32 %v3105_v7, %v2126_v9  ;;  %v2005_v30 = vmax.f32 %v4480_v25, 0.0  ;;  %v2151_v9 = vor.u32 1.1754944e-38, %v2150_v63 }
 0x6f8   : > { %v3107_v0 = vpop.eup %3106  ;;  %v2128_v38 = vadd.f32 %v3105_v7, %v2127_v60  ;;  %v2845_v15 = vmul.f32 -1.442695, %v2005_v30 }
 0x6f9   : > { %v3109_v50 = vpop.eup %3108  ;;  %v2068_v22 = vadd.f32 1.0, %v3107_v0 }
 0x6fa   : > { %v2132_v24 = vsel %vm2131_vm14, %v3105_v7, %v2128_v38  ;;  %v2140_v55 = vmul.f32 %v3109_v50, %v4470_v28  ;;  %3110 = vpow2.f32 %v2845_v15  ;;  %vm2145_vm2 = vweird.f32 %v3109_v50 }
 0x6fb   : > { %v2137_v61 = vsel %vm2134_vm15, %v2136_v6, %v2132_v24  ;;  %3112 = vrcp.f32 %v2068_v22  ;;  %vm4504_vm4 = vmor %vm2144_vm3, %vm2145_vm2  ;;  %v2163_v51 = vand.u32 2147483647, %v2068_v22  ;;  %v2165_v7 = vand.u32 2147483648, %v2068_v22 }
 0x6fc   : > { %v2322_v26 = vmul.f32 %v2137_v61, %v2002_v35  ;;  %v2141_v13 = vsub.f32 1.0, %v2140_v55  ;;  %v2148_v35 = vand.u32 2147483647, %v4470_v28  ;;  %vm2159_vm7 = vweird.f32 %v2068_v22 }
 0x6fd   : > { %v4492_v57 = vpop.f32.mrf.mxu1  ;;  %v2166_v60 = vor.u32 1.1754944e-38, %v2165_v7  ;;  %vm2164_vm9 = vcmp.eq.f32.partialorder %v2163_v51, 8.507059e+37 }
 0x6fe   : > { %v2142_v45 = vmul.f32 %v3109_v50, %v2141_v13  ;;  %v2006_v11 = vmax.f32 %v4492_v57, 0.0  ;;  %v2336_v16 = vpack.c.bf16 %v2322_v26, %v2321_v23  ;;  %vm2149_vm6 = vcmp.eq.f32.partialorder %v2148_v35, 8.507059e+37 }
 0x700   : > { %v3111_v5 = vpop.eup %3110  ;;  %v2846_v31 = vmul.f32 -1.442695, %v2006_v11  ;;  %2872 = vmatmul.msk.bf16.gmra.mxu2 %vm738_vm1, %v2336_v16  ;;  %v2143_v1 = vadd.f32 %v3109_v50, %v2142_v45 }
 0x701   : > { %v3113_v29 = vpop.eup %3112  ;;  %v4498_v14 = vadd.f32 1.0, %v3111_v5 }
 0x702   : > { %v2155_v17 = vmul.f32 %v3113_v29, %v2068_v22  ;;  %3114 = vpow2.f32 %v2846_v31  ;;  %v2147_v33 = vsel %vm4504_vm4, %v3109_v50, %v2143_v1  ;;  %vm2160_vm5 = vweird.f32 %v3113_v29 }
 0x703   : > { %3116 = vrcp.f32 %v4498_v14  ;;  %v2152_v58 = vsel %vm2149_vm6, %v2151_v9, %v2147_v33  ;;  %vm2161_vm8 = vmor %vm2159_vm7, %vm2160_vm5  ;;  %v2180_v52 = vand.u32 2147483648, %v4498_v14  ;;  %vm2174_vm11 = vweird.f32 %v4498_v14 }
 0x704   : > { %v2156_v41 = vsub.f32 1.0, %v2155_v17  ;;  %v2323_v50 = vmul.f32 %v2152_v58, %v2003_v47 }
 0x705   : > { %v4508_v2 = vpop.f32.mrf.mxu1 }
 0x706   : > { %v2157_v42 = vmul.f32 %v3113_v29, %v2156_v41  ;;  %v2007_v62 = vmax.f32 %v4508_v2, 0.0  ;;  %v2181_v41 = vor.u32 1.1754944e-38, %v2180_v52 }
 0x708   : > { %v3115_v46 = vpop.eup %3114  ;;  %v2158_v28 = vadd.f32 %v3113_v29, %v2157_v42  ;;  %v2847_v48 = vmul.f32 -1.442695, %v2007_v62 }
 0x709   : > { %v3117_v10 = vpop.eup %3116  ;;  %v2070_v44 = vadd.f32 1.0, %v3115_v46 }
 0x70a   : > { %v2162_v0 = vsel %vm2161_vm8, %v3113_v29, %v2158_v28  ;;  %v2170_v38 = vmul.f32 %v3117_v10, %v4498_v14  ;;  %3118 = vpow2.f32 %v2847_v48  ;;  %vm2175_vm10 = vweird.f32 %v3117_v10 }
 0x70b   : > { %v2167_v15 = vsel %vm2164_vm9, %v2166_v60, %v2162_v0  ;;  %3120 = vrcp.f32 %v2070_v44  ;;  %vm4532_vm12 = vmor %vm2174_vm11, %vm2175_vm10  ;;  %v2193_v31 = vand.u32 2147483647, %v2070_v44  ;;  %v2195_v29 = vand.u32 2147483648, %v2070_v44 }
 0x70c   : > { %v2324_v37 = vmul.f32 %v2167_v15, %v2004_v8  ;;  %v2171_v6 = vsub.f32 1.0, %v2170_v38  ;;  %v2178_v8 = vand.u32 2147483647, %v4498_v14  ;;  %vm2189_vm15 = vweird.f32 %v2070_v44 }
 0x70d   : > { %v4520_v22 = vpop.f32.mrf.mxu1  ;;  %v2196_v42 = vor.u32 1.1754944e-38, %v2195_v29  ;;  %vm2194_vm3 = vcmp.eq.f32.partialorder %v2193_v31, 8.507059e+37 }
 0x70e   : > { %v2172_v24 = vmul.f32 %v3117_v10, %v2171_v6  ;;  %v2008_v55 = vmax.f32 %v4520_v22, 0.0  ;;  %v2337_v61 = vpack.c.bf16 %v2324_v37, %v2323_v50  ;;  %vm2179_vm14 = vcmp.eq.f32.partialorder %v2178_v8, 8.507059e+37 }
 0x710   : > { %v3119_v23 = vpop.eup %3118  ;;  %v2848_v26 = vmul.f32 -1.442695, %v2008_v55  ;;  %2873 = vmatmul.msk.bf16.gmra.mxu2 %vm738_vm1, %v2337_v61  ;;  %v2173_v54 = vadd.f32 %v3117_v10, %v2172_v24 }
 0x711   : > { %v3121_v13 = vpop.eup %3120  ;;  %v4526_v45 = vadd.f32 1.0, %v3119_v23 }
 0x712   : > { %v2185_v47 = vmul.f32 %v3121_v13, %v2070_v44  ;;  %3122 = vpow2.f32 %v2848_v26  ;;  %v2177_v17 = vsel %vm4532_vm12, %v3117_v10, %v2173_v54  ;;  %vm2190_vm13 = vweird.f32 %v3121_v13 }
 0x713   : > { %3124 = vrcp.f32 %v4526_v45  ;;  %v2182_v33 = vsel %vm2179_vm14, %v2181_v41, %v2177_v17  ;;  %vm2191_vm2 = vmor %vm2189_vm15, %vm2190_vm13  ;;  %v2210_v57 = vand.u32 2147483648, %v4526_v45  ;;  %vm2204_vm5 = vweird.f32 %v4526_v45 }
 0x714   : > { %v2186_v16 = vsub.f32 1.0, %v2185_v47  ;;  %v2325_v10 = vmul.f32 %v2182_v33, %v2005_v30 }
 0x715   : > { %v4536_v1 = vpop.f32.mrf.mxu1 }
 0x716   : > { %v2187_v63 = vmul.f32 %v3121_v13, %v2186_v16  ;;  %v2009_v35 = vmax.f32 %v4536_v1, 0.0  ;;  %v2211_v16 = vor.u32 1.1754944e-38, %v2210_v57 }
 0x718   : > { %v3123_v19 = vpop.eup %3122  ;;  %v2188_v14 = vadd.f32 %v3121_v13, %v2187_v63  ;;  %v2849_v51 = vmul.f32 -1.442695, %v2009_v35 }
 0x719   : > { %v3125_v7 = vpop.eup %3124  ;;  %v2072_v9 = vadd.f32 1.0, %v3123_v19 }
 0x71a   : > { %v2192_v46 = vsel %vm2191_vm2, %v3121_v13, %v2188_v14  ;;  %v2200_v28 = vmul.f32 %v3125_v7, %v4526_v45  ;;  %3126 = vpow2.f32 %v2849_v51  ;;  %vm2205_vm4 = vweird.f32 %v3125_v7 }
 0x71b   : > { %v2197_v48 = vsel %vm2194_vm3, %v2196_v42, %v2192_v46  ;;  %3128 = vrcp.f32 %v2072_v9  ;;  %vm4560_vm6 = vmor %vm2204_vm5, %vm2205_vm4  ;;  %v2223_v26 = vand.u32 2147483647, %v2072_v9  ;;  %v2225_v13 = vand.u32 2147483648, %v2072_v9 }
 0x71c   : > { %v2326_v58 = vmul.f32 %v2197_v48, %v2006_v11  ;;  %v2201_v60 = vsub.f32 1.0, %v2200_v28  ;;  %v2208_v11 = vand.u32 2147483647, %v4526_v45  ;;  %vm2219_vm9 = vweird.f32 %v2072_v9 }
 0x71d   : > { %v4548_v44 = vpop.f32.mrf.mxu1  ;;  %v2226_v63 = vor.u32 1.1754944e-38, %v2225_v13  ;;  %vm2224_vm11 = vcmp.eq.f32.partialorder %v2223_v26, 8.507059e+37 }
 0x71e   : > { %v2202_v0 = vmul.f32 %v3125_v7, %v2201_v60  ;;  %v2010_v38 = vmax.f32 %v4548_v44, 0.0  ;;  %v2338_v15 = vpack.c.bf16 %v2326_v58, %v2325_v10  ;;  %vm2209_vm8 = vcmp.eq.f32.partialorder %v2208_v11, 8.507059e+37 }
 0x720   : > { %v3127_v50 = vpop.eup %3126  ;;  %v2850_v37 = vmul.f32 -1.442695, %v2010_v38  ;;  %2874 = vmatmul.msk.bf16.gmra.mxu2 %vm738_vm1, %v2338_v15  ;;  %v2203_v25 = vadd.f32 %v3125_v7, %v2202_v0 }
 0x721   : > { %v3129_v6 = vpop.eup %3128  ;;  %v4554_v24 = vadd.f32 1.0, %v3127_v50 }
 0x722   : > { %v2215_v30 = vmul.f32 %v3129_v6, %v2072_v9  ;;  %3130 = vpow2.f32 %v2850_v37  ;;  %v2207_v47 = vsel %vm4560_vm6, %v3125_v7, %v2203_v25  ;;  %vm2220_vm7 = vweird.f32 %v3129_v6 }
 0x723   : > { %3132 = vrcp.f32 %v4554_v24  ;;  %v2212_v17 = vsel %vm2209_vm8, %v2211_v16, %v2207_v47  ;;  %vm2221_vm10 = vmor %vm2219_vm9, %vm2220_vm7  ;;  %v2240_v22 = vand.u32 2147483648, %v4554_v24  ;;  %vm2234_vm13 = vweird.f32 %v4554_v24 }
 0x724   : > { %v2216_v61 = vsub.f32 1.0, %v2215_v30  ;;  %v2327_v7 = vmul.f32 %v2212_v17, %v2007_v62 }
 0x725   : > { %v4564_v54 = vpop.f32.mrf.mxu1 }
 0x726   : > { %v2217_v52 = vmul.f32 %v3129_v6, %v2216_v61  ;;  %v2011_v8 = vmax.f32 %v4564_v54, 0.0  ;;  %v2241_v61 = vor.u32 1.1754944e-38, %v2240_v22 }
 0x728   : > { %v3131_v5 = vpop.eup %3130  ;;  %v2218_v45 = vadd.f32 %v3129_v6, %v2217_v52  ;;  %v2851_v31 = vmul.f32 -1.442695, %v2011_v8 }
 0x729   : > { %v3133_v29 = vpop.eup %3132  ;;  %v2074_v41 = vadd.f32 1.0, %v3131_v5 }
 0x72a   : > { %v2222_v19 = vsel %vm2221_vm10, %v3129_v6, %v2218_v45  ;;  %v2230_v14 = vmul.f32 %v3133_v29, %v4554_v24  ;;  %3134 = vpow2.f32 %v2851_v31  ;;  %vm2235_vm12 = vweird.f32 %v3133_v29 }
 0x72b   : > { %v2227_v51 = vsel %vm2224_vm11, %v2226_v63, %v2222_v19  ;;  %3136 = vrcp.f32 %v2074_v41  ;;  %vm4588_vm14 = vmor %vm2234_vm13, %vm2235_vm12  ;;  %v2253_v37 = vand.u32 2147483647, %v2074_v41  ;;  %v2255_v6 = vand.u32 2147483648, %v2074_v41 }
 0x72c   : > { %v2328_v33 = vmul.f32 %v2227_v51, %v2008_v55  ;;  %v2231_v42 = vsub.f32 1.0, %v2230_v14  ;;  %v2238_v55 = vand.u32 2147483647, %v4554_v24  ;;  %vm2249_vm3 = vweird.f32 %v2074_v41 }
 0x72d   : > { %v4576_v9 = vpop.f32.mrf.mxu1  ;;  %v2256_v52 = vor.u32 1.1754944e-38, %v2255_v6  ;;  %vm2254_vm5 = vcmp.eq.f32.partialorder %v2253_v37, 8.507059e+37 }
 0x72e   : > { %v2339_v46 = vpack.c.bf16 %v2328_v33, %v2327_v7  ;;  %v2232_v28 = vmul.f32 %v3133_v29, %v2231_v42  ;;  %v2012_v48 = vmax.f32 %v4576_v9, 0.0  ;;  %vm2239_vm2 = vcmp.eq.f32.partialorder %v2238_v55, 8.507059e+37 }
 0x730   : > { %v3135_v10 = vpop.eup %3134  ;;  %v2852_v58 = vmul.f32 -1.442695, %v2012_v48  ;;  %2875 = vmatmul.msk.bf16.gmra.mxu2 %vm738_vm1, %v2339_v46  ;;  %v2233_v2 = vadd.f32 %v3133_v29, %v2232_v28 }
 0x731   : > { %v3137_v60 = vpop.eup %3136  ;;  %v4582_v0 = vadd.f32 1.0, %v3135_v10 }
 0x732   : > { %v2245_v62 = vmul.f32 %v3137_v60, %v2074_v41  ;;  %3138 = vpow2.f32 %v2852_v58  ;;  %v2237_v30 = vsel %vm4588_vm14, %v3133_v29, %v2233_v2  ;;  %vm2250_vm15 = vweird.f32 %v3137_v60 }
 0x733   : > { %3140 = vrcp.f32 %v4582_v0  ;;  %v2242_v47 = vsel %vm2239_vm2, %v2241_v61, %v2237_v30  ;;  %vm2251_vm4 = vmor %vm2249_vm3, %vm2250_vm15  ;;  %v2270_v44 = vand.u32 2147483648, %v4582_v0  ;;  %vm2264_vm7 = vweird.f32 %v4582_v0 }
 0x734   : > { %v2246_v15 = vsub.f32 1.0, %v2245_v62  ;;  %v2329_v29 = vmul.f32 %v2242_v47, %v2009_v35 }
 0x735   : > { %v4592_v25 = vpop.f32.mrf.mxu1  ;;  %v2271_v62 = vor.u32 1.1754944e-38, %v2270_v44 }
 0x736   : > { %v2247_v57 = vmul.f32 %v3137_v60, %v2246_v15  ;;  %v2013_v11 = vmax.f32 %v4592_v25, 0.0 }
 0x738   : > { %v3139_v23 = vpop.eup %3138  ;;  %v2248_v24 = vadd.f32 %v3137_v60, %v2247_v57  ;;  %v2853_v26 = vmul.f32 -1.442695, %v2013_v11 }
 0x739   : > { %v3141_v13 = vpop.eup %3140  ;;  %v2076_v16 = vadd.f32 1.0, %v3139_v23 }
 0x73a   : > { %v2252_v5 = vsel %vm2251_vm4, %v3137_v60, %v2248_v24  ;;  %v2260_v45 = vmul.f32 %v3141_v13, %v4582_v0  ;;  %3142 = vpow2.f32 %v2853_v26  ;;  %vm2265_vm6 = vweird.f32 %v3141_v13 }
 0x73b   : > { %v2257_v31 = vsel %vm2254_vm5, %v2256_v52, %v2252_v5  ;;  %3144 = vrcp.f32 %v2076_v16  ;;  %vm2266_vm8 = vmor %vm2264_vm7, %vm2265_vm6  ;;  %v2285_v10 = vand.u32 2147483648, %v2076_v16  ;;  %v2283_v2 = vand.u32 2147483647, %v2076_v16 }
 0x73c   : > { %v2330_v17 = vmul.f32 %v2257_v31, %v2010_v38  ;;  %v2261_v63 = vsub.f32 1.0, %v2260_v45  ;;  %v2268_v38 = vand.u32 2147483647, %v4582_v0  ;;  %vm2279_vm11 = vweird.f32 %v2076_v16 }
 0x73d   : > { %v4604_v41 = vpop.f32.mrf.mxu1  ;;  %v2286_v37 = vor.u32 1.1754944e-38, %v2285_v10  ;;  %vm2284_vm13 = vcmp.eq.f32.partialorder %v2283_v2, 8.507059e+37 }
 0x73e   : > { %v2340_v19 = vpack.c.bf16 %v2330_v17, %v2329_v29  ;;  %v2262_v14 = vmul.f32 %v3141_v13, %v2261_v63  ;;  %v2014_v51 = vmax.f32 %v4604_v41, 0.0  ;;  %vm2269_vm10 = vcmp.eq.f32.partialorder %v2268_v38, 8.507059e+37 }
 0x740   : > { %v3143_v7 = vpop.eup %3142  ;;  %v2854_v33 = vmul.f32 -1.442695, %v2014_v51  ;;  %2876 = vmatmul.msk.bf16.gmra.mxu2 %vm738_vm1, %v2340_v19  ;;  %v2263_v1 = vadd.f32 %v3141_v13, %v2262_v14 }
 0x741   : > { %v3145_v42 = vpop.eup %3144  ;;  %v2077_v46 = vadd.f32 1.0, %v3143_v7 }
 0x742   : > { %v2275_v35 = vmul.f32 %v3145_v42, %v2076_v16  ;;  %3146 = vpow2.f32 %v2854_v33  ;;  %v2267_v58 = vsel %vm2266_vm8, %v3141_v13, %v2263_v1  ;;  %vm2280_vm9 = vweird.f32 %v3145_v42 }
 0x743   : > { %3148 = vrcp.f32 %v2077_v46  ;;  %v2272_v50 = vsel %vm2269_vm10, %v2271_v62, %v2267_v58  ;;  %vm2281_vm12 = vmor %vm2279_vm11, %vm2280_vm9  ;;  %v2300_v5 = vand.u32 2147483648, %v2077_v46  ;;  %vm2294_vm15 = vweird.f32 %v2077_v46 }
 0x744   : > { %v2276_v28 = vsub.f32 1.0, %v2275_v35  ;;  %v2331_v61 = vmul.f32 %v2272_v50, %v2011_v8  ;;  %v2298_v45 = vand.u32 2147483647, %v2077_v46 }
 0x746   : > { %v2277_v60 = vmul.f32 %v3145_v42, %v2276_v28  ;;  %vm2299_vm4 = vcmp.eq.f32.partialorder %v2298_v45, 8.507059e+37 }
 0x748   : > { %v3147_v22 = vpop.eup %3146  ;;  %v2278_v55 = vadd.f32 %v3145_v42, %v2277_v60 }
 0x749   : > { %v3149_v15 = vpop.eup %3148  ;;  %v2078_v6 = vadd.f32 1.0, %v3147_v22 }
 0x74a   : > { %v2282_v30 = vsel %vm2281_vm12, %v3145_v42, %v2278_v55  ;;  %v2290_v0 = vmul.f32 %v3149_v15, %v2077_v46  ;;  %vm2295_vm14 = vweird.f32 %v3149_v15 }
 0x74b   : > { %v2287_v57 = vsel %vm2284_vm13, %v2286_v37, %v2282_v30  ;;  %3150 = vrcp.f32 %v2078_v6  ;;  %vm2296_vm2 = vmor %vm2294_vm15, %vm2295_vm14  ;;  %v2315_v29 = vand.u32 2147483648, %v2078_v6  ;;  %v2313_v9 = vand.u32 2147483647, %v2078_v6 }
 0x74c   : > { %v2332_v23 = vmul.f32 %v2287_v57, %v2012_v48  ;;  %v2291_v24 = vsub.f32 1.0, %v2290_v0  ;;  %v2301_v48 = vor.u32 1.1754944e-38, %v2300_v5  ;;  %vm2309_vm5 = vweird.f32 %v2078_v6 }
 0x74d   : > { %v2316_v19 = vor.u32 1.1754944e-38, %v2315_v29  ;;  %vm2314_vm7 = vcmp.eq.f32.partialorder %v2313_v9, 8.507059e+37 }
 0x74e   : > { %v2341_v26 = vpack.c.bf16 %v2332_v23, %v2331_v61  ;;  %v2292_v13 = vmul.f32 %v3149_v15, %v2291_v24 }
 0x750   : > { %2877 = vmatmul.msk.bf16.gmra.mxu2 %vm738_vm1, %v2341_v26  ;;  %v2293_v52 = vadd.f32 %v3149_v15, %v2292_v13 }
 0x751   : > { %v3151_v47 = vpop.eup %3150 }
 0x752   : > { %v2305_v16 = vmul.f32 %v3151_v47, %v2078_v6  ;;  %v2297_v54 = vsel %vm2296_vm2, %v3149_v15, %v2293_v52  ;;  %vm2310_vm3 = vweird.f32 %v3151_v47 }
 0x753   : > { %v2302_v63 = vsel %vm2299_vm4, %v2301_v48, %v2297_v54  ;;  %vm2311_vm6 = vmor %vm2309_vm5, %vm2310_vm3 }
 0x754   : > { %v2306_v31 = vsub.f32 1.0, %v2305_v16  ;;  %v2333_v33 = vmul.f32 %v2302_v63, %v2013_v11 }
 0x756   : > { %v2307_v8 = vmul.f32 %v3151_v47, %v2306_v31 }
 0x758   : > { %v2308_v17 = vadd.f32 %v3151_v47, %v2307_v8 }
 0x75a   : > { %v2312_v14 = vsel %vm2311_vm6, %v3151_v47, %v2308_v17 }
 0x75b   : > { %v2317_v7 = vsel %vm2314_vm7, %v2316_v19, %v2312_v14 }
 0x75c   : > { %v2334_v42 = vmul.f32 %v2317_v7, %v2014_v51 }
 0x75e   : > { %v2342_v46 = vpack.c.bf16 %v2334_v42, %v2333_v33 }
 0x760   : > { %2878 = vmatmul.msk.bf16.gmra.mxu2 %vm738_vm1, %v2342_v46 }
 0x773   : > { %v2408_v1 = vpop.f32.mrf.mxu2 }
 0x774   : > { %v4624_v35 = vadd.f32 %v2408_v1, %v4126_v18 }
 0x776   : > { %v2464_v28 = vsel %vm358_vm0, %v4624_v35, 0.0 }
 0x77b   : > { %v2410_v44 = vpop.f32.mrf.mxu2 }
 0x77c   : > { %v4627_v38 = vadd.f32 %v2410_v44, %v4136_v36 }
 0x77e   : > { %v2465_v25 = vsel %vm358_vm0, %v4627_v38, 0.0 }
 0x77f   : > { %v2466_v11 = vadd.f32 %v2465_v25, %v2464_v28 }
 0x783   : > { %v2413_v41 = vpop.f32.mrf.mxu2 }
 0x784   : > { %v4634_v51 = vadd.f32 %v2413_v41, %v4133_v32 }
 0x786   : > { %v2467_v10 = vsel %vm358_vm0, %v4634_v51, 0.0 }
 0x787   : > { %v2468_v18 = vadd.f32 %v2467_v10, %v2466_v11 }
 0x78b   : > { %v2415_v58 = vpop.f32.mrf.mxu2 }
 0x78c   : > { %v2451_v60 = vadd.f32 %v2415_v58, %v4129_v3 }
 0x78e   : > { %v2469_v36 = vsel %vm358_vm0, %v2451_v60, 0.0 }
 0x78f   : > { %v2470_v2 = vadd.f32 %v2469_v36, %v2468_v18 }
 0x793   : > { %v2418_v62 = vpop.f32.mrf.mxu2 }
 0x794   : > { %v2452_v22 = vadd.f32 %v2418_v62, %v4147_v27 }
 0x796   : > { %v2471_v55 = vsel %vm358_vm0, %v2452_v22, 0.0 }
 0x797   : > { %v2472_v15 = vadd.f32 %v2471_v55, %v2470_v2 }
 0x79b   : > { %v2420_v50 = vpop.f32.mrf.mxu2 }
 0x79c   : > { %v2453_v23 = vadd.f32 %v2420_v50, %v4144_v39 }
 0x79e   : > { %v2473_v24 = vsel %vm358_vm0, %v2453_v23, 0.0 }
 0x79f   : > { %v2474_v47 = vadd.f32 %v2473_v24, %v2472_v15 }
 0x7a3   : > { %v2423_v37 = vpop.f32.mrf.mxu2 }
 0x7a4   : > { %v2454_v3 = vadd.f32 %v2423_v37, %v4177_v59 }
 0x7a6   : > { %v2475_v27 = vsel %vm358_vm0, %v2454_v3, 0.0 }
 0x7a7   : > { %v2476_v45 = vadd.f32 %v2475_v27, %v2474_v47 }
 0x7ab   : > { %v2425_v32 = vpop.f32.mrf.mxu2 }
 0x7ac   : > { %v2455_v26 = vadd.f32 %v2425_v32, %v4174_v12 }
 0x7ae   : > { %v2477_v16 = vsel %vm358_vm0, %v2455_v26, 0.0 }
 0x7af   : > { %v2478_v59 = vadd.f32 %v2477_v16, %v2476_v45 }
 0x7b3   : > { %v2428_v6 = vpop.f32.mrf.mxu2 }
 0x7b4   : > { %v2456_v13 = vadd.f32 %v2428_v6, %v4217_v40 }
 0x7b6   : > { %v2479_v31 = vsel %vm358_vm0, %v2456_v13, 0.0 }
 0x7b7   : > { %v2480_v54 = vadd.f32 %v2479_v31, %v2478_v59 }
 0x7bb   : > { %v2430_v30 = vpop.f32.mrf.mxu2 }
 0x7bc   : > { %v2457_v5 = vadd.f32 %v2430_v30, %v4220_v53 }
 0x7be   : > { %v2481_v29 = vsel %vm358_vm0, %v2457_v5, 0.0 }
 0x7bf   : > { %v2482_v9 = vadd.f32 %v2481_v29, %v2480_v54 }
 0x7c3   : > { %v2433_v0 = vpop.f32.mrf.mxu2 }
 0x7c4   : > { %v2458_v39 = vadd.f32 %v2433_v0, %v4271_v43 }
 0x7c6   : > { %v2483_v8 = vsel %vm358_vm0, %v2458_v39, 0.0 }
 0x7c7   : > { %v2484_v63 = vadd.f32 %v2483_v8, %v2482_v9 }
 0x7cb   : > { %v2435_v57 = vpop.f32.mrf.mxu2 }
 0x7cc   : > { %v2459_v12 = vadd.f32 %v2435_v57, %v4268_v49 }
 0x7ce   : > { %v2485_v17 = vsel %vm358_vm0, %v2459_v12, 0.0 }
 0x7cf   : > { %v2486_v14 = vadd.f32 %v2485_v17, %v2484_v63 }
 0x7d3   : > { %v2438_v61 = vpop.f32.mrf.mxu2 }
 0x7d4   : > { %v2460_v40 = vadd.f32 %v2438_v61, %v4329_v34 }
 0x7d6   : > { %v2487_v19 = vsel %vm358_vm0, %v2460_v40, 0.0 }
 0x7d7   : > { %v2488_v7 = vadd.f32 %v2487_v19, %v2486_v14 }
 0x7db   : > { %v2440_v52 = vpop.f32.mrf.mxu2 }
 0x7dc   : > { %v2461_v53 = vadd.f32 %v2440_v52, %v4324_v20 }
 0x7de   : > { %v2489_v49 = vsel %vm358_vm0, %v2461_v53, 0.0 }
 0x7df   : > { %v2490_v34 = vadd.f32 %v2489_v49, %v2488_v7 }
 0x7e3   : > { %v2443_v48 = vpop.f32.mrf.mxu2 }
 0x7e4   : > { %v4660_v43 = vadd.f32 %v2443_v48, %v4367_v4 }
 0x7e6   : > { %v2491_v33 = vsel %vm358_vm0, %v4660_v43, 0.0 }
 0x7e7   : > { %v2492_v1 = vadd.f32 %v2491_v33, %v2490_v34 }
 0x7eb   : > { %v2445_v42 = vpop.f32.mrf.mxu2 }
 0x7ec   : > { %v2463_v46 = vadd.f32 %v2445_v42, %v4372_v21 }
 0x7ee   : > { %v2493_v20 = vsel %vm358_vm0, %v2463_v46, 0.0 }
 0x7ef   : > { %v2494_v44 = vadd.f32 %v2493_v20, %v2492_v1 }
 0x7f1   : > { %v2495_v28 = vrot.slane %v2494_v44, 4 }
 0x7f3   : > { %v2496_v25 = vadd.f32 %v2495_v28, %v2494_v44 }
 0x7f5   : > { %v2497_v11 = vrot.slane %v2496_v25, 2 }
 0x7f7   : > { %v2498_v4 = vadd.f32 %v2497_v11, %v2496_v25 }
 0x7f9   : > { %v2499_v41 = vrot.slane %v2498_v4, 1 }
 0x7fb   : > { %v2500_v10 = vadd.f32 %v2499_v41, %v2498_v4 }
 0x7fd   : > { %v2501_v18 = vmul.f32 %v2500_v10, %v3916_v56 }
 0x7ff   : > { %v4669_v58 = vsub.f32 %v4624_v35, %v2501_v18  ;;  %v4672_v36 = vsub.f32 %v4627_v38, %v2501_v18  ;;  %v4675_v21 = vsub.f32 %v4634_v51, %v2501_v18  ;;  %v4677_v2 = vsub.f32 %v2451_v60, %v2501_v18 }
 0x800   : > { %v4679_v62 = vsub.f32 %v2452_v22, %v2501_v18  ;;  %v4687_v50 = vsub.f32 %v2453_v23, %v2501_v18  ;;  %v4693_v37 = vsub.f32 %v2454_v3, %v2501_v18  ;;  %v4698_v0 = vsub.f32 %v2455_v26, %v2501_v18 }
 0x801   : > { %v2518_v55 = vmul.f32 %v4669_v58, %v4669_v58  ;;  %v2519_v15 = vmul.f32 %v4672_v36, %v4672_v36  ;;  %v2520_v35 = vmul.f32 %v4675_v21, %v4675_v21  ;;  %v2521_v38 = vmul.f32 %v4677_v2, %v4677_v2 }
 0x802   : > { %v2522_v32 = vmul.f32 %v4679_v62, %v4679_v62  ;;  %v2523_v57 = vmul.f32 %v4687_v50, %v4687_v50  ;;  %v4703_v24 = vsub.f32 %v2456_v13, %v2501_v18  ;;  %v2524_v3 = vmul.f32 %v4693_v37, %v4693_v37 }
 0x803   : > { %v2534_v51 = vsel %vm358_vm0, %v2518_v55, 0.0  ;;  %v2535_v60 = vsel %vm358_vm0, %v2519_v15, 0.0  ;;  %v2537_v6 = vsel %vm358_vm0, %v2520_v35, 0.0  ;;  %v2539_v61 = vsel %vm358_vm0, %v2521_v38, 0.0 }
 0x804   : > { %v2536_v22 = vadd.f32 %v2535_v60, %v2534_v51  ;;  %v2541_v27 = vsel %vm358_vm0, %v2522_v32, 0.0  ;;  %v4708_v52 = vsub.f32 %v2457_v5, %v2501_v18  ;;  %v2525_v26 = vmul.f32 %v4698_v0, %v4698_v0 }
 0x805   : > { %v2543_v16 = vsel %vm358_vm0, %v2523_v57, 0.0  ;;  %v4713_v31 = vsub.f32 %v2458_v39, %v2501_v18  ;;  %v2526_v13 = vmul.f32 %v4703_v24, %v4703_v24  ;;  %v2545_v59 = vsel %vm358_vm0, %v2524_v3, 0.0 }
 0x806   : > { %v2538_v30 = vadd.f32 %v2537_v6, %v2536_v22  ;;  %v4718_v54 = vsub.f32 %v2459_v12, %v2501_v18  ;;  %v2527_v5 = vmul.f32 %v4708_v52, %v4708_v52  ;;  %v2547_v8 = vsel %vm358_vm0, %v2525_v26, 0.0 }
 0x807   : > { %v4723_v48 = vsub.f32 %v2460_v40, %v2501_v18  ;;  %v2528_v39 = vmul.f32 %v4713_v31, %v4713_v31  ;;  %v2549_v17 = vsel %vm358_vm0, %v2526_v13, 0.0  ;;  %v4728_v19 = vsub.f32 %v2461_v53, %v2501_v18 }
 0x808   : > { %v2540_v23 = vadd.f32 %v2539_v61, %v2538_v30  ;;  %v2529_v12 = vmul.f32 %v4718_v54, %v4718_v54  ;;  %v2551_v14 = vsel %vm358_vm0, %v2527_v5, 0.0  ;;  %v4734_v7 = vsub.f32 %v4660_v43, %v2501_v18 }
 0x809   : > { %v2530_v40 = vmul.f32 %v4723_v48, %v4723_v48  ;;  %v2553_v33 = vsel %vm358_vm0, %v2528_v39, 0.0  ;;  %v4739_v42 = vsub.f32 %v2463_v46, %v2501_v18  ;;  %v2531_v53 = vmul.f32 %v4728_v19, %v4728_v19 }
 0x80a   : > { %v2542_v47 = vadd.f32 %v2541_v27, %v2540_v23  ;;  %v2555_v1 = vsel %vm358_vm0, %v2529_v12, 0.0  ;;  %v2532_v44 = vmul.f32 %v4734_v7, %v4734_v7 }
 0x80b   : > { %v2557_v43 = vsel %vm358_vm0, %v2530_v40, 0.0  ;;  %v2533_v25 = vmul.f32 %v4739_v42, %v4739_v42  ;;  %v2559_v11 = vsel %vm358_vm0, %v2531_v53, 0.0 }
 0x80c   : > { %v2544_v45 = vadd.f32 %v2543_v16, %v2542_v47  ;;  %v2561_v46 = vsel %vm358_vm0, %v2532_v44, 0.0 }
 0x80d   : > { %v2563_v10 = vsel %vm358_vm0, %v2533_v25, 0.0 }
 0x80e   : > { %v2546_v29 = vadd.f32 %v2545_v59, %v2544_v45 }
 0x810   : > { %v2548_v9 = vadd.f32 %v2547_v8, %v2546_v29 }
 0x812   : > { %v2550_v63 = vadd.f32 %v2549_v17, %v2548_v9 }
 0x814   : > { %v2552_v49 = vadd.f32 %v2551_v14, %v2550_v63 }
 0x816   : > { %v2554_v34 = vadd.f32 %v2553_v33, %v2552_v49 }
 0x818   : > { %v2556_v20 = vadd.f32 %v2555_v1, %v2554_v34 }
 0x81a   : > { %v2558_v28 = vadd.f32 %v2557_v43, %v2556_v20 }
 0x81c   : > { %v2560_v4 = vadd.f32 %v2559_v11, %v2558_v28 }
 0x81e   : > { %v2562_v41 = vadd.f32 %v2561_v46, %v2560_v4 }
 0x820   : > { %v2564_v18 = vadd.f32 %v2563_v10, %v2562_v41 }
 0x822   : > { %v2565_v55 = vrot.slane %v2564_v18, 4 }
 0x824   : > { %v2566_v15 = vadd.f32 %v2565_v55, %v2564_v18 }
 0x826   : > { %v2567_v35 = vrot.slane %v2566_v15, 2 }
 0x828   : > { %v2568_v38 = vadd.f32 %v2567_v35, %v2566_v15 }
 0x82a   : > { %v2569_v51 = vrot.slane %v2568_v38, 1 }
 0x82c   : > { %v2570_v60 = vadd.f32 %v2569_v51, %v2568_v38 }
 0x82e   : > { %v2571_v22 = vmul.f32 %v2570_v60, %v3916_v56  ;;  %v3171_v56 = vld [vmem:[%s4820_s6] sm:$0xff] }
 0x82f   : > { %v2599_v45 = vperm.slane %v3171_v56, 3 }
 0x830   : > { %v2572_v32 = vadd.f32 1e-05, %v2571_v22 }
 0x832   : > { %3152 = vrsqrt.f32 %v2572_v32  ;;  %vm2579_vm8 = vweird.f32 %v2572_v32 }
 0x838   : > { %v3153_v6 = vpop.eup %3152 }
 0x839   : > { %v2574_v30 = vmul.f32 %v3153_v6, %v2572_v32  ;;  %vm2580_vm1 = vweird.f32 %v3153_v6 }
 0x83a   : > { %vm2581_vm9 = vmor %vm2579_vm8, %vm2580_vm1 }
 0x83b   : > { %v2575_v57 = vmul.f32 %v3153_v6, %v2574_v30 }
 0x83d   : > { %v2576_v61 = vmul.f32 0.5, %v2575_v57 }
 0x83f   : > { %v2577_v23 = vsub.f32 1.5, %v2576_v61 }
 0x841   : > { %v2578_v3 = vmul.f32 %v3153_v6, %v2577_v23 }
 0x843   : > { %v2582_v27 = vsel %vm2581_vm9, %v3153_v6, %v2578_v3 }
 0x844   : > { %v2583_v47 = vmul.f32 %v2582_v27, %v4669_v58  ;;  %v2584_v26 = vmul.f32 %v2582_v27, %v4672_v36  ;;  %v2585_v16 = vmul.f32 %v2582_v27, %v4675_v21  ;;  %v2586_v13 = vmul.f32 %v2582_v27, %v4677_v2 }
 0x845   : > { %v2588_v59 = vmul.f32 %v2582_v27, %v4687_v50  ;;  %v2589_v29 = vmul.f32 %v2582_v27, %v4693_v37  ;;  %v2587_v5 = vmul.f32 %v2582_v27, %v4679_v62  ;;  %v2616_v36 = vperm.slane %v3171_v56, 4 }
 0x846   : > { %v2600_v8 = vmul.f32 %v2599_v45, %v2583_v47  ;;  %v2601_v58 = vmul.f32 %v2599_v45, %v2584_v26  ;;  %v2602_v9 = vmul.f32 %v2599_v45, %v2585_v16  ;;  %v2590_v39 = vmul.f32 %v2582_v27, %v4698_v0 }
 0x847   : > { %v2603_v21 = vmul.f32 %v2599_v45, %v2586_v13  ;;  %v2591_v17 = vmul.f32 %v2582_v27, %v4703_v24  ;;  %v2604_v63 = vmul.f32 %v2599_v45, %v2587_v5  ;;  %v2592_v2 = vmul.f32 %v2582_v27, %v4708_v52 }
 0x848   : > { %v2593_v62 = vmul.f32 %v2582_v27, %v4713_v31  ;;  %v2605_v50 = vmul.f32 %v2599_v45, %v2588_v59  ;;  %v2606_v37 = vmul.f32 %v2599_v45, %v2589_v29  ;;  %v2617_v12 = vadd.f32 %v2616_v36, %v2600_v8 }
 0x849   : > { %v2618_v0 = vadd.f32 %v2616_v36, %v2601_v58  ;;  %v2619_v14 = vadd.f32 %v2616_v36, %v2602_v9  ;;  %v2594_v24 = vmul.f32 %v2582_v27, %v4718_v54  ;;  %v2607_v49 = vmul.f32 %v2599_v45, %v2590_v39 }
 0x84a   : > { %v2620_v40 = vadd.f32 %v2616_v36, %v2603_v21  ;;  %v2595_v33 = vmul.f32 %v2582_v27, %v4723_v48  ;;  %v2608_v34 = vmul.f32 %v2599_v45, %v2591_v17  ;;  %v2621_v53 = vadd.f32 %v2616_v36, %v2604_v63  ;;  %2633 = vst.msk [vmem:[%s4770_s28] sm:$0xff] %vm358_vm0, %v2617_v12 }
 0x84b   : > { %v2596_v52 = vmul.f32 %v2582_v27, %v4728_v19  ;;  %v2609_v31 = vmul.f32 %v2599_v45, %v2592_v2  ;;  %v2622_v1 = vadd.f32 %v2616_v36, %v2605_v50  ;;  %2634 = vst.msk [vmem:[%s4770_s28 + $0x8] sm:$0xff] %vm358_vm0, %v2618_v0  ;;  %v2597_v20 = vmul.f32 %v2582_v27, %v4734_v7 }
 0x84c   : > { %v2610_v54 = vmul.f32 %v2599_v45, %v2593_v62  ;;  %v2623_v44 = vadd.f32 %v2616_v36, %v2606_v37  ;;  %2635 = vst.msk [vmem:[%s4770_s28 + $0x10] sm:$0xff] %vm358_vm0, %v2619_v14  ;;  %v2598_v48 = vmul.f32 %v2582_v27, %v4739_v42  ;;  %v2611_v43 = vmul.f32 %v2599_v45, %v2594_v24 }
 0x84d   : > { %v2624_v28 = vadd.f32 %v2616_v36, %v2607_v49  ;;  %2636 = vst.msk [vmem:[%s4770_s28 + $0x18] sm:$0xff] %vm358_vm0, %v2620_v40  ;;  %v2612_v19 = vmul.f32 %v2599_v45, %v2595_v33  ;;  %v2625_v25 = vadd.f32 %v2616_v36, %v2608_v34  ;;  %v2613_v7 = vmul.f32 %v2599_v45, %v2596_v52 }
 0x84e   : > { %2637 = vst.msk [vmem:[%s4770_s28 + $0x20] sm:$0xff] %vm358_vm0, %v2621_v53  ;;  %v2626_v11 = vadd.f32 %v2616_v36, %v2609_v31  ;;  %v2614_v4 = vmul.f32 %v2599_v45, %v2597_v20  ;;  %v2627_v42 = vadd.f32 %v2616_v36, %v2610_v54  ;;  %v2615_v46 = vmul.f32 %v2599_v45, %v2598_v48 }
 0x84f   : > { %2638 = vst.msk [vmem:[%s4770_s28 + $0x28] sm:$0xff] %vm358_vm0, %v2622_v1  ;;  %v2628_v41 = vadd.f32 %v2616_v36, %v2611_v43  ;;  %v2629_v10 = vadd.f32 %v2616_v36, %v2612_v19  ;;  %v2630_v18 = vadd.f32 %v2616_v36, %v2613_v7 }
 0x850   : > { %2639 = vst.msk [vmem:[%s4770_s28 + $0x30] sm:$0xff] %vm358_vm0, %v2623_v44  ;;  %v2631_v55 = vadd.f32 %v2616_v36, %v2614_v4  ;;  %v2632_v15 = vadd.f32 %v2616_v36, %v2615_v46 }
 0x851   : > { %2640 = vst.msk [vmem:[%s4770_s28 + $0x38] sm:$0xff] %vm358_vm0, %v2624_v28 }
 0x852   : > { %2641 = vst.msk [vmem:[%s4770_s28 + $0x40] sm:$0xff] %vm358_vm0, %v2625_v25 }
 0x853   : > { %2642 = vst.msk [vmem:[%s4770_s28 + $0x48] sm:$0xff] %vm358_vm0, %v2626_v11 }
 0x854   : > { %2643 = vst.msk [vmem:[%s4770_s28 + $0x50] sm:$0xff] %vm358_vm0, %v2627_v42 }
 0x855   : > { %2644 = vst.msk [vmem:[%s4770_s28 + $0x58] sm:$0xff] %vm358_vm0, %v2628_v41 }
 0x856   : > { %2645 = vst.msk [vmem:[%s4770_s28 + $0x60] sm:$0xff] %vm358_vm0, %v2629_v10 }
 0x857   : > { %2646 = vst.msk [vmem:[%s4770_s28 + $0x68] sm:$0xff] %vm358_vm0, %v2630_v18 }
 0x858   : > { %2647 = vst.msk [vmem:[%s4770_s28 + $0x70] sm:$0xff] %vm358_vm0, %v2631_v55 }
 0x859   : > { %2648 = vst.msk [vmem:[%s4770_s28 + $0x78] sm:$0xff] %vm358_vm0, %v2632_v15 }
 0x85a PF: > { %s17_s24 = sadd.s32 1, %s3178_s24  }
 0x85b   : > { %p14_p4 = scmp.ge.s32.totalorder %s17_s24, 10  }
 0x85d   :  { %16 = sbr.rel (!%p14_p4) target bundleno = 1 (0x1), region = 81 }

</bundles_post_ra>
